<compile_context>
chip_gen: v6e
topology: v6e:2x2x1
jax: 0.10.0
libtpu: 0.0.40
codegen_flags: <defaults>
</compile_context>

<pallas_src>
from functools import partial

import jax
import jax.numpy as jnp
from jax.experimental import pallas as pl
from jax.experimental.pallas import tpu as pltpu

NUM_H_LAYERS = 2          # opt['num_h_layers']
LANE_PAD = 128            # lane-dense width for HBM-stored projections / head
STREAM_TILE = 512         # node tile for the streaming (large-N) fallback


def _round_up(x, m):
    return (x + m - 1) // m * m


def _vmem_limit_bytes():
    # Per-generation scoped-VMEM budget: ~96 MiB on v5e/v6e (128 MiB physical),
    # ~48 MiB on v7x (64 MiB physical).  Falls back to the always-safe 48 MiB.
    try:
        cap = int(pltpu.get_tpu_info().vmem_capacity_bytes)
    except Exception:  # pragma: no cover - conservative fallback
        cap = 64 << 20
    return min(int(cap * 0.75), 100 << 20)


# ---------------------------------------------------------------------------
# Fused kernel: projection + all message-passing steps + head, VMEM-resident.
# ---------------------------------------------------------------------------
def fused_forward_kernel(x_ref, adj_ref, wpq_ref, wud_ref, wout_ref, bout_ref,
                         out_ref):
    h = wud_ref.shape[-1]
    num_h_layers = wud_ref.shape[0] // 2

    # Fused input projection:  pq = x @ [Wp | Wq | 0-pad]   (bf16 MXU, f32 out)
    pq = jnp.dot(x_ref[...], wpq_ref[...], preferred_element_type=jnp.float32)
    p = pq[:, :h]
    q = pq[:, h:2 * h]
    # dropout1 / dropout2: identity at inference.

    # Leapfrog message-passing; adjacency and weights stay VMEM-resident.
    # W is applied AFTER the aggregation:  A @ (q W) == (A @ q) @ W.
    for l in range(num_h_layers):
        agg = jnp.dot(adj_ref[...], q.astype(jnp.bfloat16),
                      preferred_element_type=jnp.float32)
        p = jnp.tanh(p + jnp.dot(agg.astype(jnp.bfloat16), wud_ref[2 * l],
                                 preferred_element_type=jnp.float32))
        agg = jnp.dot(adj_ref[...], p.astype(jnp.bfloat16),
                      preferred_element_type=jnp.float32)
        q = jnp.tanh(q + jnp.dot(agg.astype(jnp.bfloat16), wud_ref[2 * l + 1],
                                 preferred_element_type=jnp.float32))

    # Classifier head, lane-padded to 128 output columns (unmasked vst).
    out_ref[...] = (jnp.dot(q.astype(jnp.bfloat16), wout_ref[...],
                            preferred_element_type=jnp.float32)
                    + bout_ref[...])


def _fused_forward(x_pad, adj, w_pq_pad, w_ud, w_out_pad, b_out_pad,
                   vmem_limit):
    n_pad, f = x_pad.shape
    c_pad = w_out_pad.shape[1]
    return pl.pallas_call(
        fused_forward_kernel,
        out_shape=jax.ShapeDtypeStruct((n_pad, c_pad), jnp.float32),
        grid_spec=pltpu.PrefetchScalarGridSpec(
            num_scalar_prefetch=0,
            grid=(1,),
            in_specs=[
                pl.BlockSpec((n_pad, f), lambda i: (0, 0)),
                pl.BlockSpec((n_pad, n_pad), lambda i: (0, 0)),
                pl.BlockSpec(tuple(w_pq_pad.shape), lambda i: (0, 0)),
                pl.BlockSpec(tuple(w_ud.shape), lambda i: (0, 0, 0)),
                pl.BlockSpec(tuple(w_out_pad.shape), lambda i: (0, 0)),
                pl.BlockSpec(tuple(b_out_pad.shape), lambda i: (0, 0)),
            ],
            out_specs=pl.BlockSpec((n_pad, c_pad), lambda i: (0, 0)),
        ),
        compiler_params=pltpu.CompilerParams(
            dimension_semantics=("arbitrary",),
            vmem_limit_bytes=vmem_limit,
        ),
    )(x_pad, adj, w_pq_pad, w_ud, w_out_pad, b_out_pad)


# ---------------------------------------------------------------------------
# Streaming fallback kernels (large N): tiled, W hoisted out of the k-loop.
# ---------------------------------------------------------------------------
def proj_kernel(x_ref, wpq_ref, pq_ref):
    pq_ref[...] = jnp.dot(x_ref[...], wpq_ref[...],
                          preferred_element_type=jnp.float32
                          ).astype(pq_ref.dtype)


def mp_step_kernel(base_ref, src_ref, adj_ref, w_ref, out_ref, acc_ref):
    k = pl.program_id(1)

    @pl.when(k == 0)
    def _():
        acc_ref[...] = jnp.zeros_like(acc_ref)

    # Hoisted-W accumulation: only the adjacency contraction runs per k tile.
    acc_ref[...] += jnp.dot(adj_ref[...], src_ref[...],
                            preferred_element_type=jnp.float32)

    @pl.when(k == pl.num_programs(1) - 1)
    def _():
        upd = jnp.dot(acc_ref[...].astype(jnp.bfloat16), w_ref[...],
                      preferred_element_type=jnp.float32)
        out_ref[...] = jnp.tanh(base_ref[...].astype(jnp.float32)
                                + upd).astype(out_ref.dtype)


def head_kernel(q_ref, w_ref, b_ref, o_ref):
    o_ref[...] = (jnp.dot(q_ref[...], w_ref[...],
                          preferred_element_type=jnp.float32) + b_ref[...])


def _project(x_pad, w_pq_pad, tm, vmem_limit):
    n_pad, f = x_pad.shape
    c = w_pq_pad.shape[1]
    return pl.pallas_call(
        proj_kernel,
        out_shape=jax.ShapeDtypeStruct((n_pad, c), jnp.bfloat16),
        grid_spec=pltpu.PrefetchScalarGridSpec(
            num_scalar_prefetch=0,
            grid=(n_pad // tm,),
            in_specs=[
                pl.BlockSpec((tm, f), lambda i: (i, 0)),
                pl.BlockSpec((f, c), lambda i: (0, 0)),     # resident weight
            ],
            out_specs=pl.BlockSpec((tm, c), lambda i: (i, 0)),
        ),
        compiler_params=pltpu.CompilerParams(
            dimension_semantics=("parallel",),
            vmem_limit_bytes=vmem_limit,
        ),
    )(x_pad, w_pq_pad)


def _mp_step(base, src, adj, w, tm, tk, vmem_limit):
    n_pad, h = base.shape
    return pl.pallas_call(
        mp_step_kernel,
        out_shape=jax.ShapeDtypeStruct((n_pad, h), jnp.bfloat16),
        grid_spec=pltpu.PrefetchScalarGridSpec(
            num_scalar_prefetch=0,
            grid=(n_pad // tm, n_pad // tk),
            in_specs=[
                pl.BlockSpec((tm, h), lambda i, k: (i, 0)),      # base rows
                pl.BlockSpec((tk, h), lambda i, k: (k, 0)),      # agg source
                pl.BlockSpec((tm, tk), lambda i, k: (i, k)),     # bf16 adj
                pl.BlockSpec((h, h), lambda i, k: (0, 0)),       # resident W
            ],
            out_specs=pl.BlockSpec((tm, h), lambda i, k: (i, 0)),
            scratch_shapes=[pltpu.VMEM((tm, h), jnp.float32)],
        ),
        compiler_params=pltpu.CompilerParams(
            dimension_semantics=("parallel", "arbitrary"),
            vmem_limit_bytes=vmem_limit,
        ),
    )(base, src, adj, w)


def _head(q, w_out_pad, b_out_pad, tm, vmem_limit):
    n_pad, h = q.shape
    c_pad = w_out_pad.shape[1]
    return pl.pallas_call(
        head_kernel,
        out_shape=jax.ShapeDtypeStruct((n_pad, c_pad), jnp.float32),
        grid_spec=pltpu.PrefetchScalarGridSpec(
            num_scalar_prefetch=0,
            grid=(n_pad // tm,),
            in_specs=[
                pl.BlockSpec((tm, h), lambda i: (i, 0)),
                pl.BlockSpec((h, c_pad), lambda i: (0, 0)),
                pl.BlockSpec((1, c_pad), lambda i: (0, 0)),
            ],
            out_specs=pl.BlockSpec((tm, c_pad), lambda i: (i, 0)),
        ),
        compiler_params=pltpu.CompilerParams(
            dimension_semantics=("parallel",),
            vmem_limit_bytes=vmem_limit,
        ),
    )(q, w_out_pad, b_out_pad)


# ---------------------------------------------------------------------------
# Forward pass
# ---------------------------------------------------------------------------
@partial(jax.jit, static_argnames=("force_streaming",))
def sgnn_forward(x, edge_index, params, force_streaming=False):
    """x: [N, F] float32; edge_index: [2, E] int32 -> [N, num_classes]."""
    n, _ = x.shape
    h = params["w_p"].shape[1]
    c = params["w_out"].shape[1]
    num_h_layers = params["w_up"].shape[0]
    vmem_limit = _vmem_limit_bytes()

    # --- path / padding selection (static under jit) ------------------------
    n_align = _round_up(n, 128)
    fused_bytes = (2 * n_align * n_align * 2            # double-buffered bf16 adj
                   + 2 * n_align * LANE_PAD * 4 * 2     # padded output buffers
                   + 4 * n_align * LANE_PAD * 4         # pq/p/q/agg f32 temps
                   + (2 << 20))
    use_fused = (not force_streaming) and fused_bytes <= int(0.6 * vmem_limit)

    if use_fused:
        n_pad = n_align
        tm = tk = n_pad
    else:
        tm = tk = min(STREAM_TILE, n_align)
        n_pad = _round_up(n, tm)
        # TODO(synk): on v7x (2 TensorCores) cap tm at n_pad // 2 for large N
        # so the "parallel" row-tile axis keeps both cores busy.

    # --- glue: dense bf16 adjacency (messages flow src -> dst) --------------
    # Duplicate edges collapse to 1.0 (simple-graph semantics, same as before).
    src, dst = edge_index[0], edge_index[1]
    adj = jnp.zeros((n_pad, n_pad), jnp.bfloat16)
    adj = adj.at[dst, src].set(jnp.ones(dst.shape, jnp.bfloat16))

    x_pad = jnp.pad(x, ((0, n_pad - n), (0, 0))).astype(jnp.bfloat16)

    # Fused + lane-padded projection weights:  x @ [Wp | Wq | 0].
    two_h_pad = _round_up(2 * h, LANE_PAD)
    w_pq = jnp.concatenate([params["w_p"], params["w_q"]], axis=1)
    w_pq_pad = jnp.pad(w_pq, ((0, 0), (0, two_h_pad - 2 * h))
                       ).astype(jnp.bfloat16)

    # Interleaved [up_0, down_0, up_1, down_1, ...] HxH weights (bf16).
    w_ud = jnp.stack([params["w_up"], params["w_down"]], axis=1
                     ).reshape(2 * num_h_layers, h, h).astype(jnp.bfloat16)

    c_pad = _round_up(c, LANE_PAD)
    w_out_pad = jnp.pad(params["w_out"], ((0, 0), (0, c_pad - c))
                        ).astype(jnp.bfloat16)
    b_out_pad = jnp.pad(params["b_out"], ((0, 0), (0, c_pad - c)))

    if use_fused:
        out = _fused_forward(x_pad, adj, w_pq_pad, w_ud, w_out_pad, b_out_pad,
                             vmem_limit)
    else:
        pq = _project(x_pad, w_pq_pad, tm, vmem_limit)
        p, q = pq[:, :h], pq[:, h:2 * h]        # bf16 end-to-end
        # dropout1 / dropout2: identity at inference.
        for l in range(num_h_layers):
            p = _mp_step(p, q, adj, w_ud[2 * l], tm, tk, vmem_limit)
            q = _mp_step(q, p, adj, w_ud[2 * l + 1], tm, tk, vmem_limit)
        out = _head(q, w_out_pad, b_out_pad, tm, vmem_limit)

    return out[:n, :c]


def sgnn_reference(x, edge_index, params):
    """Pure-JAX f32 reference of the same forward (validation only)."""
    n = x.shape[0]
    src, dst = edge_index[0], edge_index[1]
    adj = jnp.zeros((n, n), jnp.float32).at[dst, src].set(1.0)
    p = x @ params["w_p"]
    q = x @ params["w_q"]
    for l in range(params["w_up"].shape[0]):
        p = jnp.tanh(p + adj @ (q @ params["w_up"][l]))
        q = jnp.tanh(q + adj @ (p @ params["w_down"][l]))
    return q @ params["w_out"] + params["b_out"]


def init_params(key, num_features, hidden, num_classes, num_h_layers):
    ks = jax.random.split(key, 6)
    scale_f = 1.0 / jnp.sqrt(num_features)
    scale_h = 1.0 / jnp.sqrt(hidden)
    return {
        "w_p": jax.random.uniform(ks[0], (num_features, hidden), jnp.float32,
                                  -scale_f, scale_f),
        "w_q": jax.random.uniform(ks[1], (num_features, hidden), jnp.float32,
                                  -scale_f, scale_f),
        "w_up": jax.random.uniform(ks[2], (num_h_layers, hidden, hidden),
                                   jnp.float32, -scale_h, scale_h),
        "w_down": jax.random.uniform(ks[3], (num_h_layers, hidden, hidden),
                                     jnp.float32, -scale_h, scale_h),
        "w_out": jax.random.uniform(ks[4], (hidden, num_classes), jnp.float32,
                                    -scale_h, scale_h),
        "b_out": jax.random.uniform(ks[5], (1, num_classes), jnp.float32,
                                    -scale_h, scale_h),
    }


if __name__ == "__main__":
    N = 256
    NUM_FEATURES = 32
    HIDDEN = 32
    NUM_CLASSES = 4

    key = jax.random.PRNGKey(0)
    kx, kp = jax.random.split(key)

    x = jax.random.normal(kx, (N, NUM_FEATURES), jnp.float32)

    # Small ring graph, both directions: E = 2 * N edges.
    idx = jnp.arange(N, dtype=jnp.int32)
    src = jnp.concatenate([idx, (idx + 1) % N])
    dst = jnp.concatenate([(idx + 1) % N, idx])
    edge_index = jnp.stack([src, dst], axis=0)   # [2, 2N]

    params = init_params(kp, NUM_FEATURES, HIDDEN, NUM_CLASSES, NUM_H_LAYERS)

    out_fused = sgnn_forward(x, edge_index, params)              # fused path
    out_stream = sgnn_forward(x, edge_index, params,
                              force_streaming=True)               # tiled path
    ref = sgnn_reference(x, edge_index, params)
    jax.block_until_ready((out_fused, out_stream, ref))

    assert out_fused.shape == (N, NUM_CLASSES)
    assert out_stream.shape == (N, NUM_CLASSES)
    assert bool(jnp.all(jnp.isfinite(out_fused)))
    assert bool(jnp.all(jnp.isfinite(out_stream)))
    # bf16 MXU operands vs. the f32 reference -> loose tolerance.
    assert float(jnp.max(jnp.abs(out_fused - ref))) < 2e-1
    assert float(jnp.max(jnp.abs(out_stream - ref))) < 2e-1
    print("KERNEL_OK")
</pallas_src>

<mosaic_0001>
module attributes {stable_mosaic.version = 11 : i64} {
  func.func @fused_forward_kernel(%arg0: i32, %arg1: memref<256x32xbf16, #tpu.memory_space<vmem>>, %arg2: memref<256x256xbf16, #tpu.memory_space<vmem>>, %arg3: memref<32x128xbf16, #tpu.memory_space<vmem>>, %arg4: memref<4x32x32xbf16, #tpu.memory_space<vmem>>, %arg5: memref<32x128xbf16, #tpu.memory_space<vmem>>, %arg6: memref<1x128xf32, #tpu.memory_space<vmem>>, %arg7: memref<256x128xf32, #tpu.memory_space<vmem>>) attributes {dimension_semantics = [#tpu.dimension_semantics<arbitrary>], iteration_bounds = array<i64: 1>, scalar_prefetch = 0 : i64, scratch_operands = 0 : i64, tpu.core_type = #tpu.core_type<tc>, window_params = [{pipeline_mode = #tpu.pipeline_mode<synchronous>, transform_indices = @transform_0, window_bounds = array<i64: 256, 32>}, {pipeline_mode = #tpu.pipeline_mode<synchronous>, transform_indices = @transform_1, window_bounds = array<i64: 256, 256>}, {pipeline_mode = #tpu.pipeline_mode<synchronous>, transform_indices = @transform_2, window_bounds = array<i64: 32, 128>}, {pipeline_mode = #tpu.pipeline_mode<synchronous>, transform_indices = @transform_3, window_bounds = array<i64: 4, 32, 32>}, {pipeline_mode = #tpu.pipeline_mode<synchronous>, transform_indices = @transform_4, window_bounds = array<i64: 32, 128>}, {pipeline_mode = #tpu.pipeline_mode<synchronous>, transform_indices = @transform_5, window_bounds = array<i64: 1, 128>}, {pipeline_mode = #tpu.pipeline_mode<synchronous>, transform_indices = @transform_6, window_bounds = array<i64: 256, 128>}]} {
    %c0 = arith.constant 0 : index
    %c0_0 = arith.constant 0 : index
    %0 = vector.load %arg1[%c0, %c0_0] : memref<256x32xbf16, #tpu.memory_space<vmem>>, vector<256x32xbf16>
    %c0_1 = arith.constant 0 : index
    %c0_2 = arith.constant 0 : index
    %1 = vector.load %arg3[%c0_1, %c0_2] : memref<32x128xbf16, #tpu.memory_space<vmem>>, vector<32x128xbf16>
    %cst = arith.constant dense<0.000000e+00> : vector<256x128xf32>
    %2 = tpu.matmul %0, %1, %cst {dimension_numbers = #tpu.dot_dimension_numbers<[1], [0], [0], [1], [0, 0, 1, 1], [], []>} : vector<256x32xbf16>, vector<32x128xbf16>, vector<256x128xf32> -> vector<256x128xf32>
    %3 = vector.extract_strided_slice %2 {offsets = [0, 0], sizes = [256, 32], strides = [1, 1]} : vector<256x128xf32> to vector<256x32xf32>
    %4 = vector.extract_strided_slice %2 {offsets = [0, 32], sizes = [256, 32], strides = [1, 1]} : vector<256x128xf32> to vector<256x32xf32>
    %c0_3 = arith.constant 0 : index
    %c0_4 = arith.constant 0 : index
    %5 = vector.load %arg2[%c0_3, %c0_4] : memref<256x256xbf16, #tpu.memory_space<vmem>>, vector<256x256xbf16>
    %6 = arith.truncf %4 : vector<256x32xf32> to vector<256x32xbf16>
    %cst_5 = arith.constant dense<0.000000e+00> : vector<256x32xf32>
    %7 = tpu.matmul %5, %6, %cst_5 {dimension_numbers = #tpu.dot_dimension_numbers<[1], [0], [0], [1], [0, 0, 1, 1], [], []>} : vector<256x256xbf16>, vector<256x32xbf16>, vector<256x32xf32> -> vector<256x32xf32>
    %8 = arith.truncf %7 : vector<256x32xf32> to vector<256x32xbf16>
    %c0_6 = arith.constant 0 : index
    %c0_7 = arith.constant 0 : index
    %c0_8 = arith.constant 0 : index
    %9 = vector.load %arg4[%c0_6, %c0_7, %c0_8] : memref<4x32x32xbf16, #tpu.memory_space<vmem>>, vector<1x32x32xbf16>
    %10 = vector.shape_cast %9 : vector<1x32x32xbf16> to vector<32x32xbf16>
    %cst_9 = arith.constant dense<0.000000e+00> : vector<256x32xf32>
    %11 = tpu.matmul %8, %10, %cst_9 {dimension_numbers = #tpu.dot_dimension_numbers<[1], [0], [0], [1], [0, 0, 1, 1], [], []>} : vector<256x32xbf16>, vector<32x32xbf16>, vector<256x32xf32> -> vector<256x32xf32>
    %12 = arith.addf %3, %11 : vector<256x32xf32>
    %13 = math.tanh %12 : vector<256x32xf32>
    %c0_10 = arith.constant 0 : index
    %c0_11 = arith.constant 0 : index
    %14 = vector.load %arg2[%c0_10, %c0_11] : memref<256x256xbf16, #tpu.memory_space<vmem>>, vector<256x256xbf16>
    %15 = arith.truncf %13 : vector<256x32xf32> to vector<256x32xbf16>
    %cst_12 = arith.constant dense<0.000000e+00> : vector<256x32xf32>
    %16 = tpu.matmul %14, %15, %cst_12 {dimension_numbers = #tpu.dot_dimension_numbers<[1], [0], [0], [1], [0, 0, 1, 1], [], []>} : vector<256x256xbf16>, vector<256x32xbf16>, vector<256x32xf32> -> vector<256x32xf32>
    %17 = arith.truncf %16 : vector<256x32xf32> to vector<256x32xbf16>
    %c1 = arith.constant 1 : index
    %c0_13 = arith.constant 0 : index
    %c0_14 = arith.constant 0 : index
    %18 = vector.load %arg4[%c1, %c0_13, %c0_14] : memref<4x32x32xbf16, #tpu.memory_space<vmem>>, vector<1x32x32xbf16>
    %19 = vector.shape_cast %18 : vector<1x32x32xbf16> to vector<32x32xbf16>
    %cst_15 = arith.constant dense<0.000000e+00> : vector<256x32xf32>
    %20 = tpu.matmul %17, %19, %cst_15 {dimension_numbers = #tpu.dot_dimension_numbers<[1], [0], [0], [1], [0, 0, 1, 1], [], []>} : vector<256x32xbf16>, vector<32x32xbf16>, vector<256x32xf32> -> vector<256x32xf32>
    %21 = arith.addf %4, %20 : vector<256x32xf32>
    %22 = math.tanh %21 : vector<256x32xf32>
    %c0_16 = arith.constant 0 : index
    %c0_17 = arith.constant 0 : index
    %23 = vector.load %arg2[%c0_16, %c0_17] : memref<256x256xbf16, #tpu.memory_space<vmem>>, vector<256x256xbf16>
    %24 = arith.truncf %22 : vector<256x32xf32> to vector<256x32xbf16>
    %cst_18 = arith.constant dense<0.000000e+00> : vector<256x32xf32>
    %25 = tpu.matmul %23, %24, %cst_18 {dimension_numbers = #tpu.dot_dimension_numbers<[1], [0], [0], [1], [0, 0, 1, 1], [], []>} : vector<256x256xbf16>, vector<256x32xbf16>, vector<256x32xf32> -> vector<256x32xf32>
    %26 = arith.truncf %25 : vector<256x32xf32> to vector<256x32xbf16>
    %c2 = arith.constant 2 : index
    %c0_19 = arith.constant 0 : index
    %c0_20 = arith.constant 0 : index
    %27 = vector.load %arg4[%c2, %c0_19, %c0_20] : memref<4x32x32xbf16, #tpu.memory_space<vmem>>, vector<1x32x32xbf16>
    %28 = vector.shape_cast %27 : vector<1x32x32xbf16> to vector<32x32xbf16>
    %cst_21 = arith.constant dense<0.000000e+00> : vector<256x32xf32>
    %29 = tpu.matmul %26, %28, %cst_21 {dimension_numbers = #tpu.dot_dimension_numbers<[1], [0], [0], [1], [0, 0, 1, 1], [], []>} : vector<256x32xbf16>, vector<32x32xbf16>, vector<256x32xf32> -> vector<256x32xf32>
    %30 = arith.addf %13, %29 : vector<256x32xf32>
    %31 = math.tanh %30 : vector<256x32xf32>
    %c0_22 = arith.constant 0 : index
    %c0_23 = arith.constant 0 : index
    %32 = vector.load %arg2[%c0_22, %c0_23] : memref<256x256xbf16, #tpu.memory_space<vmem>>, vector<256x256xbf16>
    %33 = arith.truncf %31 : vector<256x32xf32> to vector<256x32xbf16>
    %cst_24 = arith.constant dense<0.000000e+00> : vector<256x32xf32>
    %34 = tpu.matmul %32, %33, %cst_24 {dimension_numbers = #tpu.dot_dimension_numbers<[1], [0], [0], [1], [0, 0, 1, 1], [], []>} : vector<256x256xbf16>, vector<256x32xbf16>, vector<256x32xf32> -> vector<256x32xf32>
    %35 = arith.truncf %34 : vector<256x32xf32> to vector<256x32xbf16>
    %c3 = arith.constant 3 : index
    %c0_25 = arith.constant 0 : index
    %c0_26 = arith.constant 0 : index
    %36 = vector.load %arg4[%c3, %c0_25, %c0_26] : memref<4x32x32xbf16, #tpu.memory_space<vmem>>, vector<1x32x32xbf16>
    %37 = vector.shape_cast %36 : vector<1x32x32xbf16> to vector<32x32xbf16>
    %cst_27 = arith.constant dense<0.000000e+00> : vector<256x32xf32>
    %38 = tpu.matmul %35, %37, %cst_27 {dimension_numbers = #tpu.dot_dimension_numbers<[1], [0], [0], [1], [0, 0, 1, 1], [], []>} : vector<256x32xbf16>, vector<32x32xbf16>, vector<256x32xf32> -> vector<256x32xf32>
    %39 = arith.addf %22, %38 : vector<256x32xf32>
    %40 = math.tanh %39 : vector<256x32xf32>
    %41 = arith.truncf %40 : vector<256x32xf32> to vector<256x32xbf16>
    %c0_28 = arith.constant 0 : index
    %c0_29 = arith.constant 0 : index
    %42 = vector.load %arg5[%c0_28, %c0_29] : memref<32x128xbf16, #tpu.memory_space<vmem>>, vector<32x128xbf16>
    %cst_30 = arith.constant dense<0.000000e+00> : vector<256x128xf32>
    %43 = tpu.matmul %41, %42, %cst_30 {dimension_numbers = #tpu.dot_dimension_numbers<[1], [0], [0], [1], [0, 0, 1, 1], [], []>} : vector<256x32xbf16>, vector<32x128xbf16>, vector<256x128xf32> -> vector<256x128xf32>
    %c0_31 = arith.constant 0 : index
    %c0_32 = arith.constant 0 : index
    %44 = vector.load %arg6[%c0_31, %c0_32] : memref<1x128xf32, #tpu.memory_space<vmem>>, vector<1x128xf32>
    %45 = vector.broadcast %44 : vector<1x128xf32> to vector<256x128xf32>
    %46 = arith.addf %43, %45 : vector<256x128xf32>
    %c0_33 = arith.constant 0 : index
    %c0_34 = arith.constant 0 : index
    %47 = vector.load %arg7[%c0_33, %c0_34] : memref<256x128xf32, #tpu.memory_space<vmem>>, vector<256x128xf32>
    tpu.vector_store %arg7[%c0_33, %c0_34], %46 {strides = array<i32>} : memref<256x128xf32, #tpu.memory_space<vmem>>, vector<256x128xf32>,
    return
  }
  func.func @transform_0(%arg0: i32) -> (i32, i32) {
    %c0_i32 = arith.constant 0 : i32
    %c0_i32_0 = arith.constant 0 : i32
    %c0_i32_1 = arith.constant 0 : i32
    return %c0_i32, %c0_i32_0 : i32, i32
  }
  func.func @transform_1(%arg0: i32) -> (i32, i32) {
    %c0_i32 = arith.constant 0 : i32
    %c0_i32_0 = arith.constant 0 : i32
    %c0_i32_1 = arith.constant 0 : i32
    return %c0_i32, %c0_i32_0 : i32, i32
  }
  func.func @transform_2(%arg0: i32) -> (i32, i32) {
    %c0_i32 = arith.constant 0 : i32
    %c0_i32_0 = arith.constant 0 : i32
    %c0_i32_1 = arith.constant 0 : i32
    return %c0_i32, %c0_i32_0 : i32, i32
  }
  func.func @transform_3(%arg0: i32) -> (i32, i32, i32) {
    %c0_i32 = arith.constant 0 : i32
    %c0_i32_0 = arith.constant 0 : i32
    %c0_i32_1 = arith.constant 0 : i32
    %c0_i32_2 = arith.constant 0 : i32
    return %c0_i32, %c0_i32_0, %c0_i32_1 : i32, i32, i32
  }
  func.func @transform_4(%arg0: i32) -> (i32, i32) {
    %c0_i32 = arith.constant 0 : i32
    %c0_i32_0 = arith.constant 0 : i32
    %c0_i32_1 = arith.constant 0 : i32
    return %c0_i32, %c0_i32_0 : i32, i32
  }
  func.func @transform_5(%arg0: i32) -> (i32, i32) {
    %c0_i32 = arith.constant 0 : i32
    %c0_i32_0 = arith.constant 0 : i32
    %c0_i32_1 = arith.constant 0 : i32
    return %c0_i32, %c0_i32_0 : i32, i32
  }
  func.func @transform_6(%arg0: i32) -> (i32, i32) {
    %c0_i32 = arith.constant 0 : i32
    %c0_i32_0 = arith.constant 0 : i32
    %c0_i32_1 = arith.constant 0 : i32
    return %c0_i32, %c0_i32_0 : i32, i32
  }
}

</mosaic_0001>

<bundles_post_ra>
// kernel: sgnn_forward.1
= control target key start
LH: loop header
LB: loop body
LE: loop exit
PB: predicated region body
PF: predicated region fallthrough
CT: control target
= control target key end

     0   :  { %vm152_vm0 = vcmask 261120   ;;  %s5928_s2 = inlined_call_operand.vmem [shape: bf16[32,128], index: 2, kind: input, shape index: {}]   ;;  %s5929_s0 = inlined_call_operand.vmem [shape: bf16[256,32], index: 0, kind: input, shape index: {}]   ;;  %s5930_s1 = inlined_call_operand.vmem [shape: bf16[256,256], index: 1, kind: input, shape index: {}]   ;;  %s5931_s3 = inlined_call_operand.vmem [shape: bf16[4,32,32], index: 3, kind: input, shape index: {}]   ;;  %s5932_s4 = inlined_call_operand.vmem [shape: bf16[32,128], index: 4, kind: input, shape index: {}]   ;;  %s5933_s5 = inlined_call_operand.vmem [shape: f32[1,128], index: 5, kind: input, shape index: {}]   ;;  %s5934_s6 = inlined_call_operand.vmem [shape: f32[256,128], index: 6, kind: output, shape index: {}]  }
   0x1   :  { %v4160_v0 = vld [vmem:[%s5928_s2 + $0x8] sm:$0xff]   ;;  %v4161_v1 = vld [vmem:[%s5928_s2] sm:$0xff]   ;;  %v4164_v4 = vld [vmem:[%s5929_s0 + $0x10] sm:$0xff]   ;;  %s4525_s2 = smov 32  }
   0x2   :  { %3926 = vmatprep.subr.bf16.mxu0 %v4160_v0  ;;  %v4162_v2 = vld [vmem:[%s5929_s0] sm:$0xff]   ;;  %v4163_v3 = vld [vmem:[%s5929_s0 + $0x8] sm:$0xff]   ;;  %v4165_v5 = vld [vmem:[%s5929_s0 + $0x18] sm:$0xff]  }
   0x3   :  { %3927 = vmatpush3.bf16.msra.mxu0 %v4160_v0  ;;  %3930 = vmatprep.mubr.msk.bf16.mxu0 %vm152_vm0, %v4162_v2  ;;  %v4166_v6 = vld [vmem:[%s5929_s0 + $0x20] sm:$0xff]   ;;  %v4167_v7 = vld [vmem:[%s5929_s0 + $0x28] sm:$0xff]   ;;  %v4168_v8 = vld [vmem:[%s5929_s0 + $0x30] sm:$0xff]  }
   0x4   :  { %3928 = vmatprep.subr.bf16.mxu0 %v4161_v1  ;;  %v4169_v9 = vld [vmem:[%s5929_s0 + $0x38] sm:$0xff]   ;;  %v4170_v10 = vld [vmem:[%s5929_s0 + $0x40] sm:$0xff]   ;;  %v4171_v11 = vld [vmem:[%s5929_s0 + $0x48] sm:$0xff]  }
   0x5   :  { %v4172_v12 = vld [vmem:[%s5929_s0 + $0x50] sm:$0xff]   ;;  %v4173_v13 = vld [vmem:[%s5929_s0 + $0x58] sm:$0xff]   ;;  %v4174_v14 = vld [vmem:[%s5929_s0 + $0x60] sm:$0xff]  }
   0x6   :  { %v4175_v15 = vld [vmem:[%s5929_s0 + $0x68] sm:$0xff]   ;;  %v4176_v16 = vld [vmem:[%s5929_s0 + $0x70] sm:$0xff]   ;;  %v4177_v17 = vld [vmem:[%s5929_s0 + $0x78] sm:$0xff]   ;;  %s4524_s0 = smov 96  }
   0x7   :  { %3929 = vmatpush3.bf16.msra.mxu0 %v4161_v1  ;;  %v4733_v62 = vld [vmem:[%s5930_s1 + $0x4] ss:$8 sps:$4 sm:$0xff]   ;;  %v4738_v63 = vld [vmem:[%s5930_s1 + $0x14] ss:$8 sps:$4 sm:$0xff]  }
   0x8   :  { %6043 = vst [vmem:[#allocation5_spill] sm:$0xff] %v4738_v63  ;;  %674 = vmatprep.mubr.bf16.mxu1 %v4738_v63 }
   0xa   :  { %3931 = vmatmul.mubr.msk.bf16.vlgmr.msra.gmra.mxu0 %vm152_vm0, %v4163_v3 }
   0xb   :  { %3934 = vmatprep.mubr.msk.bf16.mxu0 %vm152_vm0, %v4164_v4 }
  0x12   :  { %3935 = vmatmul.mubr.msk.bf16.gmra.mxu0 %vm152_vm0, %v4165_v5 }
  0x13   :  { %3938 = vmatprep.mubr.msk.bf16.mxu0 %vm152_vm0, %v4166_v6 }
  0x1a   :  { %3939 = vmatmul.mubr.msk.bf16.gmra.mxu0 %vm152_vm0, %v4167_v7 }
  0x1b   :  { %3942 = vmatprep.mubr.msk.bf16.mxu0 %vm152_vm0, %v4168_v8 }
  0x22   :  { %3943 = vmatmul.mubr.msk.bf16.gmra.mxu0 %vm152_vm0, %v4169_v9 }
  0x23   :  { %3946 = vmatprep.mubr.msk.bf16.mxu0 %vm152_vm0, %v4170_v10 }
  0x2a   :  { %3947 = vmatmul.mubr.msk.bf16.gmra.mxu0 %vm152_vm0, %v4171_v11 }
  0x2b   :  { %3950 = vmatprep.mubr.msk.bf16.mxu0 %vm152_vm0, %v4172_v12 }
  0x32   :  { %3951 = vmatmul.mubr.msk.bf16.gmra.mxu0 %vm152_vm0, %v4173_v13 }
  0x33   :  { %3954 = vmatprep.mubr.msk.bf16.mxu0 %vm152_vm0, %v4174_v14 }
  0x3a   :  { %3955 = vmatmul.mubr.msk.bf16.gmra.mxu0 %vm152_vm0, %v4175_v15 }
  0x3b   :  { %3958 = vmatprep.mubr.msk.bf16.mxu0 %vm152_vm0, %v4176_v16 }
  0x42   :  { %3959 = vmatmul.mubr.msk.bf16.gmra.mxu0 %vm152_vm0, %v4177_v17 }
  0x43   :  { %666 = vmatprep.mubr.bf16.mxu0 %v4733_v62 }
  0xca   :  { %v4631_v18 = vpop.f32.mrf.mxu0 }
  0xcc   :  { %v4633_v19 = vpop.f32.mrf.mxu0 }
  0xcd   :  { %6040 = vst [vmem:[#allocation2_spill] sm:$0xff] %v4633_v19 }
  0xce   :  { %v4635_v20 = vpop.f32.mrf.mxu0 }
  0xcf   :  { %v395_v1 = vpack.c.bf16 %v4635_v20, %v4631_v18 }
  0xd0   :  { %v4637_v21 = vpop.f32.mrf.mxu0 }
  0xd1   :  { %6041 = vst [vmem:[#allocation3_spill] sm:$0xff] %v4637_v21  ;;  %v394_v3 = vpack.c.bf16 %v4637_v21, %v4633_v19 }
  0xd2   :  { %v4639_v22 = vpop.f32.mrf.mxu0 }
  0xd4   :  { %v4641_v23 = vpop.f32.mrf.mxu0 }
  0xd6   :  { %v4643_v24 = vpop.f32.mrf.mxu0 }
  0xd7   :  { %v397_v59 = vpack.c.bf16 %v4643_v24, %v4639_v22 }
  0xd8   :  { %v4645_v25 = vpop.f32.mrf.mxu0 }
  0xd9   :  { %v396_v61 = vpack.c.bf16 %v4645_v25, %v4641_v23 }
  0xda   :  { %v4647_v26 = vpop.f32.mrf.mxu0 }
  0xdc   :  { %v4649_v27 = vpop.f32.mrf.mxu0 }
  0xde   :  { %v4651_v28 = vpop.f32.mrf.mxu0 }
  0xdf   :  { %v399_v55 = vpack.c.bf16 %v4651_v28, %v4647_v26 }
  0xe0   :  { %v4653_v29 = vpop.f32.mrf.mxu0 }
  0xe1   :  { %v398_v57 = vpack.c.bf16 %v4653_v29, %v4649_v27 }
  0xe2   :  { %v4655_v30 = vpop.f32.mrf.mxu0 }
  0xe4   :  { %v4657_v31 = vpop.f32.mrf.mxu0 }
  0xe6   :  { %v4659_v32 = vpop.f32.mrf.mxu0 }
  0xe7   :  { %v401_v52 = vpack.c.bf16 %v4659_v32, %v4655_v30 }
  0xe8   :  { %v4661_v33 = vpop.f32.mrf.mxu0 }
  0xe9   :  { %v400_v53 = vpack.c.bf16 %v4661_v33, %v4657_v31 }
  0xea   :  { %v4663_v34 = vpop.f32.mrf.mxu0 }
  0xec   :  { %v4665_v35 = vpop.f32.mrf.mxu0 }
  0xed   :  { %6042 = vst [vmem:[#allocation4_spill] sm:$0xff] %v4665_v35 }
  0xee   :  { %v4667_v36 = vpop.f32.mrf.mxu0 }
  0xef   :  { %v403_v0 = vpack.c.bf16 %v4667_v36, %v4663_v34 }
  0xf0   :  { %v4669_v37 = vpop.f32.mrf.mxu0 }
  0xf1   :  { %v402_v2 = vpack.c.bf16 %v4669_v37, %v4665_v35 }
  0xf2   :  { %v4671_v38 = vpop.f32.mrf.mxu0 }
  0xf4   :  { %v4673_v39 = vpop.f32.mrf.mxu0 }
  0xf6   :  { %v4675_v40 = vpop.f32.mrf.mxu0 }
  0xf7   :  { %v405_v58 = vpack.c.bf16 %v4675_v40, %v4671_v38 }
  0xf8   :  { %v4677_v41 = vpop.f32.mrf.mxu0 }
  0xf9   :  { %v404_v60 = vpack.c.bf16 %v4677_v41, %v4673_v39 }
  0xfa   :  { %v4679_v42 = vpop.f32.mrf.mxu0 }
  0xfc   :  { %v4681_v43 = vpop.f32.mrf.mxu0 }
  0xfe   :  { %v4683_v44 = vpop.f32.mrf.mxu0 }
  0xff   :  { %v407_v54 = vpack.c.bf16 %v4683_v44, %v4679_v42 }
 0x100   :  { %v4685_v45 = vpop.f32.mrf.mxu0 }
 0x101   :  { %v406_v56 = vpack.c.bf16 %v4685_v45, %v4681_v43 }
 0x102   :  { %v4687_v46 = vpop.f32.mrf.mxu0 }
 0x104   :  { %v4689_v47 = vpop.f32.mrf.mxu0 }
 0x106   :  { %v4691_v48 = vpop.f32.mrf.mxu0 }
 0x107   :  { %v409_v49 = vpack.c.bf16 %v4691_v48, %v4687_v46 }
 0x108   :  { %v4695_v50 = vpop.f32.mrf.mxu0 }
 0x109   :  { %616 = vrot.lane.b32.xlu0 %v409_v49, %s4524_s0  ;;  %v408_v51 = vpack.c.bf16 %v4695_v50, %v4689_v47 }
 0x10b   :  { %614 = vrot.lane.b32.xlu1 %v408_v51, %s4524_s0 }
 0x10d   :  { %600 = vrot.lane.b32.xlu0 %v401_v52, %s4524_s0  ;;  %v4758_v52 = vld [vmem:[%s5930_s1] ss:$8 sps:$4 sm:$0xff]  }
 0x10e   :  { %6044 = vst [vmem:[#allocation6_spill] sm:$0xff] %v4758_v52 }
 0x10f   :  { %598 = vrot.lane.b32.xlu1 %v400_v53, %s4524_s0  ;;  %v4763_v53 = vld [vmem:[%s5930_s1 + $0x10] ss:$8 sps:$4 sm:$0xff]  }
 0x110   :  { %6045 = vst [vmem:[#allocation7_spill] sm:$0xff] %v4763_v53 }
 0x111   :  { %612 = vrot.lane.b32.xlu0 %v407_v54, %s4524_s0  ;;  %v4768_v54 = vld [vmem:[%s5930_s1 + $0x24] ss:$8 sps:$4 sm:$0xff]  }
 0x112   :  { %6046 = vst [vmem:[#allocation8_spill] sm:$0xff] %v4768_v54 }
 0x113   :  { %596 = vrot.lane.b32.xlu1 %v399_v55, %s4524_s0  ;;  %v4776_v55 = vld [vmem:[%s5930_s1 + $0x20] ss:$8 sps:$4 sm:$0xff]  }
 0x114   :  { %6047 = vst [vmem:[#allocation9_spill] sm:$0xff] %v4776_v55 }
 0x115   :  { %610 = vrot.lane.b32.xlu0 %v406_v56, %s4524_s0  ;;  %v4781_v56 = vld [vmem:[%s5930_s1 + $0x34] ss:$8 sps:$4 sm:$0xff]  }
 0x116   :  { %6048 = vst [vmem:[#allocation10_spill] sm:$0xff] %v4781_v56 }
 0x117   :  { %594 = vrot.lane.b32.xlu1 %v398_v57, %s4524_s0  ;;  %v4788_v57 = vld [vmem:[%s5930_s1 + $0x30] ss:$8 sps:$4 sm:$0xff]  }
 0x118   :  { %6049 = vst [vmem:[#allocation11_spill] sm:$0xff] %v4788_v57 }
 0x119   :  { %608 = vrot.lane.b32.xlu0 %v405_v58, %s4524_s0  ;;  %v4793_v58 = vld [vmem:[%s5930_s1 + $0x44] ss:$8 sps:$4 sm:$0xff]  }
 0x11a   :  { %6050 = vst [vmem:[#allocation12_spill] sm:$0xff] %v4793_v58 }
 0x11b   :  { %592 = vrot.lane.b32.xlu1 %v397_v59, %s4524_s0  ;;  %v4800_v59 = vld [vmem:[%s5930_s1 + $0x40] ss:$8 sps:$4 sm:$0xff]  }
 0x11c   :  { %6051 = vst [vmem:[#allocation13_spill] sm:$0xff] %v4800_v59 }
 0x11d   :  { %606 = vrot.lane.b32.xlu0 %v404_v60, %s4524_s0  ;;  %v4805_v60 = vld [vmem:[%s5930_s1 + $0x54] ss:$8 sps:$4 sm:$0xff]  }
 0x11e   :  { %6052 = vst [vmem:[#allocation14_spill] sm:$0xff] %v4805_v60 }
 0x11f   :  { %590 = vrot.lane.b32.xlu1 %v396_v61, %s4524_s0  ;;  %v4812_v61 = vld [vmem:[%s5930_s1 + $0x50] ss:$8 sps:$4 sm:$0xff]  }
 0x120   :  { %6053 = vst [vmem:[#allocation15_spill] sm:$0xff] %v4812_v61 }
 0x121   :  { %604 = vrot.lane.b32.xlu0 %v403_v0, %s4524_s0  ;;  %v4817_v0 = vld [vmem:[%s5930_s1 + $0x64] ss:$8 sps:$4 sm:$0xff]  }
 0x122   :  { %6054 = vst [vmem:[#allocation16_spill] sm:$0xff] %v4817_v0 }
 0x123   :  { %588 = vrot.lane.b32.xlu1 %v395_v1, %s4524_s0  ;;  %v4824_v1 = vld [vmem:[%s5930_s1 + $0x60] ss:$8 sps:$4 sm:$0xff]  }
 0x124   :  { %6055 = vst [vmem:[#allocation17_spill] sm:$0xff] %v4824_v1 }
 0x125   :  { %602 = vrot.lane.b32.xlu0 %v402_v2, %s4524_s0  ;;  %v4829_v2 = vld [vmem:[%s5930_s1 + $0x74] ss:$8 sps:$4 sm:$0xff]  }
 0x126   :  { %6056 = vst [vmem:[#allocation18_spill] sm:$0xff] %v4829_v2 }
 0x127   :  { %586 = vrot.lane.b32.xlu1 %v394_v3, %s4524_s0  ;;  %v4836_v3 = vld [vmem:[%s5930_s1 + $0x70] ss:$8 sps:$4 sm:$0xff]  }
 0x128   :  { %6057 = vst [vmem:[#allocation19_spill] sm:$0xff] %v4836_v3 }
 0x17b   :  { %v617_v4 = vpop.permute.xlu0 %616 }
 0x17c   :  { %3388 = vmatprep.subr.bf16.mxu0 %v617_v4  ;;  %4142 = vmatprep.subr.bf16.mxu1 %v617_v4  ;;  %v4841_v4 = vld [vmem:[%s5930_s1 + $0x84] ss:$8 sps:$4 sm:$0xff]  }
 0x17d   :  { %v615_v5 = vpop.permute.xlu1 %614  ;;  %6058 = vst [vmem:[#allocation20_spill] sm:$0xff] %v4841_v4 }
 0x17f   :  { %v601_v6 = vpop.permute.xlu0 %600 }
 0x180   :  { %3389 = vmatpush3.bf16.msra.mxu0 %v601_v6  ;;  %4150 = vmatpush3.bf16.msra.mxu1 %v601_v6  ;;  %v4853_v6 = vld [vmem:[%s5930_s1 + $0x94] ss:$8 sps:$4 sm:$0xff]  }
 0x181   :  { %3390 = vmatprep.subr.bf16.mxu0 %v615_v5  ;;  %4143 = vmatprep.subr.bf16.mxu1 %v615_v5  ;;  %v599_v7 = vpop.permute.xlu1 %598  ;;  %v4848_v5 = vld [vmem:[%s5930_s1 + $0x80] ss:$8 sps:$4 sm:$0xff]   ;;  %6060 = vst [vmem:[#allocation22_spill] sm:$0xff] %v4853_v6 }
 0x182   :  { %6059 = vst [vmem:[#allocation21_spill] sm:$0xff] %v4848_v5 }
 0x183   :  { %v613_v8 = vpop.permute.xlu0 %612 }
 0x184   :  { %3391 = vmatpush3.bf16.msra.mxu0 %v599_v7  ;;  %4151 = vmatpush3.bf16.msra.mxu1 %v599_v7  ;;  %v4860_v7 = vld [vmem:[%s5930_s1 + $0x90] ss:$8 sps:$4 sm:$0xff]  }
 0x185   :  { %3392 = vmatprep.subr.bf16.mxu0 %v613_v8  ;;  %4144 = vmatprep.subr.bf16.mxu1 %v613_v8  ;;  %v597_v9 = vpop.permute.xlu1 %596  ;;  %6061 = vst [vmem:[#allocation23_spill] sm:$0xff] %v4860_v7  ;;  %v4865_v8 = vld [vmem:[%s5930_s1 + $0xa4] ss:$8 sps:$4 sm:$0xff]  }
 0x186   :  { %6062 = vst [vmem:[#allocation24_spill] sm:$0xff] %v4865_v8 }
 0x187   :  { %v611_v10 = vpop.permute.xlu0 %610 }
 0x188   :  { %3393 = vmatpush3.bf16.msra.mxu0 %v597_v9  ;;  %4152 = vmatpush3.bf16.msra.mxu1 %v597_v9  ;;  %v4872_v9 = vld [vmem:[%s5930_s1 + $0xa0] ss:$8 sps:$4 sm:$0xff]  }
 0x189   :  { %3394 = vmatprep.subr.bf16.mxu0 %v611_v10  ;;  %4145 = vmatprep.subr.bf16.mxu1 %v611_v10  ;;  %v595_v11 = vpop.permute.xlu1 %594  ;;  %6063 = vst [vmem:[#allocation25_spill] sm:$0xff] %v4872_v9  ;;  %v4226_v10 = vld [vmem:[%s5931_s3 + $0x8] sm:$0xff]  }
 0x18b   :  { %v609_v12 = vpop.permute.xlu0 %608 }
 0x18c   :  { %3395 = vmatpush3.bf16.msra.mxu0 %v595_v11  ;;  %4153 = vmatpush3.bf16.msra.mxu1 %v595_v11  ;;  %v4880_v11 = vld [vmem:[%s5930_s1 + $0xb4] ss:$8 sps:$4 sm:$0xff]  }
 0x18d   :  { %3396 = vmatprep.subr.bf16.mxu0 %v609_v12  ;;  %4146 = vmatprep.subr.bf16.mxu1 %v609_v12  ;;  %v593_v13 = vpop.permute.xlu1 %592  ;;  %6064 = vst [vmem:[#allocation26_spill] sm:$0xff] %v4880_v11  ;;  %v4227_v12 = vld [vmem:[%s5931_s3] sm:$0xff]  }
 0x18f   :  { %v607_v14 = vpop.permute.xlu0 %606 }
 0x190   :  { %3397 = vmatpush3.bf16.msra.mxu0 %v593_v13  ;;  %4154 = vmatpush3.bf16.msra.mxu1 %v593_v13  ;;  %v4890_v13 = vld [vmem:[%s5930_s1 + $0xb0] ss:$8 sps:$4 sm:$0xff]  }
 0x191   :  { %3398 = vmatprep.subr.bf16.mxu0 %v607_v14  ;;  %4147 = vmatprep.subr.bf16.mxu1 %v607_v14  ;;  %v591_v15 = vpop.permute.xlu1 %590  ;;  %6065 = vst [vmem:[#allocation27_spill] sm:$0xff] %v4890_v13  ;;  %v4895_v14 = vld [vmem:[%s5930_s1 + $0xc4] ss:$8 sps:$4 sm:$0xff]  }
 0x192   :  { %6066 = vst [vmem:[#allocation28_spill] sm:$0xff] %v4895_v14 }
 0x193   :  { %v605_v16 = vpop.permute.xlu0 %604 }
 0x194   :  { %3399 = vmatpush3.bf16.msra.mxu0 %v591_v15  ;;  %4155 = vmatpush3.bf16.msra.mxu1 %v591_v15  ;;  %v4902_v15 = vld [vmem:[%s5930_s1 + $0xc0] ss:$8 sps:$4 sm:$0xff]  }
 0x195   :  { %3400 = vmatprep.subr.bf16.mxu0 %v605_v16  ;;  %4148 = vmatprep.subr.bf16.mxu1 %v605_v16  ;;  %v589_v17 = vpop.permute.xlu1 %588  ;;  %6067 = vst [vmem:[#allocation29_spill] sm:$0xff] %v4902_v15  ;;  %v4907_v16 = vld [vmem:[%s5930_s1 + $0xd4] ss:$8 sps:$4 sm:$0xff]  }
 0x196   :  { %6068 = vst [vmem:[#allocation30_spill] sm:$0xff] %v4907_v16 }
 0x197   :  { %v603_v49 = vpop.permute.xlu0 %602 }
 0x198   :  { %3401 = vmatpush3.bf16.msra.mxu0 %v589_v17  ;;  %4156 = vmatpush3.bf16.msra.mxu1 %v589_v17  ;;  %v4914_v17 = vld [vmem:[%s5930_s1 + $0xd0] ss:$8 sps:$4 sm:$0xff]  }
 0x199   :  { %3402 = vmatprep.subr.bf16.mxu0 %v603_v49  ;;  %4149 = vmatprep.subr.bf16.mxu1 %v603_v49  ;;  %v587_v51 = vpop.permute.xlu1 %586  ;;  %6069 = vst [vmem:[#allocation31_spill] sm:$0xff] %v4914_v17  ;;  %v4919_v49 = vld [vmem:[%s5930_s1 + $0xe4] ss:$8 sps:$4 sm:$0xff]  }
 0x19a   :  { %6070 = vst [vmem:[#allocation32_spill] sm:$0xff] %v4919_v49 }
 0x19c   :  { %3403 = vmatpush3.bf16.msra.mxu0 %v587_v51  ;;  %4157 = vmatpush3.bf16.msra.mxu1 %v587_v51  ;;  %v4926_v51 = vld [vmem:[%s5930_s1 + $0xe0] ss:$8 sps:$4 sm:$0xff]  }
 0x19d   :  { %3962 = vmatprep.subr.bf16.mxu0 %v4226_v10  ;;  %6071 = vst [vmem:[#allocation33_spill] sm:$0xff] %v4926_v51 }
 0x19f   :  { %667 = vmatmul.mubr.bf16.vlgmr.msra.gmra.mxu0 %v4758_v52  ;;  %675 = vmatmul.mubr.bf16.vlgmr.msra.gmra.mxu1 %v4763_v53 }
 0x1a0   :  { %682 = vmatprep.mubr.bf16.mxu1 %v4768_v54  ;;  %3963 = vmatpush3.bf16.msra.mxu0 %v4226_v10  ;;  %v4931_v10 = vld [vmem:[%s5930_s1 + $0xf4] ss:$8 sps:$4 sm:$0xff]  }
 0x1a1   :  { %3964 = vmatprep.subr.bf16.mxu0 %v4227_v12  ;;  %6072 = vst [vmem:[#allocation34_spill] sm:$0xff] %v4931_v10 }
 0x1a4   :  { %3965 = vmatpush3.bf16.msra.mxu0 %v4227_v12  ;;  %v4938_v12 = vld [vmem:[%s5930_s1 + $0xf0] ss:$8 sps:$4 sm:$0xff]  }
 0x1a5   :  { %6073 = vst [vmem:[#allocation35_spill] sm:$0xff] %v4938_v12 }
 0x1a7   :  { %683 = vmatmul.mubr.bf16.gmra.mxu1 %v4776_v55 }
 0x1a8   :  { %690 = vmatprep.mubr.bf16.mxu1 %v4781_v56 }
 0x1af   :  { %691 = vmatmul.mubr.bf16.gmra.mxu1 %v4788_v57 }
 0x1b0   :  { %698 = vmatprep.mubr.bf16.mxu1 %v4793_v58 }
 0x1b7   :  { %699 = vmatmul.mubr.bf16.gmra.mxu1 %v4800_v59 }
 0x1b8   :  { %706 = vmatprep.mubr.bf16.mxu1 %v4805_v60 }
 0x1bf   :  { %707 = vmatmul.mubr.bf16.gmra.mxu1 %v4812_v61 }
 0x1c0   :  { %714 = vmatprep.mubr.bf16.mxu1 %v4817_v0 }
 0x1c7   :  { %715 = vmatmul.mubr.bf16.gmra.mxu1 %v4824_v1 }
 0x1c8   :  { %722 = vmatprep.mubr.bf16.mxu1 %v4829_v2 }
 0x1cf   :  { %723 = vmatmul.mubr.bf16.gmra.mxu1 %v4836_v3 }
 0x1d0   :  { %730 = vmatprep.mubr.bf16.mxu1 %v4841_v4 }
 0x1d7   :  { %731 = vmatmul.mubr.bf16.gmra.mxu1 %v4848_v5 }
 0x1d8   :  { %738 = vmatprep.mubr.bf16.mxu1 %v4853_v6 }
 0x1df   :  { %739 = vmatmul.mubr.bf16.gmra.mxu1 %v4860_v7 }
 0x1e0   :  { %746 = vmatprep.mubr.bf16.mxu1 %v4865_v8 }
 0x1e7   :  { %747 = vmatmul.mubr.bf16.gmra.mxu1 %v4872_v9 }
 0x1e8   :  { %754 = vmatprep.mubr.bf16.mxu1 %v4880_v11 }
 0x1ef   :  { %755 = vmatmul.mubr.bf16.gmra.mxu1 %v4890_v13 }
 0x1f0   :  { %762 = vmatprep.mubr.bf16.mxu1 %v4895_v14 }
 0x1f7   :  { %763 = vmatmul.mubr.bf16.gmra.mxu1 %v4902_v15 }
 0x1f8   :  { %770 = vmatprep.mubr.bf16.mxu1 %v4907_v16 }
 0x1ff   :  { %771 = vmatmul.mubr.bf16.gmra.mxu1 %v4914_v17 }
 0x200   :  { %778 = vmatprep.mubr.bf16.mxu1 %v4919_v49 }
 0x207   :  { %779 = vmatmul.mubr.bf16.gmra.mxu1 %v4926_v51 }
 0x208   :  { %786 = vmatprep.mubr.bf16.mxu1 %v4931_v10 }
 0x20f   :  { %787 = vmatmul.mubr.bf16.gmra.mxu1 %v4938_v12 }
 0x25f   :  { %v3404_v49 = vpop.f32.mrf.mxu0  ;;  %v3410_v17 = vpop.f32.mrf.mxu1 }
 0x261   :  { %v3405_v16 = vpop.f32.mrf.mxu0  ;;  %v3411_v15 = vpop.f32.mrf.mxu1 }
 0x262   :  { %v3406_v11 = vadd.f32 %v3405_v16, %v3404_v49  ;;  %v3412_v7 = vadd.f32 %v3411_v15, %v3410_v17 }
 0x263   :  { %v3407_v14 = vpop.f32.mrf.mxu0  ;;  %v3413_v13 = vpop.f32.mrf.mxu1 }
 0x265   :  { %v3408_v9 = vpop.f32.mrf.mxu0  ;;  %v3414_v8 = vpop.f32.mrf.mxu1 }
 0x266   :  { %v3409_v51 = vadd.f32 %v3408_v9, %v3407_v14  ;;  %v3415_v6 = vadd.f32 %v3414_v8, %v3413_v13 }
 0x267   :  { %v3416_v10 = vpop.f32.mrf.mxu1 }
 0x268   :  { %v795_v5 = vpack.c.bf16 %v3409_v51, %v3406_v11  ;;  %v796_v4 = vpack.c.bf16 %v3415_v6, %v3412_v7 }
 0x269   :  { %v3417_v3 = vpop.f32.mrf.mxu1 }
 0x26a   :  { %3966 = vmatprep.mubr.msk.bf16.mxu0 %vm152_vm0, %v795_v5  ;;  %v3418_v1 = vadd.f32 %v3417_v3, %v3416_v10 }
 0x26b   :  { %v3419_v2 = vpop.f32.mrf.mxu1  ;;  %3967 = vmatmul.mubr.msk.bf16.vlgmr.msra.gmra.mxu0 %vm152_vm0, %v796_v4 }
 0x26d   :  { %v3420_v12 = vpop.f32.mrf.mxu1 }
 0x26e   :  { %v3421_v0 = vadd.f32 %v3420_v12, %v3419_v2 }
 0x26f   :  { %v3422_v61 = vpop.f32.mrf.mxu1 }
 0x270   :  { %v797_v60 = vpack.c.bf16 %v3421_v0, %v3418_v1 }
 0x271   :  { %v3423_v16 = vpop.f32.mrf.mxu1 }
 0x272   :  { %3970 = vmatprep.mubr.msk.bf16.mxu0 %vm152_vm0, %v797_v60  ;;  %v3424_v8 = vadd.f32 %v3423_v16, %v3422_v61 }
 0x273   :  { %v3425_v15 = vpop.f32.mrf.mxu1 }
 0x275   :  { %v3426_v9 = vpop.f32.mrf.mxu1 }
 0x276   :  { %v3427_v13 = vadd.f32 %v3426_v9, %v3425_v15 }
 0x277   :  { %v3428_v11 = vpop.f32.mrf.mxu1 }
 0x278   :  { %v798_v6 = vpack.c.bf16 %v3427_v13, %v3424_v8 }
 0x279   :  { %v3429_v7 = vpop.f32.mrf.mxu1 }
 0x27a   :  { %3971 = vmatmul.mubr.msk.bf16.gmra.mxu0 %vm152_vm0, %v798_v6  ;;  %v3430_v4 = vadd.f32 %v3429_v7, %v3428_v11 }
 0x27b   :  { %v3431_v5 = vpop.f32.mrf.mxu1 }
 0x27d   :  { %v3432_v14 = vpop.f32.mrf.mxu1 }
 0x27e   :  { %v3433_v17 = vadd.f32 %v3432_v14, %v3431_v5 }
 0x27f   :  { %v3434_v3 = vpop.f32.mrf.mxu1 }
 0x280   :  { %v799_v2 = vpack.c.bf16 %v3433_v17, %v3430_v4 }
 0x281   :  { %v3435_v49 = vpop.f32.mrf.mxu1 }
 0x282   :  { %3974 = vmatprep.mubr.msk.bf16.mxu0 %vm152_vm0, %v799_v2  ;;  %v3436_v1 = vadd.f32 %v3435_v49, %v3434_v3 }
 0x283   :  { %v3437_v0 = vpop.f32.mrf.mxu1 }
 0x285   :  { %v3438_v60 = vpop.f32.mrf.mxu1 }
 0x286   :  { %v3439_v51 = vadd.f32 %v3438_v60, %v3437_v0 }
 0x287   :  { %v3440_v61 = vpop.f32.mrf.mxu1 }
 0x288   :  { %v800_v10 = vpack.c.bf16 %v3439_v51, %v3436_v1 }
 0x289   :  { %v3441_v12 = vpop.f32.mrf.mxu1 }
 0x28a   :  { %3975 = vmatmul.mubr.msk.bf16.gmra.mxu0 %vm152_vm0, %v800_v10  ;;  %v3442_v9 = vadd.f32 %v3441_v12, %v3440_v61 }
 0x28b   :  { %v3443_v16 = vpop.f32.mrf.mxu1 }
 0x28d   :  { %v3444_v15 = vpop.f32.mrf.mxu1 }
 0x28e   :  { %v3445_v8 = vadd.f32 %v3444_v15, %v3443_v16 }
 0x28f   :  { %v3446_v13 = vpop.f32.mrf.mxu1 }
 0x290   :  { %v801_v11 = vpack.c.bf16 %v3445_v8, %v3442_v9 }
 0x291   :  { %v3447_v6 = vpop.f32.mrf.mxu1 }
 0x292   :  { %3978 = vmatprep.mubr.msk.bf16.mxu0 %vm152_vm0, %v801_v11  ;;  %v3448_v14 = vadd.f32 %v3447_v6, %v3446_v13 }
 0x293   :  { %v3449_v7 = vpop.f32.mrf.mxu1 }
 0x295   :  { %v3450_v5 = vpop.f32.mrf.mxu1 }
 0x296   :  { %v3451_v4 = vadd.f32 %v3450_v5, %v3449_v7 }
 0x297   :  { %v3452_v17 = vpop.f32.mrf.mxu1 }
 0x298   :  { %v802_v3 = vpack.c.bf16 %v3451_v4, %v3448_v14 }
 0x299   :  { %v3453_v2 = vpop.f32.mrf.mxu1 }
 0x29a   :  { %3979 = vmatmul.mubr.msk.bf16.gmra.mxu0 %vm152_vm0, %v802_v3  ;;  %v3454_v60 = vadd.f32 %v3453_v2, %v3452_v17 }
 0x29b   :  { %v3455_v49 = vpop.f32.mrf.mxu1 }
 0x29d   :  { %v3456_v0 = vpop.f32.mrf.mxu1 }
 0x29e   :  { %v3457_v1 = vadd.f32 %v3456_v0, %v3455_v49 }
 0x29f   :  { %v3458_v51 = vpop.f32.mrf.mxu1 }
 0x2a0   :  { %v803_v61 = vpack.c.bf16 %v3457_v1, %v3454_v60 }
 0x2a1   :  { %v3459_v10 = vpop.f32.mrf.mxu1 }
 0x2a2   :  { %3982 = vmatprep.mubr.msk.bf16.mxu0 %vm152_vm0, %v803_v61  ;;  %v3460_v15 = vadd.f32 %v3459_v10, %v3458_v51 }
 0x2a3   :  { %v3461_v12 = vpop.f32.mrf.mxu1 }
 0x2a5   :  { %v3462_v16 = vpop.f32.mrf.mxu1 }
 0x2a6   :  { %v3463_v9 = vadd.f32 %v3462_v16, %v3461_v12 }
 0x2a7   :  { %v3464_v8 = vpop.f32.mrf.mxu1 }
 0x2a8   :  { %v804_v13 = vpack.c.bf16 %v3463_v9, %v3460_v15 }
 0x2a9   :  { %v3465_v11 = vpop.f32.mrf.mxu1 }
 0x2aa   :  { %3983 = vmatmul.mubr.msk.bf16.gmra.mxu0 %vm152_vm0, %v804_v13  ;;  %v3466_v5 = vadd.f32 %v3465_v11, %v3464_v8 }
 0x2ab   :  { %v3467_v6 = vpop.f32.mrf.mxu1 }
 0x2ad   :  { %v3468_v7 = vpop.f32.mrf.mxu1 }
 0x2ae   :  { %v3469_v14 = vadd.f32 %v3468_v7, %v3467_v6 }
 0x2af   :  { %v3470_v4 = vpop.f32.mrf.mxu1 }
 0x2b0   :  { %v805_v17 = vpack.c.bf16 %v3469_v14, %v3466_v5 }
 0x2b1   :  { %v3471_v3 = vpop.f32.mrf.mxu1 }
 0x2b2   :  { %3986 = vmatprep.mubr.msk.bf16.mxu0 %vm152_vm0, %v805_v17  ;;  %v3472_v0 = vadd.f32 %v3471_v3, %v3470_v4 }
 0x2b3   :  { %v3473_v2 = vpop.f32.mrf.mxu1 }
 0x2b5   :  { %v3474_v49 = vpop.f32.mrf.mxu1 }
 0x2b6   :  { %v3475_v60 = vadd.f32 %v3474_v49, %v3473_v2 }
 0x2b7   :  { %v3476_v1 = vpop.f32.mrf.mxu1 }
 0x2b8   :  { %v806_v51 = vpack.c.bf16 %v3475_v60, %v3472_v0 }
 0x2b9   :  { %v3477_v61 = vpop.f32.mrf.mxu1 }
 0x2ba   :  { %3987 = vmatmul.mubr.msk.bf16.gmra.mxu0 %vm152_vm0, %v806_v51  ;;  %v3478_v16 = vadd.f32 %v3477_v61, %v3476_v1 }
 0x2bb   :  { %v3479_v10 = vpop.f32.mrf.mxu1 }
 0x2bd   :  { %v3480_v12 = vpop.f32.mrf.mxu1 }
 0x2be   :  { %v3481_v15 = vadd.f32 %v3480_v12, %v3479_v10 }
 0x2bf   :  { %v3482_v9 = vpop.f32.mrf.mxu1 }
 0x2c0   :  { %v807_v8 = vpack.c.bf16 %v3481_v15, %v3478_v16 }
 0x2c1   :  { %v3483_v13 = vpop.f32.mrf.mxu1 }
 0x2c2   :  { %3990 = vmatprep.mubr.msk.bf16.mxu0 %vm152_vm0, %v807_v8  ;;  %v3484_v7 = vadd.f32 %v3483_v13, %v3482_v9 }
 0x2c3   :  { %v3485_v11 = vpop.f32.mrf.mxu1 }
 0x2c5   :  { %v3486_v6 = vpop.f32.mrf.mxu1 }
 0x2c6   :  { %v3487_v5 = vadd.f32 %v3486_v6, %v3485_v11 }
 0x2c7   :  { %v3488_v14 = vpop.f32.mrf.mxu1 }
 0x2c8   :  { %v808_v4 = vpack.c.bf16 %v3487_v5, %v3484_v7 }
 0x2c9   :  { %v3489_v17 = vpop.f32.mrf.mxu1 }
 0x2ca   :  { %3991 = vmatmul.mubr.msk.bf16.gmra.mxu0 %vm152_vm0, %v808_v4  ;;  %v3490_v49 = vadd.f32 %v3489_v17, %v3488_v14 }
 0x2cb   :  { %v3491_v3 = vpop.f32.mrf.mxu1 }
 0x2cd   :  { %v3492_v2 = vpop.f32.mrf.mxu1 }
 0x2ce   :  { %v3493_v0 = vadd.f32 %v3492_v2, %v3491_v3 }
 0x2cf   :  { %v3494_v60 = vpop.f32.mrf.mxu1 }
 0x2d0   :  { %v809_v1 = vpack.c.bf16 %v3493_v0, %v3490_v49 }
 0x2d1   :  { %v3495_v51 = vpop.f32.mrf.mxu1 }
 0x2d2   :  { %3994 = vmatprep.mubr.msk.bf16.mxu0 %vm152_vm0, %v809_v1  ;;  %v3496_v12 = vadd.f32 %v3495_v51, %v3494_v60 }
 0x2d3   :  { %v3497_v61 = vpop.f32.mrf.mxu1 }
 0x2d5   :  { %v3498_v10 = vpop.f32.mrf.mxu1 }
 0x2d6   :  { %v3499_v16 = vadd.f32 %v3498_v10, %v3497_v61 }
 0x2d8   :  { %v810_v15 = vpack.c.bf16 %v3499_v16, %v3496_v12 }
 0x2da   :  { %3995 = vmatmul.mubr.msk.bf16.gmra.mxu0 %vm152_vm0, %v810_v15 }
 0x2db   :  { %1148 = vmatprep.mubr.bf16.mxu0 %v4733_v62 }
 0x32b   :  { %v4958_v9 = vpop.f32.mrf.mxu0 }
 0x32c   :  { %6074 = vst [vmem:[#allocation36_spill] sm:$0xff] %v4958_v9 }
 0x32d   :  { %v4960_v8 = vpop.f32.mrf.mxu0 }
 0x32e   :  { %6075 = vst [vmem:[#allocation37_spill] sm:$0xff] %v4960_v8 }
 0x32f   :  { %v4962_v13 = vpop.f32.mrf.mxu0 }
 0x331   :  { %v4964_v11 = vpop.f32.mrf.mxu0 }
 0x332   :  { %6076 = vst [vmem:[#allocation38_spill] sm:$0xff] %v4964_v11 }
 0x33a   :  { %v4966_v6 = vpop.f32.mrf.mxu0 }
 0x33c   :  { %v4968_v7 = vpop.f32.mrf.mxu0 }
 0x33e   :  { %v3973_v5 = vpop.f32.mrf.mxu0 }
 0x340   :  { %v4970_v14 = vpop.f32.mrf.mxu0 }
 0x34a   :  { %v3976_v4 = vpop.f32.mrf.mxu0 }
 0x34c   :  { %v941_v17 = vpop.f32.mrf.mxu0 }
 0x34e   :  { %v3977_v3 = vpop.f32.mrf.mxu0 }
 0x350   :  { %v944_v2 = vpop.f32.mrf.mxu0 }
 0x35a   :  { %v3980_v62 = vpop.f32.mrf.mxu0 }
 0x35b   :  { %v1050_v54 = vadd.f32 %v3980_v62, %v4655_v30 }
 0x35c   :  { %v957_v49 = vpop.f32.mrf.mxu0 }
 0x35d   :  { %4236 = vtanh.f32 %v1050_v54  ;;  %v1047_v54 = vadd.f32 %v3977_v3, %v4651_v28 }
 0x35e   :  { %v3981_v0 = vpop.f32.mrf.mxu0 }
 0x35f   :  { %v1051_v63 = vadd.f32 %v3981_v0, %v4659_v32  ;;  %v1048_v0 = vadd.f32 %v957_v49, %v4657_v31 }
 0x360   :  { %v960_v60 = vpop.f32.mrf.mxu0 }
 0x361   :  { %4238 = vtanh.f32 %v1051_v63 }
 0x36a   :  { %v4972_v1 = vpop.f32.mrf.mxu0 }
 0x36c   :  { %v4974_v51 = vpop.f32.mrf.mxu0 }
 0x36d   :  { %6077 = vst [vmem:[#allocation39_spill] sm:$0xff] %v4974_v51  ;;  %v1049_v51 = vadd.f32 %v960_v60, %v4661_v33 }
 0x36e   :  { %v4976_v61 = vpop.f32.mrf.mxu0 }
 0x370   :  { %v4978_v10 = vpop.f32.mrf.mxu0 }
 0x37a   :  { %v3988_v12 = vpop.f32.mrf.mxu0 }
 0x37c   :  { %v989_v16 = vpop.f32.mrf.mxu0 }
 0x37e   :  { %v3989_v15 = vpop.f32.mrf.mxu0 }
 0x380   :  { %v992_v59 = vpop.f32.mrf.mxu0 }
 0x38a   :  { %v3992_v58 = vpop.f32.mrf.mxu0 }
 0x38c   :  { %v1005_v57 = vpop.f32.mrf.mxu0 }
 0x38e   :  { %v3993_v56 = vpop.f32.mrf.mxu0 }
 0x38f   :  { %v1063_v9 = vadd.f32 %v3993_v56, %v4683_v44  ;;  %v1044_v56 = vadd.f32 %v941_v17, %v4649_v27  ;;  %v1042_v17 = vadd.f32 %v4966_v6, %v4639_v22  ;;  %v1055_v6 = vadd.f32 %v4976_v61, %v4667_v36 }
 0x390   :  { %v1008_v55 = vpop.f32.mrf.mxu0 }
 0x391   :  { %v1061_v63 = vadd.f32 %v1008_v55, %v4685_v45 }
 0x39a   :  { %v3996_v53 = vpop.f32.mrf.mxu0 }
 0x39b   :  { %v1066_v52 = vadd.f32 %v3996_v53, %v4687_v46  ;;  %v1062_v53 = vadd.f32 %v3992_v58, %v4679_v42  ;;  %v4997_v58 = vpop.eup %4236 }
 0x39c   :  { %v1021_v8 = vpop.f32.mrf.mxu0  ;;  %v5000_v55 = vpop.eup %4238 }
 0x39d   :  { %v1064_v19 = vadd.f32 %v1021_v8, %v4689_v47  ;;  %4240 = vtanh.f32 %v1066_v52  ;;  %v1046_v52 = vadd.f32 %v3976_v4, %v4647_v26  ;;  %6078 = vst [vmem:[#allocation40_spill] sm:$0xff] %v5000_v55  ;;  %v1043_v8 = vadd.f32 %v3973_v5, %v4643_v24 }
 0x39e   :  { %v3997_v11 = vpop.f32.mrf.mxu0  ;;  %v1107_v60 = vpack.c.bf16 %v5000_v55, %v4997_v58 }
 0x39f   :  { %v1067_v21 = vadd.f32 %v3997_v11, %v4691_v48  ;;  %v1057_v11 = vadd.f32 %v992_v59, %v4677_v41  ;;  %v1041_v59 = vadd.f32 %v4970_v14, %v4645_v25 }
 0x3a0   :  { %v1024_v35 = vpop.f32.mrf.mxu0 }
 0x3a1   :  { %4242 = vtanh.f32 %v1067_v21  ;;  %v1065_v62 = vadd.f32 %v1024_v35, %v4695_v50  ;;  %v1060_v21 = vadd.f32 %v1005_v57, %v4681_v43  ;;  %v1045_v35 = vadd.f32 %v944_v2, %v4653_v29 }
 0x3a2   :  { %4244 = vtanh.f32 %v1064_v19  ;;  %v1059_v19 = vadd.f32 %v3989_v15, %v4675_v40  ;;  %v1056_v2 = vadd.f32 %v989_v16, %v4673_v39  ;;  %v1040_v15 = vadd.f32 %v4968_v7, %v4641_v23 }
 0x3a3   :  { %4246 = vtanh.f32 %v1065_v62  ;;  %v1054_v62 = vadd.f32 %v4972_v1, %v4663_v34  ;;  %v1053_v7 = vadd.f32 %v4978_v10, %v4669_v37  ;;  %v6094_v10 = vld [vmem:[#allocation3_spill] sm:$0xff] }
 0x3a4   :  { %4248 = vtanh.f32 %v1049_v51 }
 0x3a5   :  { %4250 = vtanh.f32 %v1063_v9  ;;  %v1058_v9 = vadd.f32 %v3988_v12, %v4671_v38 }
 0x3a6   :  { %4252 = vtanh.f32 %v1048_v0  ;;  %v1039_v0 = vadd.f32 %v4962_v13, %v4635_v20 }
 0x3a7   :  { %4254 = vtanh.f32 %v1062_v53 }
 0x3a8   :  { %4256 = vtanh.f32 %v1047_v54 }
 0x3a9   :  { %4258 = vtanh.f32 %v1061_v63 }
 0x3aa   :  { %4260 = vtanh.f32 %v1046_v52  ;;  %v5003_v57 = vpop.eup %4240  ;;  %v6089_v52 = vld [vmem:[#allocation36_spill] sm:$0xff] }
 0x3ab   :  { %4262 = vtanh.f32 %v1060_v21  ;;  %6079 = vst [vmem:[#allocation41_spill] sm:$0xff] %v5003_v57  ;;  %v1038_v21 = vadd.f32 %v6089_v52, %v4631_v18 }
 0x3ac   :  { %4264 = vtanh.f32 %v1045_v35  ;;  %v6091_v35 = vld [vmem:[#allocation4_spill] sm:$0xff] }
 0x3ad   :  { %4266 = vtanh.f32 %v1059_v19  ;;  %v6092_v19 = vld [vmem:[#allocation39_spill] sm:$0xff] }
 0x3ae   :  { %v5006_v4 = vpop.eup %4242  ;;  %4268 = vtanh.f32 %v1044_v56  ;;  %v1052_v56 = vadd.f32 %v6092_v19, %v6091_v35 }
 0x3af   :  { %6080 = vst [vmem:[#allocation42_spill] sm:$0xff] %v5006_v4  ;;  %v5010_v3 = vpop.eup %4244  ;;  %4270 = vtanh.f32 %v1058_v9  ;;  %v1115_v5 = vpack.c.bf16 %v5006_v4, %v5003_v57 }
 0x3b0   :  { %6081 = vst [vmem:[#allocation43_spill] sm:$0xff] %v5010_v3  ;;  %v5015_v49 = vpop.eup %4246  ;;  %4272 = vtanh.f32 %v1043_v8  ;;  %v6095_v8 = vld [vmem:[#allocation38_spill] sm:$0xff] }
 0x3b1   :  { %6082 = vst [vmem:[#allocation44_spill] sm:$0xff] %v5015_v49  ;;  %v5021_v51 = vpop.eup %4248  ;;  %4274 = vtanh.f32 %v1057_v11  ;;  %3518 = vmatprep.subr.bf16.mxu0 %v1115_v5  ;;  %v1114_v12 = vpack.c.bf16 %v5015_v49, %v5010_v3  ;;  %v1037_v11 = vadd.f32 %v6095_v8, %v6094_v10 }
 0x3b2   :  { %6083 = vst [vmem:[#allocation45_spill] sm:$0xff] %v5021_v51  ;;  %v5027_v16 = vpop.eup %4250  ;;  %4276 = vtanh.f32 %v1042_v17  ;;  %3519 = vmatpush3.bf16.msra.mxu0 %v1107_v60  ;;  %v6098_v60 = vld [vmem:[#allocation2_spill] sm:$0xff] }
 0x3b3   :  { %6084 = vst [vmem:[#allocation46_spill] sm:$0xff] %v5027_v16  ;;  %v5031_v14 = vpop.eup %4252  ;;  %4278 = vtanh.f32 %v1056_v2  ;;  %3520 = vmatprep.subr.bf16.mxu0 %v1114_v12 }
 0x3b4   :  { %6085 = vst [vmem:[#allocation47_spill] sm:$0xff] %v5031_v14  ;;  %v5035_v61 = vpop.eup %4254  ;;  %4280 = vtanh.f32 %v1041_v59  ;;  %v1106_v53 = vpack.c.bf16 %v5021_v51, %v5031_v14 }
 0x3b5   :  { %6086 = vst [vmem:[#allocation48_spill] sm:$0xff] %v5035_v61  ;;  %v5041_v54 = vpop.eup %4256  ;;  %4282 = vtanh.f32 %v1055_v6  ;;  %v1113_v1 = vpack.c.bf16 %v5027_v16, %v5035_v61  ;;  %v6099_v6 = vld [vmem:[#allocation37_spill] sm:$0xff] }
 0x3b6   :  { %6087 = vst [vmem:[#allocation49_spill] sm:$0xff] %v5041_v54  ;;  %v5047_v63 = vpop.eup %4258  ;;  %4284 = vtanh.f32 %v1040_v15  ;;  %3521 = vmatpush3.bf16.msra.mxu0 %v1106_v53  ;;  %v1036_v12 = vadd.f32 %v6099_v6, %v6098_v60 }
 0x3b7   :  { %6088 = vst [vmem:[#allocation50_spill] sm:$0xff] %v5047_v63  ;;  %v5051_v13 = vpop.eup %4260  ;;  %4286 = vtanh.f32 %v1054_v62  ;;  %3522 = vmatprep.subr.bf16.mxu0 %v1113_v1 }
 0x3b8   :  { %6090 = vst [vmem:[#allocation36_spill] sm:$0xff] %v5051_v13  ;;  %v5055_v9 = vpop.eup %4262  ;;  %4288 = vtanh.f32 %v1039_v0  ;;  %v1105_v17 = vpack.c.bf16 %v5041_v54, %v5051_v13 }
 0x3b9   :  { %6093 = vst [vmem:[#allocation4_spill] sm:$0xff] %v5055_v9  ;;  %v5061_v2 = vpop.eup %4264  ;;  %4290 = vtanh.f32 %v1053_v7  ;;  %v1112_v5 = vpack.c.bf16 %v5047_v63, %v5055_v9  ;;  %v6116_v9 = vld [vmem:[#allocation13_spill] sm:$0xff] }
 0x3ba   :  { %6096 = vst [vmem:[#allocation39_spill] sm:$0xff] %v5061_v2  ;;  %v5065_v59 = vpop.eup %4266  ;;  %4292 = vtanh.f32 %v1038_v21  ;;  %3523 = vmatpush3.bf16.msra.mxu0 %v1105_v17 }
 0x3bb   :  { %6097 = vst [vmem:[#allocation3_spill] sm:$0xff] %v5065_v59  ;;  %v5069_v15 = vpop.eup %4268  ;;  %4294 = vtanh.f32 %v1052_v56  ;;  %3524 = vmatprep.subr.bf16.mxu0 %v1112_v5 }
 0x3bc   :  { %6100 = vst [vmem:[#allocation38_spill] sm:$0xff] %v5069_v15  ;;  %v5071_v62 = vpop.eup %4270  ;;  %4296 = vtanh.f32 %v1037_v11  ;;  %v1104_v0 = vpack.c.bf16 %v5061_v2, %v5069_v15  ;;  %v6109_v15 = vld [vmem:[#allocation5_spill] sm:$0xff]  ;;  %v6114_v2 = vld [vmem:[#allocation11_spill] sm:$0xff] }
 0x3bd   :  { %6101 = vst [vmem:[#allocation2_spill] sm:$0xff] %v5071_v62  ;;  %v5075_v53 = vpop.eup %4272  ;;  %v1111_v7 = vpack.c.bf16 %v5065_v59, %v5071_v62  ;;  %4298 = vtanh.f32 %v1036_v12  ;;  %v6110_v59 = vld [vmem:[#allocation7_spill] sm:$0xff] }
 0x3be   :  { %v5079_v1 = vpop.eup %4274  ;;  %3525 = vmatpush3.bf16.msra.mxu0 %v1104_v0 }
 0x3bf   :  { %6102 = vst [vmem:[#allocation37_spill] sm:$0xff] %v5079_v1  ;;  %v5081_v52 = vpop.eup %4276  ;;  %3526 = vmatprep.subr.bf16.mxu0 %v1111_v7 }
 0x3c0   :  { %v5083_v21 = vpop.eup %4278  ;;  %v1103_v19 = vpack.c.bf16 %v5075_v53, %v5081_v52 }
 0x3c1   :  { %6103 = vst [vmem:[#allocation51_spill] sm:$0xff] %v5083_v21  ;;  %v5087_v56 = vpop.eup %4280  ;;  %v1110_v8 = vpack.c.bf16 %v5079_v1, %v5083_v21 }
 0x3c2   :  { %v5091_v11 = vpop.eup %4282  ;;  %3527 = vmatpush3.bf16.msra.mxu0 %v1103_v19 }
 0x3c3   :  { %6104 = vst [vmem:[#allocation52_spill] sm:$0xff] %v5091_v11  ;;  %v5093_v17 = vpop.eup %4284  ;;  %3528 = vmatprep.subr.bf16.mxu0 %v1110_v8 }
 0x3c4   :  { %v5095_v5 = vpop.eup %4286  ;;  %v1102_v6 = vpack.c.bf16 %v5087_v56, %v5093_v17 }
 0x3c5   :  { %6105 = vst [vmem:[#allocation53_spill] sm:$0xff] %v5095_v5  ;;  %v5099_v12 = vpop.eup %4288  ;;  %v1109_v0 = vpack.c.bf16 %v5091_v11, %v5095_v5  ;;  %v4228_v5 = vld [vmem:[%s5931_s3 + $0x18] sm:$0xff]  }
 0x3c6   :  { %v5103_v7 = vpop.eup %4290  ;;  %3529 = vmatpush3.bf16.msra.mxu0 %v1102_v6  ;;  %3998 = vmatprep.subr.bf16.mxu1 %v4228_v5 }
 0x3c7   :  { %6106 = vst [vmem:[#allocation54_spill] sm:$0xff] %v5103_v7  ;;  %v5105_v21 = vpop.eup %4292  ;;  %3530 = vmatprep.subr.bf16.mxu0 %v1109_v0  ;;  %3999 = vmatpush3.bf16.msra.mxu1 %v4228_v5  ;;  %v6108_v0 = vld [vmem:[#allocation6_spill] sm:$0xff] }
 0x3c8   :  { %v5107_v19 = vpop.eup %4294  ;;  %v1101_v8 = vpack.c.bf16 %v5099_v12, %v5105_v21  ;;  %v6117_v5 = vld [vmem:[#allocation14_spill] sm:$0xff] }
 0x3c9   :  { %6107 = vst [vmem:[#allocation55_spill] sm:$0xff] %v5107_v19  ;;  %v5111_v1 = vpop.eup %4296  ;;  %v1108_v62 = vpack.c.bf16 %v5103_v7, %v5107_v19  ;;  %v6111_v19 = vld [vmem:[#allocation8_spill] sm:$0xff]  ;;  %v6112_v7 = vld [vmem:[#allocation9_spill] sm:$0xff] }
 0x3ca   :  { %3531 = vmatpush3.bf16.msra.mxu0 %v1101_v8  ;;  %v5118_v11 = vpop.eup %4298  ;;  %v6113_v8 = vld [vmem:[#allocation10_spill] sm:$0xff] }
 0x3cb   :  { %3532 = vmatprep.subr.bf16.mxu0 %v1108_v62  ;;  %v1100_v6 = vpack.c.bf16 %v5111_v1, %v5118_v11  ;;  %v6115_v62 = vld [vmem:[#allocation12_spill] sm:$0xff] }
 0x3ce   :  { %3533 = vmatpush3.bf16.msra.mxu0 %v1100_v6  ;;  %v6118_v6 = vld [vmem:[#allocation15_spill] sm:$0xff] }
 0x3d1   :  { %1149 = vmatmul.mubr.bf16.vlgmr.msra.gmra.mxu0 %v6108_v0  ;;  %v6119_v0 = vld [vmem:[#allocation16_spill] sm:$0xff] }
 0x3d2   :  { %1156 = vmatprep.mubr.bf16.mxu0 %v6109_v15  ;;  %v6120_v15 = vld [vmem:[#allocation17_spill] sm:$0xff] }
 0x3d9   :  { %1157 = vmatmul.mubr.bf16.gmra.mxu0 %v6110_v59  ;;  %v6121_v59 = vld [vmem:[#allocation18_spill] sm:$0xff] }
 0x3da   :  { %1164 = vmatprep.mubr.bf16.mxu0 %v6111_v19  ;;  %v6122_v19 = vld [vmem:[#allocation19_spill] sm:$0xff] }
 0x3e1   :  { %1165 = vmatmul.mubr.bf16.gmra.mxu0 %v6112_v7  ;;  %v6123_v7 = vld [vmem:[#allocation20_spill] sm:$0xff] }
 0x3e2   :  { %1172 = vmatprep.mubr.bf16.mxu0 %v6113_v8  ;;  %v6124_v8 = vld [vmem:[#allocation21_spill] sm:$0xff] }
 0x3e9   :  { %1173 = vmatmul.mubr.bf16.gmra.mxu0 %v6114_v2  ;;  %v6125_v2 = vld [vmem:[#allocation22_spill] sm:$0xff] }
 0x3ea   :  { %1180 = vmatprep.mubr.bf16.mxu0 %v6115_v62  ;;  %v6126_v62 = vld [vmem:[#allocation23_spill] sm:$0xff] }
 0x3f1   :  { %1181 = vmatmul.mubr.bf16.gmra.mxu0 %v6116_v9  ;;  %v6127_v9 = vld [vmem:[#allocation24_spill] sm:$0xff] }
 0x3f2   :  { %1188 = vmatprep.mubr.bf16.mxu0 %v6117_v5  ;;  %v4229_v5 = vld [vmem:[%s5931_s3 + $0x10] sm:$0xff]  }
 0x3f3   :  { %4000 = vmatprep.subr.bf16.mxu1 %v4229_v5 }
 0x3f4   :  { %4001 = vmatpush3.bf16.msra.mxu1 %v4229_v5 }
 0x3f9   :  { %1189 = vmatmul.mubr.bf16.gmra.mxu0 %v6118_v6  ;;  %v6128_v6 = vld [vmem:[#allocation25_spill] sm:$0xff] }
 0x3fa   :  { %1196 = vmatprep.mubr.bf16.mxu0 %v6119_v0  ;;  %v6129_v0 = vld [vmem:[#allocation26_spill] sm:$0xff] }
 0x401   :  { %1197 = vmatmul.mubr.bf16.gmra.mxu0 %v6120_v15  ;;  %v6130_v15 = vld [vmem:[#allocation27_spill] sm:$0xff] }
 0x402   :  { %1204 = vmatprep.mubr.bf16.mxu0 %v6121_v59  ;;  %v6131_v59 = vld [vmem:[#allocation28_spill] sm:$0xff] }
 0x409   :  { %1205 = vmatmul.mubr.bf16.gmra.mxu0 %v6122_v19  ;;  %v6132_v19 = vld [vmem:[#allocation29_spill] sm:$0xff] }
 0x40a   :  { %1212 = vmatprep.mubr.bf16.mxu0 %v6123_v7  ;;  %v6133_v7 = vld [vmem:[#allocation30_spill] sm:$0xff] }
 0x411   :  { %1213 = vmatmul.mubr.bf16.gmra.mxu0 %v6124_v8  ;;  %v6134_v8 = vld [vmem:[#allocation31_spill] sm:$0xff] }
 0x412   :  { %1220 = vmatprep.mubr.bf16.mxu0 %v6125_v2  ;;  %v6135_v2 = vld [vmem:[#allocation32_spill] sm:$0xff] }
 0x419   :  { %1221 = vmatmul.mubr.bf16.gmra.mxu0 %v6126_v62  ;;  %v6136_v62 = vld [vmem:[#allocation33_spill] sm:$0xff] }
 0x41a   :  { %1228 = vmatprep.mubr.bf16.mxu0 %v6127_v9  ;;  %v6137_v9 = vld [vmem:[#allocation34_spill] sm:$0xff] }
 0x421   :  { %1229 = vmatmul.mubr.bf16.gmra.mxu0 %v6128_v6  ;;  %v6138_v6 = vld [vmem:[#allocation35_spill] sm:$0xff] }
 0x422   :  { %1236 = vmatprep.mubr.bf16.mxu0 %v6129_v0 }
 0x429   :  { %1237 = vmatmul.mubr.bf16.gmra.mxu0 %v6130_v15 }
 0x42a   :  { %1244 = vmatprep.mubr.bf16.mxu0 %v6131_v59 }
 0x431   :  { %1245 = vmatmul.mubr.bf16.gmra.mxu0 %v6132_v19 }
 0x432   :  { %1252 = vmatprep.mubr.bf16.mxu0 %v6133_v7 }
 0x439   :  { %1253 = vmatmul.mubr.bf16.gmra.mxu0 %v6134_v8 }
 0x43a   :  { %1260 = vmatprep.mubr.bf16.mxu0 %v6135_v2 }
 0x441   :  { %1261 = vmatmul.mubr.bf16.gmra.mxu0 %v6136_v62 }
 0x442   :  { %1268 = vmatprep.mubr.bf16.mxu0 %v6137_v9 }
 0x449   :  { %1269 = vmatmul.mubr.bf16.gmra.mxu0 %v6138_v6 }
 0x491   :  { %v3534_v5 = vpop.f32.mrf.mxu0 }
 0x493   :  { %v3535_v0 = vpop.f32.mrf.mxu0 }
 0x494   :  { %v3536_v63 = vadd.f32 %v3535_v0, %v3534_v5 }
 0x495   :  { %v3537_v13 = vpop.f32.mrf.mxu0 }
 0x497   :  { %v3538_v15 = vpop.f32.mrf.mxu0 }
 0x498   :  { %v3539_v59 = vadd.f32 %v3538_v15, %v3537_v13 }
 0x499   :  { %v3540_v54 = vpop.f32.mrf.mxu0 }
 0x49a   :  { %v1277_v19 = vpack.c.bf16 %v3539_v59, %v3536_v63 }
 0x49b   :  { %v3541_v61 = vpop.f32.mrf.mxu0 }
 0x49c   :  { %4002 = vmatprep.mubr.msk.bf16.mxu1 %vm152_vm0, %v1277_v19  ;;  %v3542_v2 = vadd.f32 %v3541_v61, %v3540_v54 }
 0x49d   :  { %v3543_v7 = vpop.f32.mrf.mxu0 }
 0x49f   :  { %v3544_v8 = vpop.f32.mrf.mxu0 }
 0x4a0   :  { %v3545_v14 = vadd.f32 %v3544_v8, %v3543_v7 }
 0x4a1   :  { %v3546_v62 = vpop.f32.mrf.mxu0 }
 0x4a2   :  { %v1278_v49 = vpack.c.bf16 %v3545_v14, %v3542_v2 }
 0x4a3   :  { %v3547_v9 = vpop.f32.mrf.mxu0 }
 0x4a4   :  { %4003 = vmatmul.mubr.msk.bf16.vlgmr.msra.gmra.mxu1 %vm152_vm0, %v1278_v49  ;;  %v3548_v51 = vadd.f32 %v3547_v9, %v3546_v62 }
 0x4a5   :  { %v3549_v6 = vpop.f32.mrf.mxu0 }
 0x4a7   :  { %v3550_v16 = vpop.f32.mrf.mxu0 }
 0x4a8   :  { %v3551_v4 = vadd.f32 %v3550_v16, %v3549_v6 }
 0x4a9   :  { %v3552_v5 = vpop.f32.mrf.mxu0 }
 0x4aa   :  { %v1279_v13 = vpack.c.bf16 %v3551_v4, %v3548_v51 }
 0x4ab   :  { %v3553_v0 = vpop.f32.mrf.mxu0 }
 0x4ac   :  { %4006 = vmatprep.mubr.msk.bf16.mxu1 %vm152_vm0, %v1279_v13  ;;  %v3554_v59 = vadd.f32 %v3553_v0, %v3552_v5 }
 0x4ad   :  { %v3555_v63 = vpop.f32.mrf.mxu0 }
 0x4af   :  { %v3556_v15 = vpop.f32.mrf.mxu0 }
 0x4b0   :  { %v3557_v19 = vadd.f32 %v3556_v15, %v3555_v63 }
 0x4b1   :  { %v3558_v61 = vpop.f32.mrf.mxu0 }
 0x4b2   :  { %v1280_v54 = vpack.c.bf16 %v3557_v19, %v3554_v59 }
 0x4b3   :  { %v3559_v7 = vpop.f32.mrf.mxu0 }
 0x4b4   :  { %4007 = vmatmul.mubr.msk.bf16.gmra.mxu1 %vm152_vm0, %v1280_v54  ;;  %v3560_v8 = vadd.f32 %v3559_v7, %v3558_v61 }
 0x4b5   :  { %v3561_v14 = vpop.f32.mrf.mxu0 }
 0x4b7   :  { %v3562_v49 = vpop.f32.mrf.mxu0 }
 0x4b8   :  { %v3563_v2 = vadd.f32 %v3562_v49, %v3561_v14 }
 0x4b9   :  { %v3564_v62 = vpop.f32.mrf.mxu0 }
 0x4ba   :  { %v1281_v16 = vpack.c.bf16 %v3563_v2, %v3560_v8 }
 0x4bb   :  { %v3565_v9 = vpop.f32.mrf.mxu0 }
 0x4bc   :  { %4010 = vmatprep.mubr.msk.bf16.mxu1 %vm152_vm0, %v1281_v16  ;;  %v3566_v6 = vadd.f32 %v3565_v9, %v3564_v62 }
 0x4bd   :  { %v3567_v4 = vpop.f32.mrf.mxu0 }
 0x4bf   :  { %v3568_v51 = vpop.f32.mrf.mxu0 }
 0x4c0   :  { %v3569_v13 = vadd.f32 %v3568_v51, %v3567_v4 }
 0x4c1   :  { %v3570_v5 = vpop.f32.mrf.mxu0 }
 0x4c2   :  { %v1282_v0 = vpack.c.bf16 %v3569_v13, %v3566_v6 }
 0x4c3   :  { %v3571_v63 = vpop.f32.mrf.mxu0 }
 0x4c4   :  { %4011 = vmatmul.mubr.msk.bf16.gmra.mxu1 %vm152_vm0, %v1282_v0  ;;  %v3572_v19 = vadd.f32 %v3571_v63, %v3570_v5 }
 0x4c5   :  { %v3573_v15 = vpop.f32.mrf.mxu0 }
 0x4c7   :  { %v3574_v59 = vpop.f32.mrf.mxu0 }
 0x4c8   :  { %v3575_v54 = vadd.f32 %v3574_v59, %v3573_v15 }
 0x4c9   :  { %v3576_v61 = vpop.f32.mrf.mxu0 }
 0x4ca   :  { %v1283_v7 = vpack.c.bf16 %v3575_v54, %v3572_v19 }
 0x4cb   :  { %v3577_v14 = vpop.f32.mrf.mxu0 }
 0x4cc   :  { %4014 = vmatprep.mubr.msk.bf16.mxu1 %vm152_vm0, %v1283_v7  ;;  %v3578_v2 = vadd.f32 %v3577_v14, %v3576_v61 }
 0x4cd   :  { %v3579_v49 = vpop.f32.mrf.mxu0 }
 0x4cf   :  { %v3580_v8 = vpop.f32.mrf.mxu0 }
 0x4d0   :  { %v3581_v16 = vadd.f32 %v3580_v8, %v3579_v49 }
 0x4d1   :  { %v3582_v62 = vpop.f32.mrf.mxu0 }
 0x4d2   :  { %v1284_v9 = vpack.c.bf16 %v3581_v16, %v3578_v2 }
 0x4d3   :  { %v3583_v4 = vpop.f32.mrf.mxu0 }
 0x4d4   :  { %4015 = vmatmul.mubr.msk.bf16.gmra.mxu1 %vm152_vm0, %v1284_v9  ;;  %v3584_v13 = vadd.f32 %v3583_v4, %v3582_v62 }
 0x4d5   :  { %v3585_v51 = vpop.f32.mrf.mxu0 }
 0x4d7   :  { %v3586_v6 = vpop.f32.mrf.mxu0 }
 0x4d8   :  { %v3587_v0 = vadd.f32 %v3586_v6, %v3585_v51 }
 0x4d9   :  { %v3588_v5 = vpop.f32.mrf.mxu0 }
 0x4da   :  { %v1285_v63 = vpack.c.bf16 %v3587_v0, %v3584_v13 }
 0x4db   :  { %v3589_v15 = vpop.f32.mrf.mxu0 }
 0x4dc   :  { %4018 = vmatprep.mubr.msk.bf16.mxu1 %vm152_vm0, %v1285_v63  ;;  %v3590_v54 = vadd.f32 %v3589_v15, %v3588_v5 }
 0x4dd   :  { %v3591_v59 = vpop.f32.mrf.mxu0 }
 0x4df   :  { %v3592_v19 = vpop.f32.mrf.mxu0 }
 0x4e0   :  { %v3593_v7 = vadd.f32 %v3592_v19, %v3591_v59 }
 0x4e1   :  { %v3594_v61 = vpop.f32.mrf.mxu0 }
 0x4e2   :  { %v1286_v14 = vpack.c.bf16 %v3593_v7, %v3590_v54 }
 0x4e3   :  { %v3595_v49 = vpop.f32.mrf.mxu0 }
 0x4e4   :  { %4019 = vmatmul.mubr.msk.bf16.gmra.mxu1 %vm152_vm0, %v1286_v14  ;;  %v3596_v16 = vadd.f32 %v3595_v49, %v3594_v61 }
 0x4e5   :  { %v3597_v8 = vpop.f32.mrf.mxu0 }
 0x4e7   :  { %v3598_v2 = vpop.f32.mrf.mxu0 }
 0x4e8   :  { %v3599_v9 = vadd.f32 %v3598_v2, %v3597_v8 }
 0x4e9   :  { %v3600_v62 = vpop.f32.mrf.mxu0 }
 0x4ea   :  { %v1287_v4 = vpack.c.bf16 %v3599_v9, %v3596_v16 }
 0x4eb   :  { %v3601_v51 = vpop.f32.mrf.mxu0 }
 0x4ec   :  { %4022 = vmatprep.mubr.msk.bf16.mxu1 %vm152_vm0, %v1287_v4  ;;  %v3602_v0 = vadd.f32 %v3601_v51, %v3600_v62 }
 0x4ed   :  { %v3603_v6 = vpop.f32.mrf.mxu0 }
 0x4ef   :  { %v3604_v13 = vpop.f32.mrf.mxu0 }
 0x4f0   :  { %v3605_v63 = vadd.f32 %v3604_v13, %v3603_v6 }
 0x4f1   :  { %v3606_v5 = vpop.f32.mrf.mxu0 }
 0x4f2   :  { %v1288_v15 = vpack.c.bf16 %v3605_v63, %v3602_v0 }
 0x4f3   :  { %v3607_v59 = vpop.f32.mrf.mxu0 }
 0x4f4   :  { %4023 = vmatmul.mubr.msk.bf16.gmra.mxu1 %vm152_vm0, %v1288_v15  ;;  %v3608_v7 = vadd.f32 %v3607_v59, %v3606_v5 }
 0x4f5   :  { %v3609_v19 = vpop.f32.mrf.mxu0 }
 0x4f7   :  { %v3610_v54 = vpop.f32.mrf.mxu0 }
 0x4f8   :  { %v3611_v14 = vadd.f32 %v3610_v54, %v3609_v19 }
 0x4f9   :  { %v3612_v61 = vpop.f32.mrf.mxu0 }
 0x4fa   :  { %v1289_v49 = vpack.c.bf16 %v3611_v14, %v3608_v7 }
 0x4fb   :  { %v3613_v8 = vpop.f32.mrf.mxu0 }
 0x4fc   :  { %4026 = vmatprep.mubr.msk.bf16.mxu1 %vm152_vm0, %v1289_v49  ;;  %v3614_v9 = vadd.f32 %v3613_v8, %v3612_v61  ;;  %v5175_v8 = vld [vmem:[%s5930_s1 + $0x4] ss:$8 sps:$4 sm:$0xff]  }
 0x4fd   :  { %v3615_v2 = vpop.f32.mrf.mxu0 }
 0x4ff   :  { %v3616_v16 = vpop.f32.mrf.mxu0 }
 0x500   :  { %v3617_v4 = vadd.f32 %v3616_v16, %v3615_v2 }
 0x501   :  { %v3618_v62 = vpop.f32.mrf.mxu0 }
 0x502   :  { %v1290_v51 = vpack.c.bf16 %v3617_v4, %v3614_v9 }
 0x503   :  { %v3619_v6 = vpop.f32.mrf.mxu0 }
 0x504   :  { %4027 = vmatmul.mubr.msk.bf16.gmra.mxu1 %vm152_vm0, %v1290_v51  ;;  %v3620_v63 = vadd.f32 %v3619_v6, %v3618_v62 }
 0x505   :  { %v3621_v13 = vpop.f32.mrf.mxu0 }
 0x507   :  { %v3622_v0 = vpop.f32.mrf.mxu0 }
 0x508   :  { %v3623_v15 = vadd.f32 %v3622_v0, %v3621_v13 }
 0x509   :  { %v3624_v5 = vpop.f32.mrf.mxu0 }
 0x50a   :  { %v1291_v59 = vpack.c.bf16 %v3623_v15, %v3620_v63 }
 0x50b   :  { %v3625_v19 = vpop.f32.mrf.mxu0 }
 0x50c   :  { %4030 = vmatprep.mubr.msk.bf16.mxu1 %vm152_vm0, %v1291_v59  ;;  %v3626_v14 = vadd.f32 %v3625_v19, %v3624_v5 }
 0x50d   :  { %v3627_v54 = vpop.f32.mrf.mxu0 }
 0x50f   :  { %v3628_v7 = vpop.f32.mrf.mxu0 }
 0x510   :  { %v3629_v49 = vadd.f32 %v3628_v7, %v3627_v54 }
 0x512   :  { %v1292_v61 = vpack.c.bf16 %v3629_v49, %v3626_v14 }
 0x514   :  { %4031 = vmatmul.mubr.msk.bf16.gmra.mxu1 %vm152_vm0, %v1292_v61 }
 0x515   :  { %1823 = vmatprep.mubr.bf16.mxu1 %v5175_v8 }
 0x564   :  { %v4004_v2 = vpop.f32.mrf.mxu1 }
 0x566   :  { %v1392_v16 = vpop.f32.mrf.mxu1 }
 0x568   :  { %v4005_v9 = vpop.f32.mrf.mxu1 }
 0x56a   :  { %v1395_v4 = vpop.f32.mrf.mxu1 }
 0x574   :  { %v4008_v62 = vpop.f32.mrf.mxu1 }
 0x576   :  { %v1408_v51 = vpop.f32.mrf.mxu1 }
 0x578   :  { %v4009_v6 = vpop.f32.mrf.mxu1 }
 0x57a   :  { %v1411_v13 = vpop.f32.mrf.mxu1 }
 0x584   :  { %v4012_v0 = vpop.f32.mrf.mxu1 }
 0x585   :  { %1571 = vrot.lane.b32.xlu0 %v4012_v0, %s4525_s2 }
 0x586   :  { %v1424_v63 = vpop.f32.mrf.mxu1 }
 0x588   :  { %v4013_v15 = vpop.f32.mrf.mxu1 }
 0x589   :  { %1567 = vrot.lane.b32.xlu0 %v1424_v63, %s4525_s2  ;;  %1573 = vrot.lane.b32.xlu1 %v4013_v15, %s4525_s2 }
 0x58a   :  { %v1427_v5 = vpop.f32.mrf.mxu1 }
 0x58d   :  { %1569 = vrot.lane.b32.xlu1 %v1427_v5, %s4525_s2 }
 0x594   :  { %v4016_v59 = vpop.f32.mrf.mxu1 }
 0x595   :  { %1579 = vrot.lane.b32.xlu0 %v4016_v59, %s4525_s2 }
 0x596   :  { %v1440_v19 = vpop.f32.mrf.mxu1 }
 0x598   :  { %v4017_v54 = vpop.f32.mrf.mxu1 }
 0x599   :  { %1575 = vrot.lane.b32.xlu0 %v1440_v19, %s4525_s2  ;;  %1581 = vrot.lane.b32.xlu1 %v4017_v54, %s4525_s2 }
 0x59a   :  { %v1443_v7 = vpop.f32.mrf.mxu1 }
 0x59d   :  { %1577 = vrot.lane.b32.xlu1 %v1443_v7, %s4525_s2 }
 0x5a4   :  { %v4020_v14 = vpop.f32.mrf.mxu1 }
 0x5a6   :  { %v1456_v49 = vpop.f32.mrf.mxu1 }
 0x5a8   :  { %v4021_v61 = vpop.f32.mrf.mxu1 }
 0x5aa   :  { %v1459_v0 = vpop.f32.mrf.mxu1 }
 0x5b4   :  { %v4024_v63 = vpop.f32.mrf.mxu1 }
 0x5b5   :  { %1595 = vrot.lane.b32.xlu0 %v4024_v63, %s4525_s2 }
 0x5b6   :  { %v1472_v15 = vpop.f32.mrf.mxu1 }
 0x5b8   :  { %v4025_v5 = vpop.f32.mrf.mxu1 }
 0x5b9   :  { %1597 = vrot.lane.b32.xlu1 %v4025_v5, %s4525_s2 }
 0x5ba   :  { %v1475_v59 = vpop.f32.mrf.mxu1 }
 0x5c4   :  { %v4028_v3 = vpop.f32.mrf.mxu1 }
 0x5c5   :  { %1603 = vrot.lane.b32.xlu0 %v4028_v3, %s4525_s2 }
 0x5c6   :  { %v1488_v19 = vpop.f32.mrf.mxu1 }
 0x5c8   :  { %v4029_v54 = vpop.f32.mrf.mxu1 }
 0x5c9   :  { %1599 = vrot.lane.b32.xlu0 %v1488_v19, %s4525_s2  ;;  %1605 = vrot.lane.b32.xlu1 %v4029_v54, %s4525_s2 }
 0x5ca   :  { %v1491_v7 = vpop.f32.mrf.mxu1 }
 0x5cd   :  { %1601 = vrot.lane.b32.xlu1 %v1491_v7, %s4525_s2 }
 0x5d4   :  { %v4032_v57 = vpop.f32.mrf.mxu1 }
 0x5d5   :  { %1611 = vrot.lane.b32.xlu0 %v4032_v57, %s4525_s2 }
 0x5d6   :  { %v1504_v63 = vpop.f32.mrf.mxu1 }
 0x5d8   :  { %v4033_v55 = vpop.f32.mrf.mxu1 }
 0x5d9   :  { %1607 = vrot.lane.b32.xlu0 %v1504_v63, %s4525_s2  ;;  %1613 = vrot.lane.b32.xlu1 %v4033_v55, %s4525_s2 }
 0x5da   :  { %v1507_v5 = vpop.f32.mrf.mxu1 }
 0x5dd   :  { %1563 = vrot.lane.b32.xlu0 %v4008_v62, %s4525_s2  ;;  %1609 = vrot.lane.b32.xlu1 %v1507_v5, %s4525_s2 }
 0x5e1   :  { %1591 = vrot.lane.b32.xlu0 %v1472_v15, %s4525_s2  ;;  %1565 = vrot.lane.b32.xlu1 %v4009_v6, %s4525_s2 }
 0x5e5   :  { %1559 = vrot.lane.b32.xlu0 %v1408_v51, %s4525_s2  ;;  %1593 = vrot.lane.b32.xlu1 %v1475_v59, %s4525_s2 }
 0x5e9   :  { %1587 = vrot.lane.b32.xlu0 %v4020_v14, %s4525_s2  ;;  %1561 = vrot.lane.b32.xlu1 %v1411_v13, %s4525_s2 }
 0x5ed   :  { %1555 = vrot.lane.b32.xlu0 %v4004_v2, %s4525_s2  ;;  %1589 = vrot.lane.b32.xlu1 %v4021_v61, %s4525_s2 }
 0x5f1   :  { %1583 = vrot.lane.b32.xlu0 %v1456_v49, %s4525_s2  ;;  %1557 = vrot.lane.b32.xlu1 %v4005_v9, %s4525_s2 }
 0x5f5   :  { %1551 = vrot.lane.b32.xlu0 %v1392_v16, %s4525_s2  ;;  %1585 = vrot.lane.b32.xlu1 %v1459_v0, %s4525_s2 }
 0x5f7   :  { %v1572_v55 = vpop.permute.xlu0 %1571 }
 0x5f8   :  { %v1657_v61 = vadd.f32 %v4647_v26, %v1572_v55 }
 0x5f9   :  { %1553 = vrot.lane.b32.xlu1 %v1395_v4, %s4525_s2 }
 0x5fb   :  { %v1574_v57 = vpop.permute.xlu1 %1573  ;;  %v1568_v3 = vpop.permute.xlu0 %1567 }
 0x5fc   :  { %v1658_v4 = vadd.f32 %v4651_v28, %v1574_v57  ;;  %v1655_v0 = vadd.f32 %v1568_v3, %v4649_v27 }
 0x5ff   :  { %v1570_v62 = vpop.permute.xlu1 %1569 }
 0x607   :  { %v1580_v51 = vpop.permute.xlu0 %1579 }
 0x608   :  { %v1661_v6 = vadd.f32 %v4655_v30, %v1580_v51  ;;  %v1656_v30 = vadd.f32 %v1570_v62, %v4653_v29 }
 0x60a   :  { %4300 = vtanh.f32 %v1661_v6 }
 0x60b   :  { %v1576_v2 = vpop.permute.xlu0 %1575  ;;  %v1582_v13 = vpop.permute.xlu1 %1581 }
 0x60c   :  { %v1662_v14 = vadd.f32 %v4659_v32, %v1582_v13  ;;  %v1659_v49 = vadd.f32 %v1576_v2, %v4657_v31 }
 0x60e   :  { %4302 = vtanh.f32 %v1662_v14 }
 0x60f   :  { %v1578_v16 = vpop.permute.xlu1 %1577  ;;  %4304 = vtanh.f32 %v1659_v49 }
 0x610   :  { %v1660_v9 = vadd.f32 %v1578_v16, %v4661_v33 }
 0x612   :  { %4306 = vtanh.f32 %v1660_v9 }
 0x613   :  { %4308 = vtanh.f32 %v1658_v4 }
 0x614   :  { %4310 = vtanh.f32 %v1657_v61 }
 0x615   :  { %4312 = vtanh.f32 %v1656_v30 }
 0x616   :  { %4314 = vtanh.f32 %v1655_v0 }
 0x617   :  { %v5218_v32 = vpop.eup %4300 }
 0x618   :  { %6139 = vst [vmem:[#allocation6_spill] sm:$0xff] %v5218_v32 }
 0x61b   :  { %v5220_v31 = vpop.eup %4302 }
 0x61c   :  { %6140 = vst [vmem:[#allocation5_spill] sm:$0xff] %v5220_v31  ;;  %v1718_v33 = vpack.c.bf16 %v5220_v31, %v5218_v32  ;;  %v5224_v28 = vpop.eup %4304 }
 0x61d   :  { %6141 = vst [vmem:[#allocation7_spill] sm:$0xff] %v5224_v28 }
 0x61e   :  { %1757 = vrot.lane.b32.xlu1 %v1718_v33, %s4524_s0 }
 0x61f   :  { %v5226_v15 = vpop.eup %4306 }
 0x620   :  { %6142 = vst [vmem:[#allocation8_spill] sm:$0xff] %v5226_v15  ;;  %v1717_v26 = vpack.c.bf16 %v5226_v15, %v5224_v28  ;;  %v5231_v29 = vpop.eup %4308 }
 0x621   :  { %6143 = vst [vmem:[#allocation9_spill] sm:$0xff] %v5231_v29  ;;  %v5234_v27 = vpop.eup %4310 }
 0x622   :  { %1755 = vrot.lane.b32.xlu1 %v1717_v26, %s4524_s0  ;;  %6144 = vst [vmem:[#allocation10_spill] sm:$0xff] %v5234_v27  ;;  %v1716_v59 = vpack.c.bf16 %v5231_v29, %v5234_v27  ;;  %v5238_v19 = vpop.eup %4312 }
 0x623   :  { %6145 = vst [vmem:[#allocation11_spill] sm:$0xff] %v5238_v19  ;;  %v5241_v54 = vpop.eup %4314 }
 0x624   :  { %6146 = vst [vmem:[#allocation12_spill] sm:$0xff] %v5241_v54  ;;  %v1715_v7 = vpack.c.bf16 %v5238_v19, %v5241_v54 }
 0x626   :  { %1753 = vrot.lane.b32.xlu1 %v1716_v59, %s4524_s0 }
 0x627   :  { %v1596_v63 = vpop.permute.xlu0 %1595 }
 0x62a   :  { %1751 = vrot.lane.b32.xlu1 %v1715_v7, %s4524_s0 }
 0x62b   :  { %v1598_v5 = vpop.permute.xlu1 %1597 }
 0x62c   :  { %v1670_v59 = vadd.f32 %v4675_v40, %v1598_v5 }
 0x637   :  { %v1604_v55 = vpop.permute.xlu0 %1603 }
 0x638   :  { %v1673_v4 = vadd.f32 %v4679_v42, %v1604_v55 }
 0x63b   :  { %v1606_v57 = vpop.permute.xlu1 %1605  ;;  %v1600_v3 = vpop.permute.xlu0 %1599 }
 0x63c   :  { %v1674_v30 = vadd.f32 %v4683_v44, %v1606_v57  ;;  %v1671_v26 = vadd.f32 %v1600_v3, %v4681_v43  ;;  %v1669_v44 = vadd.f32 %v4671_v38, %v1596_v63 }
 0x63f   :  { %v1602_v62 = vpop.permute.xlu1 %1601 }
 0x647   :  { %v1612_v51 = vpop.permute.xlu0 %1611 }
 0x648   :  { %v1677_v6 = vadd.f32 %v4687_v46, %v1612_v51 }
 0x64a   :  { %4316 = vtanh.f32 %v1677_v6 }
 0x64b   :  { %v1608_v2 = vpop.permute.xlu0 %1607  ;;  %v1614_v13 = vpop.permute.xlu1 %1613 }
 0x64c   :  { %v1678_v14 = vadd.f32 %v4691_v48, %v1614_v13  ;;  %v1675_v49 = vadd.f32 %v1608_v2, %v4689_v47  ;;  %v1672_v47 = vadd.f32 %v1602_v62, %v4685_v45 }
 0x64e   :  { %4318 = vtanh.f32 %v1678_v14 }
 0x64f   :  { %v1564_v16 = vpop.permute.xlu0 %1563  ;;  %v1610_v9 = vpop.permute.xlu1 %1609  ;;  %4320 = vtanh.f32 %v1675_v49 }
 0x650   :  { %v1676_v61 = vadd.f32 %v1610_v9, %v4695_v50  ;;  %v1653_v0 = vadd.f32 %v4639_v22, %v1564_v16 }
 0x652   :  { %4322 = vtanh.f32 %v1676_v61 }
 0x653   :  { %v1592_v46 = vpop.permute.xlu0 %1591  ;;  %v1566_v33 = vpop.permute.xlu1 %1565  ;;  %4324 = vtanh.f32 %v1673_v4 }
 0x654   :  { %v1654_v48 = vadd.f32 %v4643_v24, %v1566_v33  ;;  %4326 = vtanh.f32 %v1674_v30 }
 0x655   :  { %4328 = vtanh.f32 %v1653_v0 }
 0x656   :  { %4330 = vtanh.f32 %v1654_v48 }
 0x657   :  { %v1560_v42 = vpop.permute.xlu0 %1559  ;;  %v1594_v50 = vpop.permute.xlu1 %1593  ;;  %4332 = vtanh.f32 %v1672_v47 }
 0x658   :  { %v1651_v22 = vadd.f32 %v1560_v42, %v4641_v23  ;;  %v5259_v7 = vpop.eup %4316  ;;  %4334 = vtanh.f32 %v1671_v26  ;;  %v1668_v45 = vadd.f32 %v1594_v50, %v4677_v41  ;;  %v1667_v23 = vadd.f32 %v1592_v46, %v4673_v39 }
 0x659   :  { %6147 = vst [vmem:[#allocation13_spill] sm:$0xff] %v5259_v7  ;;  %4336 = vtanh.f32 %v1669_v44 }
 0x65a   :  { %4338 = vtanh.f32 %v1670_v59 }
 0x65b   :  { %v1588_v24 = vpop.permute.xlu0 %1587  ;;  %v1562_v55 = vpop.permute.xlu1 %1561  ;;  %4340 = vtanh.f32 %v1651_v22 }
 0x65c   :  { %v5261_v57 = vpop.eup %4318  ;;  %v1652_v43 = vadd.f32 %v1562_v55, %v4645_v25  ;;  %v1665_v25 = vadd.f32 %v4663_v34, %v1588_v24 }
 0x65d   :  { %6148 = vst [vmem:[#allocation14_spill] sm:$0xff] %v5261_v57  ;;  %v1726_v38 = vpack.c.bf16 %v5261_v57, %v5259_v7  ;;  %v5267_v40 = vpop.eup %4320  ;;  %v5489_v57 = vld [vmem:[%s5930_s1 + $0xb4] ss:$8 sps:$4 sm:$0xff]   ;;  %v5495_v7 = vld [vmem:[%s5930_s1 + $0xb0] ss:$8 sps:$4 sm:$0xff]  }
 0x65e   :  { %6149 = vst [vmem:[#allocation15_spill] sm:$0xff] %v5267_v40  ;;  %4342 = vtanh.f32 %v1652_v43  ;;  %6174 = vst [vmem:[#allocation60_spill] sm:$0xff] %v5489_v57 }
 0x65f   :  { %1773 = vrot.lane.b32.xlu0 %v1726_v38, %s4524_s0  ;;  %v1556_v63 = vpop.permute.xlu0 %1555  ;;  %v1590_v5 = vpop.permute.xlu1 %1589  ;;  %4344 = vtanh.f32 %v1668_v45  ;;  %6175 = vst [vmem:[#allocation61_spill] sm:$0xff] %v5495_v7 }
 0x660   :  { %v5271_v3 = vpop.eup %4322  ;;  %v1666_v41 = vadd.f32 %v4667_v36, %v1590_v5  ;;  %v1649_v39 = vadd.f32 %v4631_v18, %v1556_v63  ;;  %4346 = vtanh.f32 %v1667_v23 }
 0x661   :  { %6150 = vst [vmem:[#allocation16_spill] sm:$0xff] %v5271_v3  ;;  %v5274_v62 = vpop.eup %4324  ;;  %v1725_v51 = vpack.c.bf16 %v5271_v3, %v5267_v40  ;;  %4348 = vtanh.f32 %v1665_v25  ;;  %v5501_v3 = vld [vmem:[%s5930_s1 + $0xc4] ss:$8 sps:$4 sm:$0xff]   ;;  %v5507_v40 = vld [vmem:[%s5930_s1 + $0xc0] ss:$8 sps:$4 sm:$0xff]  }
 0x662   :  { %6151 = vst [vmem:[#allocation17_spill] sm:$0xff] %v5274_v62  ;;  %v5279_v6 = vpop.eup %4326  ;;  %4350 = vtanh.f32 %v1666_v41  ;;  %6176 = vst [vmem:[#allocation62_spill] sm:$0xff] %v5501_v3 }
 0x663   :  { %6152 = vst [vmem:[#allocation18_spill] sm:$0xff] %v5279_v6  ;;  %v5282_v2 = vpop.eup %4328  ;;  %1771 = vrot.lane.b32.xlu0 %v1725_v51, %s4524_s0  ;;  %v1584_v13 = vpop.permute.xlu0 %1583  ;;  %v1724_v36 = vpack.c.bf16 %v5279_v6, %v5274_v62  ;;  %4352 = vtanh.f32 %v1649_v39  ;;  %6177 = vst [vmem:[#allocation63_spill] sm:$0xff] %v5507_v40  ;;  %v5519_v6 = vld [vmem:[%s5930_s1 + $0xd0] ss:$8 sps:$4 sm:$0xff]   ;;  %v5525_v62 = vld [vmem:[%s5930_s1 + $0xe4] ss:$8 sps:$4 sm:$0xff]  }
 0x664   :  { %6153 = vst [vmem:[#allocation19_spill] sm:$0xff] %v5282_v2  ;;  %v1558_v14 = vpop.permute.xlu1 %1557  ;;  %v5285_v34 = vpop.eup %4330  ;;  %v1663_v9 = vadd.f32 %v1584_v13, %v6091_v35  ;;  %6179 = vst [vmem:[#allocation65_spill] sm:$0xff] %v5519_v6 }
 0x665   :  { %6154 = vst [vmem:[#allocation20_spill] sm:$0xff] %v5285_v34  ;;  %v1650_v49 = vadd.f32 %v4635_v20, %v1558_v14  ;;  %v1714_v16 = vpack.c.bf16 %v5285_v34, %v5282_v2  ;;  %v5292_v18 = vpop.eup %4332  ;;  %6180 = vst [vmem:[#allocation66_spill] sm:$0xff] %v5525_v62 }
 0x666   :  { %6155 = vst [vmem:[#allocation21_spill] sm:$0xff] %v5292_v18  ;;  %v5297_v20 = vpop.eup %4334 }
 0x667   :  { %4354 = vtanh.f32 %v1650_v49  ;;  %1769 = vrot.lane.b32.xlu0 %v1724_v36, %s4524_s0  ;;  %1749 = vrot.lane.b32.xlu1 %v1714_v16, %s4524_s0  ;;  %v1552_v4 = vpop.permute.xlu0 %1551  ;;  %6156 = vst [vmem:[#allocation22_spill] sm:$0xff] %v5297_v20  ;;  %v5300_v0 = vpop.eup %4336  ;;  %v1723_v33 = vpack.c.bf16 %v5292_v18, %v5297_v20  ;;  %v5531_v18 = vld [vmem:[%s5930_s1 + $0xe0] ss:$8 sps:$4 sm:$0xff]   ;;  %v5537_v20 = vld [vmem:[%s5930_s1 + $0xf4] ss:$8 sps:$4 sm:$0xff]  }
 0x668   :  { %v1586_v61 = vpop.permute.xlu1 %1585  ;;  %6157 = vst [vmem:[#allocation23_spill] sm:$0xff] %v5300_v0  ;;  %v1647_v46 = vadd.f32 %v1552_v4, %v6098_v60  ;;  %v5305_v48 = vpop.eup %4338  ;;  %4356 = vtanh.f32 %v1663_v9  ;;  %6181 = vst [vmem:[#allocation67_spill] sm:$0xff] %v5531_v18 }
 0x669   :  { %v1664_v30 = vadd.f32 %v1586_v61, %v4669_v37  ;;  %6158 = vst [vmem:[#allocation24_spill] sm:$0xff] %v5305_v48  ;;  %v5307_v35 = vpop.eup %4340  ;;  %v1722_v60 = vpack.c.bf16 %v5305_v48, %v5300_v0  ;;  %6182 = vst [vmem:[#allocation68_spill] sm:$0xff] %v5537_v20  ;;  %v5543_v48 = vld [vmem:[%s5930_s1 + $0xf0] ss:$8 sps:$4 sm:$0xff]  }
 0x66a   :  { %6159 = vst [vmem:[#allocation25_spill] sm:$0xff] %v5307_v35  ;;  %6183 = vst [vmem:[#allocation69_spill] sm:$0xff] %v5543_v48 }
 0x66b   :  { %4358 = vtanh.f32 %v1664_v30  ;;  %1767 = vrot.lane.b32.xlu0 %v1723_v33, %s4524_s0  ;;  %v5310_v26 = vpop.eup %4342 }
 0x66c   :  { %v1554_v47 = vpop.permute.xlu1 %1553  ;;  %6160 = vst [vmem:[#allocation26_spill] sm:$0xff] %v5310_v26  ;;  %4360 = vtanh.f32 %v1647_v46  ;;  %v1713_v42 = vpack.c.bf16 %v5310_v26, %v5307_v35  ;;  %v5317_v50 = vpop.eup %4344 }
 0x66d   :  { %v1648_v37 = vadd.f32 %v1554_v47, %v6094_v10  ;;  %6161 = vst [vmem:[#allocation27_spill] sm:$0xff] %v5317_v50  ;;  %v5321_v44 = vpop.eup %4346 }
 0x66e   :  { %1747 = vrot.lane.b32.xlu1 %v1713_v42, %s4524_s0  ;;  %6162 = vst [vmem:[#allocation28_spill] sm:$0xff] %v5321_v44  ;;  %v5323_v59 = vpop.eup %4348  ;;  %v1721_v10 = vpack.c.bf16 %v5317_v50, %v5321_v44 }
 0x66f   :  { %4362 = vtanh.f32 %v1648_v37  ;;  %1765 = vrot.lane.b32.xlu0 %v1722_v60, %s4524_s0  ;;  %6163 = vst [vmem:[#allocation29_spill] sm:$0xff] %v5323_v59  ;;  %v5327_v22 = vpop.eup %4350  ;;  %v4230_v37 = vld [vmem:[%s5931_s3 + $0x28] sm:$0xff]  }
 0x670   :  { %6164 = vst [vmem:[#allocation30_spill] sm:$0xff] %v5327_v22  ;;  %v5329_v24 = vpop.eup %4352  ;;  %v1720_v43 = vpack.c.bf16 %v5327_v22, %v5323_v59  ;;  %4034 = vmatprep.subr.bf16.mxu0 %v4230_v37 }
 0x671   :  { %6165 = vst [vmem:[#allocation31_spill] sm:$0xff] %v5329_v24  ;;  %4035 = vmatpush3.bf16.msra.mxu0 %v4230_v37  ;;  %v5474_v37 = vld [vmem:[%s5930_s1 + $0xa4] ss:$8 sps:$4 sm:$0xff]  }
 0x672   :  { %6172 = vst [vmem:[#allocation58_spill] sm:$0xff] %v5474_v37 }
 0x673   :  { %1763 = vrot.lane.b32.xlu0 %v1721_v10, %s4524_s0  ;;  %v5360_v10 = vld [vmem:[%s5930_s1] ss:$8 sps:$4 sm:$0xff]  }
 0x674   :  { %v5332_v55 = vpop.eup %4354 }
 0x675   :  { %6166 = vst [vmem:[#allocation32_spill] sm:$0xff] %v5332_v55  ;;  %v1712_v45 = vpack.c.bf16 %v5332_v55, %v5329_v24  ;;  %v5338_v38 = vpop.eup %4356 }
 0x676   :  { %6167 = vst [vmem:[#allocation33_spill] sm:$0xff] %v5338_v38 }
 0x677   :  { %1761 = vrot.lane.b32.xlu0 %v1720_v43, %s4524_s0  ;;  %1745 = vrot.lane.b32.xlu1 %v1712_v45, %s4524_s0  ;;  %v5366_v43 = vld [vmem:[%s5930_s1 + $0x14] ss:$8 sps:$4 sm:$0xff]   ;;  %v5372_v45 = vld [vmem:[%s5930_s1 + $0x10] ss:$8 sps:$4 sm:$0xff]  }
 0x678   :  { %v5342_v23 = vpop.eup %4358 }
 0x679   :  { %6168 = vst [vmem:[#allocation34_spill] sm:$0xff] %v5342_v23  ;;  %v1719_v63 = vpack.c.bf16 %v5342_v23, %v5338_v38  ;;  %v5346_v5 = vpop.eup %4360 }
 0x67a   :  { %6169 = vst [vmem:[#allocation35_spill] sm:$0xff] %v5346_v5 }
 0x67b   :  { %1759 = vrot.lane.b32.xlu0 %v1719_v63, %s4524_s0  ;;  %v5378_v63 = vld [vmem:[%s5930_s1 + $0x24] ss:$8 sps:$4 sm:$0xff]  }
 0x67c   :  { %v5348_v25 = vpop.eup %4362 }
 0x67d   :  { %6170 = vst [vmem:[#allocation56_spill] sm:$0xff] %v5348_v25  ;;  %v1711_v41 = vpack.c.bf16 %v5348_v25, %v5346_v5  ;;  %v6184_v25 = vld [vmem:[#allocation40_spill] sm:$0xff] }
 0x67f   :  { %1743 = vrot.lane.b32.xlu1 %v1711_v41, %s4524_s0  ;;  %v5384_v41 = vld [vmem:[%s5930_s1 + $0x20] ss:$8 sps:$4 sm:$0xff]  }
 0x690   :  { %v1758_v51 = vpop.permute.xlu1 %1757 }
 0x694   :  { %v1756_v39 = vpop.permute.xlu1 %1755 }
 0x698   :  { %v1754_v49 = vpop.permute.xlu1 %1753 }
 0x69c   :  { %v1752_v16 = vpop.permute.xlu1 %1751 }
 0x6d1   :  { %v1774_v13 = vpop.permute.xlu0 %1773 }
 0x6d2   :  { %3648 = vmatprep.subr.bf16.mxu1 %v1774_v13  ;;  %v5402_v13 = vld [vmem:[%s5930_s1 + $0x44] ss:$8 sps:$4 sm:$0xff]  }
 0x6d3   :  { %3649 = vmatpush3.bf16.msra.mxu1 %v1758_v51  ;;  %v5390_v51 = vld [vmem:[%s5930_s1 + $0x34] ss:$8 sps:$4 sm:$0xff]  }
 0x6d5   :  { %v1772_v14 = vpop.permute.xlu0 %1771 }
 0x6d6   :  { %3650 = vmatprep.subr.bf16.mxu1 %v1772_v14  ;;  %v5408_v14 = vld [vmem:[%s5930_s1 + $0x40] ss:$8 sps:$4 sm:$0xff]  }
 0x6d7   :  { %3651 = vmatpush3.bf16.msra.mxu1 %v1756_v39  ;;  %v5396_v39 = vld [vmem:[%s5930_s1 + $0x30] ss:$8 sps:$4 sm:$0xff]  }
 0x6d9   :  { %v1770_v36 = vpop.permute.xlu0 %1769  ;;  %v1750_v4 = vpop.permute.xlu1 %1749 }
 0x6da   :  { %3652 = vmatprep.subr.bf16.mxu1 %v1770_v36  ;;  %v5420_v36 = vld [vmem:[%s5930_s1 + $0x50] ss:$8 sps:$4 sm:$0xff]  }
 0x6db   :  { %3653 = vmatpush3.bf16.msra.mxu1 %v1754_v49  ;;  %v5414_v49 = vld [vmem:[%s5930_s1 + $0x54] ss:$8 sps:$4 sm:$0xff]  }
 0x6dd   :  { %v1768_v9 = vpop.permute.xlu0 %1767 }
 0x6de   :  { %3654 = vmatprep.subr.bf16.mxu1 %v1768_v9  ;;  %v5432_v9 = vld [vmem:[%s5930_s1 + $0x60] ss:$8 sps:$4 sm:$0xff]  }
 0x6df   :  { %3655 = vmatpush3.bf16.msra.mxu1 %v1752_v16  ;;  %v5426_v16 = vld [vmem:[%s5930_s1 + $0x64] ss:$8 sps:$4 sm:$0xff]  }
 0x6e0   :  { %v1748_v30 = vpop.permute.xlu1 %1747 }
 0x6e1   :  { %v1766_v61 = vpop.permute.xlu0 %1765 }
 0x6e2   :  { %3656 = vmatprep.subr.bf16.mxu1 %v1766_v61  ;;  %v5444_v61 = vld [vmem:[%s5930_s1 + $0x70] ss:$8 sps:$4 sm:$0xff]  }
 0x6e3   :  { %3657 = vmatpush3.bf16.msra.mxu1 %v1750_v4  ;;  %v5438_v4 = vld [vmem:[%s5930_s1 + $0x74] ss:$8 sps:$4 sm:$0xff]  }
 0x6e5   :  { %v1764_v46 = vpop.permute.xlu0 %1763 }
 0x6e6   :  { %3658 = vmatprep.subr.bf16.mxu1 %v1764_v46  ;;  %v5456_v46 = vld [vmem:[%s5930_s1 + $0x80] ss:$8 sps:$4 sm:$0xff]  }
 0x6e7   :  { %3659 = vmatpush3.bf16.msra.mxu1 %v1748_v30  ;;  %v5450_v30 = vld [vmem:[%s5930_s1 + $0x84] ss:$8 sps:$4 sm:$0xff]  }
 0x6e9   :  { %v1762_v33 = vpop.permute.xlu0 %1761  ;;  %v1746_v47 = vpop.permute.xlu1 %1745 }
 0x6ea   :  { %3660 = vmatprep.subr.bf16.mxu1 %v1762_v33  ;;  %v5462_v33 = vld [vmem:[%s5930_s1 + $0x94] ss:$8 sps:$4 sm:$0xff]  }
 0x6eb   :  { %3661 = vmatpush3.bf16.msra.mxu1 %v1746_v47  ;;  %v5468_v47 = vld [vmem:[%s5930_s1 + $0x90] ss:$8 sps:$4 sm:$0xff]  }
 0x6ec   :  { %6171 = vst [vmem:[#allocation57_spill] sm:$0xff] %v5468_v47 }
 0x6ed   :  { %v1760_v60 = vpop.permute.xlu0 %1759 }
 0x6ee   :  { %3662 = vmatprep.subr.bf16.mxu1 %v1760_v60  ;;  %v4231_v60 = vld [vmem:[%s5931_s3 + $0x20] sm:$0xff]  }
 0x6ef   :  { %4036 = vmatprep.subr.bf16.mxu0 %v4231_v60 }
 0x6f0   :  { %4037 = vmatpush3.bf16.msra.mxu0 %v4231_v60  ;;  %v5513_v60 = vld [vmem:[%s5930_s1 + $0xd4] ss:$8 sps:$4 sm:$0xff]  }
 0x6f1   :  { %v1744_v42 = vpop.permute.xlu1 %1743  ;;  %6178 = vst [vmem:[#allocation64_spill] sm:$0xff] %v5513_v60 }
 0x6f2   :  { %3663 = vmatpush3.bf16.msra.mxu1 %v1744_v42  ;;  %v5483_v42 = vld [vmem:[%s5930_s1 + $0xa0] ss:$8 sps:$4 sm:$0xff]  }
 0x6f3   :  { %6173 = vst [vmem:[#allocation59_spill] sm:$0xff] %v5483_v42 }
 0x6f5   :  { %1824 = vmatmul.mubr.bf16.vlgmr.msra.gmra.mxu1 %v5360_v10 }
 0x6f6   :  { %1831 = vmatprep.mubr.bf16.mxu1 %v5366_v43 }
 0x6fd   :  { %1832 = vmatmul.mubr.bf16.gmra.mxu1 %v5372_v45 }
 0x6fe   :  { %1839 = vmatprep.mubr.bf16.mxu1 %v5378_v63 }
 0x705   :  { %1840 = vmatmul.mubr.bf16.gmra.mxu1 %v5384_v41 }
 0x706   :  { %1847 = vmatprep.mubr.bf16.mxu1 %v5390_v51 }
 0x70d   :  { %1848 = vmatmul.mubr.bf16.gmra.mxu1 %v5396_v39 }
 0x70e   :  { %1855 = vmatprep.mubr.bf16.mxu1 %v5402_v13 }
 0x715   :  { %1856 = vmatmul.mubr.bf16.gmra.mxu1 %v5408_v14 }
 0x716   :  { %1863 = vmatprep.mubr.bf16.mxu1 %v5414_v49 }
 0x71d   :  { %1864 = vmatmul.mubr.bf16.gmra.mxu1 %v5420_v36 }
 0x71e   :  { %1871 = vmatprep.mubr.bf16.mxu1 %v5426_v16 }
 0x725   :  { %1872 = vmatmul.mubr.bf16.gmra.mxu1 %v5432_v9 }
 0x726   :  { %1879 = vmatprep.mubr.bf16.mxu1 %v5438_v4 }
 0x72d   :  { %1880 = vmatmul.mubr.bf16.gmra.mxu1 %v5444_v61 }
 0x72e   :  { %1887 = vmatprep.mubr.bf16.mxu1 %v5450_v30 }
 0x735   :  { %1888 = vmatmul.mubr.bf16.gmra.mxu1 %v5456_v46 }
 0x736   :  { %1895 = vmatprep.mubr.bf16.mxu1 %v5462_v33 }
 0x73d   :  { %1896 = vmatmul.mubr.bf16.gmra.mxu1 %v5468_v47 }
 0x73e   :  { %1903 = vmatprep.mubr.bf16.mxu1 %v5474_v37  ;;  %v6189_v37 = vld [vmem:[#allocation46_spill] sm:$0xff] }
 0x745   :  { %1904 = vmatmul.mubr.bf16.gmra.mxu1 %v5483_v42 }
 0x746   :  { %1911 = vmatprep.mubr.bf16.mxu1 %v5489_v57 }
 0x74d   :  { %1912 = vmatmul.mubr.bf16.gmra.mxu1 %v5495_v7  ;;  %v6188_v7 = vld [vmem:[#allocation45_spill] sm:$0xff] }
 0x74e   :  { %1919 = vmatprep.mubr.bf16.mxu1 %v5501_v3 }
 0x755   :  { %1920 = vmatmul.mubr.bf16.gmra.mxu1 %v5507_v40  ;;  %v6187_v40 = vld [vmem:[#allocation42_spill] sm:$0xff] }
 0x756   :  { %1927 = vmatprep.mubr.bf16.mxu1 %v5513_v60 }
 0x75d   :  { %1928 = vmatmul.mubr.bf16.gmra.mxu1 %v5519_v6 }
 0x75e   :  { %1935 = vmatprep.mubr.bf16.mxu1 %v5525_v62  ;;  %v6186_v62 = vld [vmem:[#allocation43_spill] sm:$0xff] }
 0x765   :  { %1936 = vmatmul.mubr.bf16.gmra.mxu1 %v5531_v18 }
 0x766   :  { %1943 = vmatprep.mubr.bf16.mxu1 %v5537_v20 }
 0x76d   :  { %1944 = vmatmul.mubr.bf16.gmra.mxu1 %v5543_v48  ;;  %v6185_v48 = vld [vmem:[#allocation41_spill] sm:$0xff] }
 0x7b5   :  { %v3664_v0 = vpop.f32.mrf.mxu1 }
 0x7b7   :  { %v3665_v50 = vpop.f32.mrf.mxu1 }
 0x7b8   :  { %v3666_v59 = vadd.f32 %v3665_v50, %v3664_v0 }
 0x7b9   :  { %v3667_v44 = vpop.f32.mrf.mxu1 }
 0x7bb   :  { %v3668_v22 = vpop.f32.mrf.mxu1 }
 0x7bc   :  { %v3669_v23 = vadd.f32 %v3668_v22, %v3667_v44 }
 0x7bd   :  { %v3670_v38 = vpop.f32.mrf.mxu1 }
 0x7be   :  { %v1952_v31 = vpack.c.bf16 %v3669_v23, %v3666_v59 }
 0x7bf   :  { %v3671_v32 = vpop.f32.mrf.mxu1 }
 0x7c0   :  { %4038 = vmatprep.mubr.msk.bf16.mxu0 %vm152_vm0, %v1952_v31  ;;  %v3672_v29 = vadd.f32 %v3671_v32, %v3670_v38 }
 0x7c1   :  { %v3673_v15 = vpop.f32.mrf.mxu1 }
 0x7c3   :  { %v3674_v28 = vpop.f32.mrf.mxu1 }
 0x7c4   :  { %v3675_v27 = vadd.f32 %v3674_v28, %v3673_v15 }
 0x7c5   :  { %v3676_v19 = vpop.f32.mrf.mxu1 }
 0x7c6   :  { %v1953_v54 = vpack.c.bf16 %v3675_v27, %v3672_v29 }
 0x7c7   :  { %v3677_v34 = vpop.f32.mrf.mxu1 }
 0x7c8   :  { %4039 = vmatmul.mubr.msk.bf16.vlgmr.msra.gmra.mxu0 %vm152_vm0, %v1953_v54  ;;  %v3678_v35 = vadd.f32 %v3677_v34, %v3676_v19 }
 0x7c9   :  { %v3679_v2 = vpop.f32.mrf.mxu1 }
 0x7cb   :  { %v3680_v26 = vpop.f32.mrf.mxu1 }
 0x7cc   :  { %v3681_v55 = vadd.f32 %v3680_v26, %v3679_v2 }
 0x7cd   :  { %v3682_v0 = vpop.f32.mrf.mxu1 }
 0x7ce   :  { %v1954_v50 = vpack.c.bf16 %v3681_v55, %v3678_v35 }
 0x7cf   :  { %v3683_v44 = vpop.f32.mrf.mxu1 }
 0x7d0   :  { %4042 = vmatprep.mubr.msk.bf16.mxu0 %vm152_vm0, %v1954_v50  ;;  %v3684_v22 = vadd.f32 %v3683_v44, %v3682_v0 }
 0x7d1   :  { %v3685_v59 = vpop.f32.mrf.mxu1 }
 0x7d3   :  { %v3686_v31 = vpop.f32.mrf.mxu1 }
 0x7d4   :  { %v3687_v23 = vadd.f32 %v3686_v31, %v3685_v59 }
 0x7d5   :  { %v3688_v32 = vpop.f32.mrf.mxu1 }
 0x7d6   :  { %v1955_v28 = vpack.c.bf16 %v3687_v23, %v3684_v22 }
 0x7d7   :  { %v3689_v15 = vpop.f32.mrf.mxu1 }
 0x7d8   :  { %4043 = vmatmul.mubr.msk.bf16.gmra.mxu0 %vm152_vm0, %v1955_v28  ;;  %v3690_v54 = vadd.f32 %v3689_v15, %v3688_v32 }
 0x7d9   :  { %v3691_v29 = vpop.f32.mrf.mxu1 }
 0x7db   :  { %v3692_v27 = vpop.f32.mrf.mxu1 }
 0x7dc   :  { %v3693_v38 = vadd.f32 %v3692_v27, %v3691_v29 }
 0x7dd   :  { %v3694_v19 = vpop.f32.mrf.mxu1 }
 0x7de   :  { %v1956_v2 = vpack.c.bf16 %v3693_v38, %v3690_v54 }
 0x7df   :  { %v3695_v34 = vpop.f32.mrf.mxu1 }
 0x7e0   :  { %4046 = vmatprep.mubr.msk.bf16.mxu0 %vm152_vm0, %v1956_v2  ;;  %v3696_v55 = vadd.f32 %v3695_v34, %v3694_v19 }
 0x7e1   :  { %v3697_v35 = vpop.f32.mrf.mxu1 }
 0x7e3   :  { %v3698_v26 = vpop.f32.mrf.mxu1 }
 0x7e4   :  { %v3699_v50 = vadd.f32 %v3698_v26, %v3697_v35 }
 0x7e5   :  { %v3700_v0 = vpop.f32.mrf.mxu1 }
 0x7e6   :  { %v1957_v44 = vpack.c.bf16 %v3699_v50, %v3696_v55 }
 0x7e7   :  { %v3701_v59 = vpop.f32.mrf.mxu1 }
 0x7e8   :  { %4047 = vmatmul.mubr.msk.bf16.gmra.mxu0 %vm152_vm0, %v1957_v44  ;;  %v3702_v23 = vadd.f32 %v3701_v59, %v3700_v0 }
 0x7e9   :  { %v3703_v31 = vpop.f32.mrf.mxu1 }
 0x7eb   :  { %v3704_v22 = vpop.f32.mrf.mxu1 }
 0x7ec   :  { %v3705_v28 = vadd.f32 %v3704_v22, %v3703_v31 }
 0x7ed   :  { %v3706_v32 = vpop.f32.mrf.mxu1 }
 0x7ee   :  { %v1958_v15 = vpack.c.bf16 %v3705_v28, %v3702_v23 }
 0x7ef   :  { %v3707_v29 = vpop.f32.mrf.mxu1 }
 0x7f0   :  { %4050 = vmatprep.mubr.msk.bf16.mxu0 %vm152_vm0, %v1958_v15  ;;  %v3708_v38 = vadd.f32 %v3707_v29, %v3706_v32 }
 0x7f1   :  { %v3709_v27 = vpop.f32.mrf.mxu1 }
 0x7f3   :  { %v3710_v54 = vpop.f32.mrf.mxu1 }
 0x7f4   :  { %v3711_v2 = vadd.f32 %v3710_v54, %v3709_v27 }
 0x7f5   :  { %v3712_v19 = vpop.f32.mrf.mxu1 }
 0x7f6   :  { %v1959_v34 = vpack.c.bf16 %v3711_v2, %v3708_v38 }
 0x7f7   :  { %v3713_v35 = vpop.f32.mrf.mxu1 }
 0x7f8   :  { %4051 = vmatmul.mubr.msk.bf16.gmra.mxu0 %vm152_vm0, %v1959_v34  ;;  %v3714_v50 = vadd.f32 %v3713_v35, %v3712_v19 }
 0x7f9   :  { %v3715_v26 = vpop.f32.mrf.mxu1 }
 0x7fb   :  { %v3716_v55 = vpop.f32.mrf.mxu1 }
 0x7fc   :  { %v3717_v44 = vadd.f32 %v3716_v55, %v3715_v26 }
 0x7fd   :  { %v3718_v0 = vpop.f32.mrf.mxu1 }
 0x7fe   :  { %v1960_v59 = vpack.c.bf16 %v3717_v44, %v3714_v50 }
 0x7ff   :  { %v3719_v31 = vpop.f32.mrf.mxu1 }
 0x800   :  { %4054 = vmatprep.mubr.msk.bf16.mxu0 %vm152_vm0, %v1960_v59  ;;  %v3720_v28 = vadd.f32 %v3719_v31, %v3718_v0 }
 0x801   :  { %v3721_v22 = vpop.f32.mrf.mxu1 }
 0x803   :  { %v3722_v23 = vpop.f32.mrf.mxu1 }
 0x804   :  { %v3723_v15 = vadd.f32 %v3722_v23, %v3721_v22 }
 0x805   :  { %v3724_v32 = vpop.f32.mrf.mxu1 }
 0x806   :  { %v1961_v29 = vpack.c.bf16 %v3723_v15, %v3720_v28 }
 0x807   :  { %v3725_v27 = vpop.f32.mrf.mxu1 }
 0x808   :  { %4055 = vmatmul.mubr.msk.bf16.gmra.mxu0 %vm152_vm0, %v1961_v29  ;;  %v3726_v2 = vadd.f32 %v3725_v27, %v3724_v32 }
 0x809   :  { %v3727_v54 = vpop.f32.mrf.mxu1 }
 0x80b   :  { %v3728_v38 = vpop.f32.mrf.mxu1 }
 0x80c   :  { %v3729_v34 = vadd.f32 %v3728_v38, %v3727_v54 }
 0x80d   :  { %v3730_v19 = vpop.f32.mrf.mxu1 }
 0x80e   :  { %v1962_v35 = vpack.c.bf16 %v3729_v34, %v3726_v2 }
 0x80f   :  { %v3731_v26 = vpop.f32.mrf.mxu1 }
 0x810   :  { %4058 = vmatprep.mubr.msk.bf16.mxu0 %vm152_vm0, %v1962_v35  ;;  %v3732_v44 = vadd.f32 %v3731_v26, %v3730_v19 }
 0x811   :  { %v3733_v55 = vpop.f32.mrf.mxu1 }
 0x813   :  { %v3734_v50 = vpop.f32.mrf.mxu1 }
 0x814   :  { %v3735_v59 = vadd.f32 %v3734_v50, %v3733_v55 }
 0x815   :  { %v3736_v0 = vpop.f32.mrf.mxu1 }
 0x816   :  { %v1963_v31 = vpack.c.bf16 %v3735_v59, %v3732_v44 }
 0x817   :  { %v3737_v22 = vpop.f32.mrf.mxu1 }
 0x818   :  { %4059 = vmatmul.mubr.msk.bf16.gmra.mxu0 %vm152_vm0, %v1963_v31  ;;  %v3738_v15 = vadd.f32 %v3737_v22, %v3736_v0 }
 0x819   :  { %v3739_v23 = vpop.f32.mrf.mxu1 }
 0x81b   :  { %v3740_v28 = vpop.f32.mrf.mxu1 }
 0x81c   :  { %v3741_v29 = vadd.f32 %v3740_v28, %v3739_v23 }
 0x81d   :  { %v3742_v32 = vpop.f32.mrf.mxu1 }
 0x81e   :  { %v1964_v27 = vpack.c.bf16 %v3741_v29, %v3738_v15 }
 0x81f   :  { %v3743_v54 = vpop.f32.mrf.mxu1 }
 0x820   :  { %4062 = vmatprep.mubr.msk.bf16.mxu0 %vm152_vm0, %v1964_v27  ;;  %v3744_v34 = vadd.f32 %v3743_v54, %v3742_v32 }
 0x821   :  { %v3745_v38 = vpop.f32.mrf.mxu1 }
 0x823   :  { %v3746_v2 = vpop.f32.mrf.mxu1 }
 0x824   :  { %v3747_v35 = vadd.f32 %v3746_v2, %v3745_v38 }
 0x825   :  { %v3748_v19 = vpop.f32.mrf.mxu1 }
 0x826   :  { %v1965_v26 = vpack.c.bf16 %v3747_v35, %v3744_v34 }
 0x827   :  { %v3749_v55 = vpop.f32.mrf.mxu1 }
 0x828   :  { %4063 = vmatmul.mubr.msk.bf16.gmra.mxu0 %vm152_vm0, %v1965_v26  ;;  %v3750_v59 = vadd.f32 %v3749_v55, %v3748_v19 }
 0x829   :  { %v3751_v50 = vpop.f32.mrf.mxu1 }
 0x82b   :  { %v3752_v44 = vpop.f32.mrf.mxu1 }
 0x82c   :  { %v3753_v31 = vadd.f32 %v3752_v44, %v3751_v50 }
 0x82d   :  { %v3754_v0 = vpop.f32.mrf.mxu1 }
 0x82e   :  { %v1966_v22 = vpack.c.bf16 %v3753_v31, %v3750_v59 }
 0x82f   :  { %v3755_v23 = vpop.f32.mrf.mxu1 }
 0x830   :  { %4066 = vmatprep.mubr.msk.bf16.mxu0 %vm152_vm0, %v1966_v22  ;;  %v3756_v29 = vadd.f32 %v3755_v23, %v3754_v0 }
 0x831   :  { %v3757_v28 = vpop.f32.mrf.mxu1 }
 0x833   :  { %v3758_v15 = vpop.f32.mrf.mxu1 }
 0x834   :  { %v3759_v27 = vadd.f32 %v3758_v15, %v3757_v28 }
 0x836   :  { %v1967_v32 = vpack.c.bf16 %v3759_v27, %v3756_v29 }
 0x838   :  { %4067 = vmatmul.mubr.msk.bf16.gmra.mxu0 %vm152_vm0, %v1967_v32 }
 0x839   :  { %2306 = vmatprep.mubr.bf16.mxu0 %v5175_v8 }
 0x888   :  { %v4040_v54 = vpop.f32.mrf.mxu0 }
 0x889   :  { %v2196_v38 = vadd.f32 %v5105_v21, %v4040_v54 }
 0x88a   :  { %v2067_v2 = vpop.f32.mrf.mxu0 }
 0x88b   :  { %v2194_v34 = vadd.f32 %v5118_v11, %v2067_v2  ;;  %4364 = vtanh.f32 %v2196_v38 }
 0x88c   :  { %v4041_v35 = vpop.f32.mrf.mxu0 }
 0x88d   :  { %v2197_v19 = vadd.f32 %v5099_v12, %v4041_v35 }
 0x88e   :  { %v2070_v26 = vpop.f32.mrf.mxu0 }
 0x88f   :  { %4366 = vtanh.f32 %v2197_v19  ;;  %v2195_v55 = vadd.f32 %v5111_v1, %v2070_v26 }
 0x890   :  { %4368 = vtanh.f32 %v2194_v34 }
 0x891   :  { %4370 = vtanh.f32 %v2195_v55 }
 0x898   :  { %v4044_v50 = vpop.f32.mrf.mxu0  ;;  %v5568_v59 = vpop.eup %4364 }
 0x899   :  { %v2200_v44 = vadd.f32 %v5081_v52, %v4044_v50 }
 0x89a   :  { %v2083_v8 = vpop.f32.mrf.mxu0 }
 0x89b   :  { %v2198_v11 = vadd.f32 %v5093_v17, %v2083_v8  ;;  %4372 = vtanh.f32 %v2200_v44 }
 0x89c   :  { %v5570_v21 = vpop.eup %4366  ;;  %v4045_v31 = vpop.f32.mrf.mxu0 }
 0x89d   :  { %v5573_v0 = vpop.eup %4368  ;;  %v2201_v12 = vadd.f32 %v5075_v53, %v4045_v31 }
 0x89e   :  { %v5578_v22 = vpop.eup %4370  ;;  %v2086_v23 = vpop.f32.mrf.mxu0 }
 0x89f   :  { %4374 = vtanh.f32 %v2201_v12  ;;  %v2199_v52 = vadd.f32 %v5087_v56, %v2086_v23 }
 0x8a0   :  { %4376 = vtanh.f32 %v2198_v11 }
 0x8a1   :  { %4378 = vtanh.f32 %v2199_v52 }
 0x8a8   :  { %v5583_v17 = vpop.eup %4372  ;;  %v4048_v56 = vpop.f32.mrf.mxu0 }
 0x8aa   :  { %v2099_v54 = vpop.f32.mrf.mxu0 }
 0x8ac   :  { %v5585_v15 = vpop.eup %4374  ;;  %v4049_v38 = vpop.f32.mrf.mxu0 }
 0x8ad   :  { %v5587_v53 = vpop.eup %4376 }
 0x8ae   :  { %v5591_v27 = vpop.eup %4378  ;;  %v2102_v2 = vpop.f32.mrf.mxu0 }
 0x8b8   :  { %v4052_v34 = vpop.f32.mrf.mxu0 }
 0x8b9   :  { %v2208_v29 = vadd.f32 %v4997_v58, %v4052_v34  ;;  %v6190_v58 = vld [vmem:[#allocation44_spill] sm:$0xff] }
 0x8ba   :  { %v2115_v35 = vpop.f32.mrf.mxu0 }
 0x8bb   :  { %4380 = vtanh.f32 %v2208_v29  ;;  %v6199_v29 = vld [vmem:[#allocation38_spill] sm:$0xff] }
 0x8bc   :  { %v4053_v19 = vpop.f32.mrf.mxu0 }
 0x8bd   :  { %v2209_v5 = vadd.f32 %v6184_v25, %v4053_v19  ;;  %v6191_v25 = vld [vmem:[#allocation47_spill] sm:$0xff] }
 0x8be   :  { %v2118_v26 = vpop.f32.mrf.mxu0  ;;  %v2206_v19 = vadd.f32 %v6191_v25, %v2115_v35  ;;  %v2202_v35 = vadd.f32 %v6199_v29, %v2099_v54 }
 0x8bf   :  { %4382 = vtanh.f32 %v2209_v5  ;;  %v2207_v57 = vadd.f32 %v6188_v7, %v2118_v26  ;;  %v6195_v7 = vld [vmem:[#allocation36_spill] sm:$0xff]  ;;  %v6201_v26 = vld [vmem:[#allocation37_spill] sm:$0xff] }
 0x8c8   :  { %v5595_v55 = vpop.f32.mrf.mxu0 }
 0x8ca   :  { %v5597_v50 = vpop.f32.mrf.mxu0 }
 0x8cc   :  { %v4057_v44 = vpop.f32.mrf.mxu0 }
 0x8ce   :  { %v5599_v8 = vpop.f32.mrf.mxu0 }
 0x8d8   :  { %v4060_v11 = vpop.f32.mrf.mxu0 }
 0x8da   :  { %v2147_v31 = vpop.f32.mrf.mxu0 }
 0x8dc   :  { %v4061_v12 = vpop.f32.mrf.mxu0 }
 0x8de   :  { %v2150_v23 = vpop.f32.mrf.mxu0 }
 0x8e8   :  { %v4064_v52 = vpop.f32.mrf.mxu0 }
 0x8ea   :  { %v2163_v28 = vpop.f32.mrf.mxu0 }
 0x8ec   :  { %v4065_v1 = vpop.f32.mrf.mxu0 }
 0x8ed   :  { %v2221_v47 = vadd.f32 %v6189_v37, %v4065_v1  ;;  %v6196_v37 = vld [vmem:[#allocation4_spill] sm:$0xff]  ;;  %v6198_v1 = vld [vmem:[#allocation3_spill] sm:$0xff] }
 0x8ee   :  { %v2166_v32 = vpop.f32.mrf.mxu0 }
 0x8f8   :  { %v4068_v24 = vpop.f32.mrf.mxu0 }
 0x8f9   :  { %v2224_v20 = vadd.f32 %v6185_v48, %v4068_v24  ;;  %v6192_v48 = vld [vmem:[#allocation48_spill] sm:$0xff] }
 0x8fa   :  { %v2179_v18 = vpop.f32.mrf.mxu0  ;;  %v2220_v24 = vadd.f32 %v6192_v48, %v4064_v52  ;;  %v2215_v52 = vadd.f32 %v6201_v26, %v2150_v23  ;;  %v6203_v48 = vld [vmem:[#allocation52_spill] sm:$0xff]  ;;  %v6204_v23 = vld [vmem:[#allocation53_spill] sm:$0xff] }
 0x8fb   :  { %v2222_v6 = vadd.f32 %v6186_v62, %v2179_v18  ;;  %4384 = vtanh.f32 %v2224_v20  ;;  %v6193_v62 = vld [vmem:[#allocation49_spill] sm:$0xff]  ;;  %v2204_v20 = vadd.f32 %v6195_v7, %v4048_v56 }
 0x8fc   :  { %v4069_v60 = vpop.f32.mrf.mxu0  ;;  %v2205_v18 = vadd.f32 %v6193_v62, %v4049_v38  ;;  %v4381_v38 = vpop.eup %4380 }
 0x8fd   :  { %v2225_v3 = vadd.f32 %v6187_v40, %v4069_v60  ;;  %v6194_v40 = vld [vmem:[#allocation50_spill] sm:$0xff] }
 0x8fe   :  { %v2182_v42 = vpop.f32.mrf.mxu0  ;;  %v2219_v5 = vadd.f32 %v6194_v40, %v2166_v32  ;;  %v4383_v32 = vpop.eup %4382  ;;  %v2212_v40 = vadd.f32 %v6204_v23, %v5595_v55 }
 0x8ff   :  { %4386 = vtanh.f32 %v2225_v3  ;;  %v2223_v34 = vadd.f32 %v6190_v58, %v2182_v42  ;;  %v2218_v3 = vadd.f32 %v6196_v37, %v2163_v28  ;;  %v6197_v42 = vld [vmem:[#allocation39_spill] sm:$0xff] }
 0x900   :  { %4388 = vtanh.f32 %v2222_v6  ;;  %v2203_v60 = vadd.f32 %v6197_v42, %v2102_v2  ;;  %v2217_v6 = vadd.f32 %v6198_v1, %v4061_v12  ;;  %v6202_v2 = vld [vmem:[#allocation51_spill] sm:$0xff] }
 0x901   :  { %4390 = vtanh.f32 %v2223_v34  ;;  %v2214_v12 = vadd.f32 %v6202_v2, %v2147_v31 }
 0x902   :  { %4392 = vtanh.f32 %v2207_v57  ;;  %v6200_v57 = vld [vmem:[#allocation2_spill] sm:$0xff] }
 0x903   :  { %4394 = vtanh.f32 %v2221_v47  ;;  %v2216_v47 = vadd.f32 %v6200_v57, %v4060_v11 }
 0x904   :  { %4396 = vtanh.f32 %v2206_v19  ;;  %v2265_v19 = vpack.c.bf16 %v4383_v32, %v4381_v38 }
 0x905   :  { %4398 = vtanh.f32 %v2220_v24  ;;  %v2213_v24 = vadd.f32 %v6203_v48, %v4057_v44  ;;  %v6209_v48 = vpack.c.bf16 %v5570_v21, %v5568_v59 }
 0x906   :  { %4400 = vtanh.f32 %v2205_v18 }
 0x907   :  { %4402 = vtanh.f32 %v2219_v5 }
 0x908   :  { %4404 = vtanh.f32 %v2204_v20  ;;  %v4385_v56 = vpop.eup %4384  ;;  %v6205_v20 = vld [vmem:[#allocation54_spill] sm:$0xff] }
 0x909   :  { %4406 = vtanh.f32 %v2218_v3  ;;  %v2211_v37 = vadd.f32 %v6205_v20, %v5599_v8 }
 0x90a   :  { %4408 = vtanh.f32 %v2203_v60  ;;  %v6206_v60 = vld [vmem:[#allocation55_spill] sm:$0xff] }
 0x90b   :  { %4410 = vtanh.f32 %v2217_v6  ;;  %v2210_v1 = vadd.f32 %v6206_v60, %v5597_v50 }
 0x90c   :  { %v4387_v28 = vpop.eup %4386  ;;  %4412 = vtanh.f32 %v2202_v35 }
 0x90d   :  { %v4389_v58 = vpop.eup %4388  ;;  %4414 = vtanh.f32 %v2216_v47  ;;  %v2273_v34 = vpack.c.bf16 %v4387_v28, %v4385_v56  ;;  %v6207_v28 = vpack.c.bf16 %v5585_v15, %v5583_v17  ;;  %v6210_v17 = vpack.c.bf16 %v5578_v22, %v5573_v0 }
 0x90e   :  { %v4391_v25 = vpop.eup %4390  ;;  %4416 = vtanh.f32 %v2215_v52 }
 0x90f   :  { %v4393_v54 = vpop.eup %4392  ;;  %3778 = vmatprep.subr.bf16.mxu0 %v2273_v34  ;;  %v2272_v11 = vpack.c.bf16 %v4391_v25, %v4389_v58  ;;  %4418 = vtanh.f32 %v2214_v12  ;;  %v6208_v34 = vpack.c.bf16 %v5591_v27, %v5587_v53 }
 0x910   :  { %v4395_v62 = vpop.eup %4394  ;;  %3779 = vmatpush3.bf16.msra.mxu0 %v2265_v19  ;;  %4420 = vtanh.f32 %v2213_v24 }
 0x911   :  { %v4397_v18 = vpop.eup %4396  ;;  %3780 = vmatprep.subr.bf16.mxu0 %v2272_v11  ;;  %4422 = vtanh.f32 %v2212_v40 }
 0x912   :  { %v4399_v5 = vpop.eup %4398  ;;  %v2264_v7 = vpack.c.bf16 %v4393_v54, %v4397_v18  ;;  %4424 = vtanh.f32 %v2211_v37  ;;  %v4232_v54 = vld [vmem:[%s5931_s3 + $0x38] sm:$0xff]  }
 0x913   :  { %v4401_v31 = vpop.eup %4400  ;;  %v2271_v3 = vpack.c.bf16 %v4395_v62, %v4399_v5  ;;  %4426 = vtanh.f32 %v2210_v1  ;;  %4070 = vmatprep.subr.bf16.mxu1 %v4232_v54 }
 0x914   :  { %v4403_v44 = vpop.eup %4402  ;;  %3781 = vmatpush3.bf16.msra.mxu0 %v2264_v7  ;;  %4071 = vmatpush3.bf16.msra.mxu1 %v4232_v54 }
 0x915   :  { %v4405_v42 = vpop.eup %4404  ;;  %3782 = vmatprep.subr.bf16.mxu0 %v2271_v3 }
 0x916   :  { %v4407_v6 = vpop.eup %4406  ;;  %v2263_v55 = vpack.c.bf16 %v4401_v31, %v4405_v42 }
 0x917   :  { %v4409_v29 = vpop.eup %4408  ;;  %v2270_v35 = vpack.c.bf16 %v4403_v44, %v4407_v6 }
 0x918   :  { %v4411_v38 = vpop.eup %4410  ;;  %3783 = vmatpush3.bf16.msra.mxu0 %v2263_v55 }
 0x919   :  { %v4413_v57 = vpop.eup %4412  ;;  %3784 = vmatprep.subr.bf16.mxu0 %v2270_v35 }
 0x91a   :  { %v4415_v8 = vpop.eup %4414  ;;  %v2262_v47 = vpack.c.bf16 %v4409_v29, %v4413_v57 }
 0x91b   :  { %v2269_v32 = vpack.c.bf16 %v4411_v38, %v4415_v8  ;;  %v4417_v56 = vpop.eup %4416 }
 0x91c   :  { %3785 = vmatpush3.bf16.msra.mxu0 %v2262_v47  ;;  %v4419_v26 = vpop.eup %4418 }
 0x91d   :  { %3786 = vmatprep.subr.bf16.mxu0 %v2269_v32  ;;  %v2268_v52 = vpack.c.bf16 %v4417_v56, %v4419_v26  ;;  %v4421_v50 = vpop.eup %4420 }
 0x91e   :  { %v4423_v58 = vpop.eup %4422 }
 0x91f   :  { %v2267_v2 = vpack.c.bf16 %v4421_v50, %v4423_v58  ;;  %v4425_v12 = vpop.eup %4424 }
 0x920   :  { %3787 = vmatpush3.bf16.msra.mxu0 %v6207_v28  ;;  %v4427_v25 = vpop.eup %4426 }
 0x921   :  { %3788 = vmatprep.subr.bf16.mxu0 %v2268_v52  ;;  %v2266_v19 = vpack.c.bf16 %v4425_v12, %v4427_v25 }
 0x924   :  { %3789 = vmatpush3.bf16.msra.mxu0 %v6208_v34 }
 0x925   :  { %3790 = vmatprep.subr.bf16.mxu0 %v2267_v2 }
 0x928   :  { %3791 = vmatpush3.bf16.msra.mxu0 %v6209_v48 }
 0x929   :  { %3792 = vmatprep.subr.bf16.mxu0 %v2266_v19 }
 0x92c   :  { %3793 = vmatpush3.bf16.msra.mxu0 %v6210_v17 }
 0x92f   :  { %2307 = vmatmul.mubr.bf16.vlgmr.msra.gmra.mxu0 %v5360_v10  ;;  %v6211_v10 = vld [vmem:[#allocation57_spill] sm:$0xff] }
 0x930   :  { %2314 = vmatprep.mubr.bf16.mxu0 %v5366_v43  ;;  %v6212_v43 = vld [vmem:[#allocation58_spill] sm:$0xff] }
 0x937   :  { %2315 = vmatmul.mubr.bf16.gmra.mxu0 %v5372_v45  ;;  %v4233_v45 = vld [vmem:[%s5931_s3 + $0x30] sm:$0xff]  }
 0x938   :  { %2322 = vmatprep.mubr.bf16.mxu0 %v5378_v63  ;;  %v6213_v63 = vld [vmem:[#allocation59_spill] sm:$0xff]  ;;  %4072 = vmatprep.subr.bf16.mxu1 %v4233_v45 }
 0x939   :  { %4073 = vmatpush3.bf16.msra.mxu1 %v4233_v45 }
 0x93f   :  { %2323 = vmatmul.mubr.bf16.gmra.mxu0 %v5384_v41  ;;  %v6214_v41 = vld [vmem:[#allocation60_spill] sm:$0xff] }
 0x940   :  { %2330 = vmatprep.mubr.bf16.mxu0 %v5390_v51  ;;  %v6215_v51 = vld [vmem:[#allocation61_spill] sm:$0xff] }
 0x947   :  { %2331 = vmatmul.mubr.bf16.gmra.mxu0 %v5396_v39  ;;  %v6216_v39 = vld [vmem:[#allocation62_spill] sm:$0xff] }
 0x948   :  { %2338 = vmatprep.mubr.bf16.mxu0 %v5402_v13  ;;  %v6217_v13 = vld [vmem:[#allocation63_spill] sm:$0xff] }
 0x94f   :  { %2339 = vmatmul.mubr.bf16.gmra.mxu0 %v5408_v14  ;;  %v6218_v14 = vld [vmem:[#allocation64_spill] sm:$0xff] }
 0x950   :  { %2346 = vmatprep.mubr.bf16.mxu0 %v5414_v49  ;;  %v6219_v49 = vld [vmem:[#allocation65_spill] sm:$0xff] }
 0x957   :  { %2347 = vmatmul.mubr.bf16.gmra.mxu0 %v5420_v36  ;;  %v6220_v36 = vld [vmem:[#allocation66_spill] sm:$0xff] }
 0x958   :  { %2354 = vmatprep.mubr.bf16.mxu0 %v5426_v16  ;;  %v6221_v16 = vld [vmem:[#allocation67_spill] sm:$0xff] }
 0x95f   :  { %2355 = vmatmul.mubr.bf16.gmra.mxu0 %v5432_v9  ;;  %v6222_v9 = vld [vmem:[#allocation68_spill] sm:$0xff] }
 0x960   :  { %2362 = vmatprep.mubr.bf16.mxu0 %v5438_v4  ;;  %v6223_v4 = vld [vmem:[#allocation69_spill] sm:$0xff] }
 0x967   :  { %2363 = vmatmul.mubr.bf16.gmra.mxu0 %v5444_v61 }
 0x968   :  { %2370 = vmatprep.mubr.bf16.mxu0 %v5450_v30 }
 0x96f   :  { %2371 = vmatmul.mubr.bf16.gmra.mxu0 %v5456_v46 }
 0x970   :  { %2378 = vmatprep.mubr.bf16.mxu0 %v5462_v33 }
 0x977   :  { %2379 = vmatmul.mubr.bf16.gmra.mxu0 %v6211_v10 }
 0x978   :  { %2386 = vmatprep.mubr.bf16.mxu0 %v6212_v43 }
 0x97f   :  { %2387 = vmatmul.mubr.bf16.gmra.mxu0 %v6213_v63 }
 0x980   :  { %2394 = vmatprep.mubr.bf16.mxu0 %v6214_v41 }
 0x987   :  { %2395 = vmatmul.mubr.bf16.gmra.mxu0 %v6215_v51 }
 0x988   :  { %2402 = vmatprep.mubr.bf16.mxu0 %v6216_v39 }
 0x98f   :  { %2403 = vmatmul.mubr.bf16.gmra.mxu0 %v6217_v13 }
 0x990   :  { %2410 = vmatprep.mubr.bf16.mxu0 %v6218_v14 }
 0x997   :  { %2411 = vmatmul.mubr.bf16.gmra.mxu0 %v6219_v49 }
 0x998   :  { %2418 = vmatprep.mubr.bf16.mxu0 %v6220_v36 }
 0x99f   :  { %2419 = vmatmul.mubr.bf16.gmra.mxu0 %v6221_v16 }
 0x9a0   :  { %2426 = vmatprep.mubr.bf16.mxu0 %v6222_v9 }
 0x9a7   :  { %2427 = vmatmul.mubr.bf16.gmra.mxu0 %v6223_v4 }
 0x9ef   :  { %v3794_v61 = vpop.f32.mrf.mxu0 }
 0x9f1   :  { %v3795_v30 = vpop.f32.mrf.mxu0 }
 0x9f2   :  { %v3796_v59 = vadd.f32 %v3795_v30, %v3794_v61 }
 0x9f3   :  { %v3797_v46 = vpop.f32.mrf.mxu0 }
 0x9f5   :  { %v3798_v33 = vpop.f32.mrf.mxu0 }
 0x9f6   :  { %v3799_v21 = vadd.f32 %v3798_v33, %v3797_v46 }
 0x9f7   :  { %v3800_v0 = vpop.f32.mrf.mxu0 }
 0x9f8   :  { %v2435_v22 = vpack.c.bf16 %v3799_v21, %v3796_v59 }
 0x9f9   :  { %v3801_v15 = vpop.f32.mrf.mxu0 }
 0x9fa   :  { %4074 = vmatprep.mubr.msk.bf16.mxu1 %vm152_vm0, %v2435_v22  ;;  %v3802_v24 = vadd.f32 %v3801_v15, %v3800_v0 }
 0x9fb   :  { %v3803_v53 = vpop.f32.mrf.mxu0 }
 0x9fd   :  { %v3804_v27 = vpop.f32.mrf.mxu0 }
 0x9fe   :  { %v3805_v11 = vadd.f32 %v3804_v27, %v3803_v53 }
 0x9ff   :  { %v3806_v62 = vpop.f32.mrf.mxu0 }
 0xa00   :  { %v2436_v18 = vpack.c.bf16 %v3805_v11, %v3802_v24 }
 0xa01   :  { %v3807_v23 = vpop.f32.mrf.mxu0 }
 0xa02   :  { %4075 = vmatmul.mubr.msk.bf16.vlgmr.msra.gmra.mxu1 %vm152_vm0, %v2436_v18  ;;  %v3808_v7 = vadd.f32 %v3807_v23, %v3806_v62 }
 0xa03   :  { %v3809_v40 = vpop.f32.mrf.mxu0 }
 0xa05   :  { %v3810_v5 = vpop.f32.mrf.mxu0 }
 0xa06   :  { %v3811_v31 = vadd.f32 %v3810_v5, %v3809_v40 }
 0xa07   :  { %v3812_v20 = vpop.f32.mrf.mxu0 }
 0xa08   :  { %v2437_v37 = vpack.c.bf16 %v3811_v31, %v3808_v7 }
 0xa09   :  { %v3813_v3 = vpop.f32.mrf.mxu0 }
 0xa0a   :  { %4078 = vmatprep.mubr.msk.bf16.mxu1 %vm152_vm0, %v2437_v37  ;;  %v3814_v60 = vadd.f32 %v3813_v3, %v3812_v20 }
 0xa0b   :  { %v3815_v44 = vpop.f32.mrf.mxu0 }
 0xa0d   :  { %v3816_v42 = vpop.f32.mrf.mxu0 }
 0xa0e   :  { %v3817_v1 = vadd.f32 %v3816_v42, %v3815_v44 }
 0xa0f   :  { %v3818_v6 = vpop.f32.mrf.mxu0 }
 0xa10   :  { %v2438_v55 = vpack.c.bf16 %v3817_v1, %v3814_v60 }
 0xa11   :  { %v3819_v29 = vpop.f32.mrf.mxu0 }
 0xa12   :  { %4079 = vmatmul.mubr.msk.bf16.gmra.mxu1 %vm152_vm0, %v2438_v55  ;;  %v3820_v57 = vadd.f32 %v3819_v29, %v3818_v6 }
 0xa13   :  { %v3821_v35 = vpop.f32.mrf.mxu0 }
 0xa15   :  { %v3822_v38 = vpop.f32.mrf.mxu0 }
 0xa16   :  { %v3823_v8 = vadd.f32 %v3822_v38, %v3821_v35 }
 0xa17   :  { %v3824_v47 = vpop.f32.mrf.mxu0 }
 0xa18   :  { %v2439_v32 = vpack.c.bf16 %v3823_v8, %v3820_v57 }
 0xa19   :  { %v3825_v56 = vpop.f32.mrf.mxu0 }
 0xa1a   :  { %4082 = vmatprep.mubr.msk.bf16.mxu1 %vm152_vm0, %v2439_v32  ;;  %v3826_v50 = vadd.f32 %v3825_v56, %v3824_v47 }
 0xa1b   :  { %v3827_v26 = vpop.f32.mrf.mxu0 }
 0xa1d   :  { %v3828_v52 = vpop.f32.mrf.mxu0 }
 0xa1e   :  { %v3829_v28 = vadd.f32 %v3828_v52, %v3827_v26 }
 0xa1f   :  { %v3830_v58 = vpop.f32.mrf.mxu0 }
 0xa20   :  { %v2440_v2 = vpack.c.bf16 %v3829_v28, %v3826_v50 }
 0xa21   :  { %v3831_v12 = vpop.f32.mrf.mxu0 }
 0xa22   :  { %4083 = vmatmul.mubr.msk.bf16.gmra.mxu1 %vm152_vm0, %v2440_v2  ;;  %v3832_v19 = vadd.f32 %v3831_v12, %v3830_v58 }
 0xa23   :  { %v3833_v34 = vpop.f32.mrf.mxu0 }
 0xa25   :  { %v3834_v25 = vpop.f32.mrf.mxu0 }
 0xa26   :  { %v3835_v54 = vadd.f32 %v3834_v25, %v3833_v34 }
 0xa27   :  { %v3836_v48 = vpop.f32.mrf.mxu0 }
 0xa28   :  { %v2441_v17 = vpack.c.bf16 %v3835_v54, %v3832_v19 }
 0xa29   :  { %v3837_v10 = vpop.f32.mrf.mxu0 }
 0xa2a   :  { %4086 = vmatprep.mubr.msk.bf16.mxu1 %vm152_vm0, %v2441_v17  ;;  %v3838_v63 = vadd.f32 %v3837_v10, %v3836_v48 }
 0xa2b   :  { %v3839_v43 = vpop.f32.mrf.mxu0 }
 0xa2d   :  { %v3840_v45 = vpop.f32.mrf.mxu0 }
 0xa2e   :  { %v3841_v41 = vadd.f32 %v3840_v45, %v3839_v43 }
 0xa2f   :  { %v3842_v51 = vpop.f32.mrf.mxu0 }
 0xa30   :  { %v2442_v39 = vpack.c.bf16 %v3841_v41, %v3838_v63 }
 0xa31   :  { %v3843_v13 = vpop.f32.mrf.mxu0 }
 0xa32   :  { %4087 = vmatmul.mubr.msk.bf16.gmra.mxu1 %vm152_vm0, %v2442_v39  ;;  %v3844_v36 = vadd.f32 %v3843_v13, %v3842_v51 }
 0xa33   :  { %v3845_v14 = vpop.f32.mrf.mxu0 }
 0xa35   :  { %v3846_v49 = vpop.f32.mrf.mxu0 }
 0xa36   :  { %v3847_v16 = vadd.f32 %v3846_v49, %v3845_v14 }
 0xa37   :  { %v3848_v9 = vpop.f32.mrf.mxu0 }
 0xa38   :  { %v2443_v4 = vpack.c.bf16 %v3847_v16, %v3844_v36 }
 0xa39   :  { %v3849_v61 = vpop.f32.mrf.mxu0 }
 0xa3a   :  { %4090 = vmatprep.mubr.msk.bf16.mxu1 %vm152_vm0, %v2443_v4  ;;  %v3850_v33 = vadd.f32 %v3849_v61, %v3848_v9 }
 0xa3b   :  { %v3851_v30 = vpop.f32.mrf.mxu0 }
 0xa3d   :  { %v3852_v46 = vpop.f32.mrf.mxu0 }
 0xa3e   :  { %v3853_v59 = vadd.f32 %v3852_v46, %v3851_v30 }
 0xa3f   :  { %v3854_v21 = vpop.f32.mrf.mxu0 }
 0xa40   :  { %v2444_v0 = vpack.c.bf16 %v3853_v59, %v3850_v33 }
 0xa41   :  { %v3855_v22 = vpop.f32.mrf.mxu0 }
 0xa42   :  { %4091 = vmatmul.mubr.msk.bf16.gmra.mxu1 %vm152_vm0, %v2444_v0  ;;  %v3856_v27 = vadd.f32 %v3855_v22, %v3854_v21 }
 0xa43   :  { %v3857_v15 = vpop.f32.mrf.mxu0 }
 0xa45   :  { %v3858_v53 = vpop.f32.mrf.mxu0 }
 0xa46   :  { %v3859_v24 = vadd.f32 %v3858_v53, %v3857_v15 }
 0xa47   :  { %v3860_v11 = vpop.f32.mrf.mxu0 }
 0xa48   :  { %v2445_v62 = vpack.c.bf16 %v3859_v24, %v3856_v27 }
 0xa49   :  { %v3861_v18 = vpop.f32.mrf.mxu0 }
 0xa4a   :  { %4094 = vmatprep.mubr.msk.bf16.mxu1 %vm152_vm0, %v2445_v62  ;;  %v3862_v5 = vadd.f32 %v3861_v18, %v3860_v11  ;;  %v4234_v62 = vld [vmem:[%s5932_s4 + $0x8] sm:$0xff]  }
 0xa4b   :  { %v3863_v23 = vpop.f32.mrf.mxu0  ;;  %4106 = vmatprep.subr.bf16.mxu1 %v4234_v62 }
 0xa4c   :  { %4107 = vmatpush3.bf16.msra.mxu1 %v4234_v62 }
 0xa4d   :  { %v3864_v40 = vpop.f32.mrf.mxu0 }
 0xa4e   :  { %v3865_v7 = vadd.f32 %v3864_v40, %v3863_v23 }
 0xa4f   :  { %v3866_v31 = vpop.f32.mrf.mxu0 }
 0xa50   :  { %v2446_v20 = vpack.c.bf16 %v3865_v7, %v3862_v5  ;;  %v6224_v7 = vld [vmem:[#allocation35_spill] sm:$0xff] }
 0xa51   :  { %v3867_v37 = vpop.f32.mrf.mxu0 }
 0xa52   :  { %4095 = vmatmul.mubr.msk.bf16.gmra.mxu1 %vm152_vm0, %v2446_v20  ;;  %v3868_v42 = vadd.f32 %v3867_v37, %v3866_v31 }
 0xa53   :  { %v3869_v3 = vpop.f32.mrf.mxu0 }
 0xa55   :  { %v3870_v44 = vpop.f32.mrf.mxu0 }
 0xa56   :  { %v3871_v60 = vadd.f32 %v3870_v44, %v3869_v3  ;;  %v6225_v3 = vld [vmem:[#allocation56_spill] sm:$0xff] }
 0xa57   :  { %v3872_v1 = vpop.f32.mrf.mxu0 }
 0xa58   :  { %v2447_v6 = vpack.c.bf16 %v3871_v60, %v3868_v42  ;;  %v6226_v42 = vld [vmem:[#allocation31_spill] sm:$0xff] }
 0xa59   :  { %v3873_v55 = vpop.f32.mrf.mxu0 }
 0xa5a   :  { %4098 = vmatprep.mubr.msk.bf16.mxu1 %vm152_vm0, %v2447_v6  ;;  %v3874_v38 = vadd.f32 %v3873_v55, %v3872_v1  ;;  %v6227_v6 = vld [vmem:[#allocation32_spill] sm:$0xff] }
 0xa5b   :  { %v3875_v29 = vpop.f32.mrf.mxu0 }
 0xa5d   :  { %v3876_v35 = vpop.f32.mrf.mxu0 }
 0xa5e   :  { %v3877_v57 = vadd.f32 %v3876_v35, %v3875_v29  ;;  %v4235_v29 = vld [vmem:[%s5932_s4] sm:$0xff]  }
 0xa5f   :  { %v3878_v8 = vpop.f32.mrf.mxu0  ;;  %4108 = vmatprep.subr.bf16.mxu1 %v4235_v29 }
 0xa60   :  { %v2448_v47 = vpack.c.bf16 %v3877_v57, %v3874_v38  ;;  %4109 = vmatpush3.bf16.msra.mxu1 %v4235_v29  ;;  %v6228_v38 = vld [vmem:[#allocation25_spill] sm:$0xff] }
 0xa61   :  { %v3879_v32 = vpop.f32.mrf.mxu0  ;;  %v6242_v29 = vld [vmem:[#allocation29_spill] sm:$0xff] }
 0xa62   :  { %4099 = vmatmul.mubr.msk.bf16.gmra.mxu1 %vm152_vm0, %v2448_v47  ;;  %v3880_v52 = vadd.f32 %v3879_v32, %v3878_v8 }
 0xa63   :  { %v3881_v56 = vpop.f32.mrf.mxu0 }
 0xa65   :  { %v3882_v26 = vpop.f32.mrf.mxu0 }
 0xa66   :  { %v3883_v50 = vadd.f32 %v3882_v26, %v3881_v56  ;;  %v6229_v26 = vld [vmem:[#allocation26_spill] sm:$0xff] }
 0xa67   :  { %v3884_v28 = vpop.f32.mrf.mxu0 }
 0xa68   :  { %v2449_v58 = vpack.c.bf16 %v3883_v50, %v3880_v52  ;;  %v6230_v50 = vld [vmem:[#allocation19_spill] sm:$0xff] }
 0xa69   :  { %v3885_v2 = vpop.f32.mrf.mxu0 }
 0xa6a   :  { %4102 = vmatprep.mubr.msk.bf16.mxu1 %vm152_vm0, %v2449_v58  ;;  %v3886_v25 = vadd.f32 %v3885_v2, %v3884_v28 }
 0xa6b   :  { %v3887_v12 = vpop.f32.mrf.mxu0 }
 0xa6d   :  { %v3888_v34 = vpop.f32.mrf.mxu0 }
 0xa6e   :  { %v3889_v19 = vadd.f32 %v3888_v34, %v3887_v12 }
 0xa70   :  { %v2450_v54 = vpack.c.bf16 %v3889_v19, %v3886_v25  ;;  %v6231_v25 = vld [vmem:[#allocation20_spill] sm:$0xff] }
 0xa72   :  { %4103 = vmatmul.mubr.msk.bf16.gmra.mxu1 %vm152_vm0, %v2450_v54 }
 0xac2   :  { %v4076_v48 = vpop.f32.mrf.mxu1 }
 0xac4   :  { %v2550_v17 = vpop.f32.mrf.mxu1 }
 0xac5   :  { %2709 = vrot.lane.b32.xlu0 %v2550_v17, %s4525_s2  ;;  %v6232_v17 = vld [vmem:[#allocation12_spill] sm:$0xff] }
 0xac6   :  { %v4077_v10 = vpop.f32.mrf.mxu1 }
 0xac8   :  { %v2553_v43 = vpop.f32.mrf.mxu1 }
 0xac9   :  { %2713 = vrot.lane.b32.xlu0 %v4076_v48, %s4525_s2  ;;  %2711 = vrot.lane.b32.xlu1 %v2553_v43, %s4525_s2 }
 0xacd   :  { %2715 = vrot.lane.b32.xlu1 %v4077_v10, %s4525_s2 }
 0xad2   :  { %v4080_v45 = vpop.f32.mrf.mxu1 }
 0xad4   :  { %v2566_v63 = vpop.f32.mrf.mxu1 }
 0xad5   :  { %2717 = vrot.lane.b32.xlu0 %v2566_v63, %s4525_s2 }
 0xad6   :  { %v4081_v41 = vpop.f32.mrf.mxu1 }
 0xad8   :  { %v2569_v51 = vpop.f32.mrf.mxu1 }
 0xad9   :  { %2721 = vrot.lane.b32.xlu0 %v4080_v45, %s4525_s2  ;;  %2719 = vrot.lane.b32.xlu1 %v2569_v51, %s4525_s2  ;;  %v6233_v51 = vld [vmem:[#allocation11_spill] sm:$0xff] }
 0xadd   :  { %2723 = vrot.lane.b32.xlu1 %v4081_v41, %s4525_s2 }
 0xae2   :  { %v4084_v39 = vpop.f32.mrf.mxu1 }
 0xae4   :  { %v2582_v13 = vpop.f32.mrf.mxu1 }
 0xae5   :  { %2725 = vrot.lane.b32.xlu0 %v2582_v13, %s4525_s2  ;;  %v6234_v13 = vld [vmem:[#allocation10_spill] sm:$0xff] }
 0xae6   :  { %v4085_v14 = vpop.f32.mrf.mxu1 }
 0xae8   :  { %v2585_v49 = vpop.f32.mrf.mxu1 }
 0xae9   :  { %2729 = vrot.lane.b32.xlu0 %v4084_v39, %s4525_s2  ;;  %2727 = vrot.lane.b32.xlu1 %v2585_v49, %s4525_s2 }
 0xaed   :  { %2731 = vrot.lane.b32.xlu1 %v4085_v14, %s4525_s2 }
 0xaf2   :  { %v4088_v36 = vpop.f32.mrf.mxu1 }
 0xaf4   :  { %v2598_v16 = vpop.f32.mrf.mxu1 }
 0xaf5   :  { %2733 = vrot.lane.b32.xlu0 %v2598_v16, %s4525_s2 }
 0xaf6   :  { %v4089_v9 = vpop.f32.mrf.mxu1 }
 0xaf8   :  { %v2601_v4 = vpop.f32.mrf.mxu1 }
 0xaf9   :  { %2737 = vrot.lane.b32.xlu0 %v4088_v36, %s4525_s2  ;;  %2735 = vrot.lane.b32.xlu1 %v2601_v4, %s4525_s2  ;;  %v6235_v4 = vld [vmem:[#allocation9_spill] sm:$0xff] }
 0xafd   :  { %2739 = vrot.lane.b32.xlu1 %v4089_v9, %s4525_s2 }
 0xb02   :  { %v4092_v61 = vpop.f32.mrf.mxu1 }
 0xb04   :  { %v2614_v30 = vpop.f32.mrf.mxu1 }
 0xb05   :  { %2741 = vrot.lane.b32.xlu0 %v2614_v30, %s4525_s2 }
 0xb06   :  { %v4093_v46 = vpop.f32.mrf.mxu1 }
 0xb08   :  { %v2617_v33 = vpop.f32.mrf.mxu1 }
 0xb09   :  { %2745 = vrot.lane.b32.xlu0 %v4092_v61, %s4525_s2  ;;  %2743 = vrot.lane.b32.xlu1 %v2617_v33, %s4525_s2  ;;  %v6236_v33 = vld [vmem:[#allocation7_spill] sm:$0xff] }
 0xb0d   :  { %2747 = vrot.lane.b32.xlu1 %v4093_v46, %s4525_s2 }
 0xb12   :  { %v4096_v59 = vpop.f32.mrf.mxu1 }
 0xb14   :  { %v2630_v21 = vpop.f32.mrf.mxu1 }
 0xb15   :  { %2749 = vrot.lane.b32.xlu0 %v2630_v21, %s4525_s2 }
 0xb16   :  { %v4097_v0 = vpop.f32.mrf.mxu1 }
 0xb18   :  { %v2633_v22 = vpop.f32.mrf.mxu1 }
 0xb19   :  { %2753 = vrot.lane.b32.xlu0 %v4096_v59, %s4525_s2  ;;  %2751 = vrot.lane.b32.xlu1 %v2633_v22, %s4525_s2 }
 0xb1d   :  { %2755 = vrot.lane.b32.xlu1 %v4097_v0, %s4525_s2 }
 0xb22   :  { %v4100_v15 = vpop.f32.mrf.mxu1 }
 0xb24   :  { %v2646_v53 = vpop.f32.mrf.mxu1 }
 0xb25   :  { %2757 = vrot.lane.b32.xlu0 %v2646_v53, %s4525_s2  ;;  %v6237_v53 = vld [vmem:[#allocation8_spill] sm:$0xff] }
 0xb26   :  { %v4101_v27 = vpop.f32.mrf.mxu1 }
 0xb28   :  { %v2649_v24 = vpop.f32.mrf.mxu1 }
 0xb29   :  { %2761 = vrot.lane.b32.xlu0 %v4100_v15, %s4525_s2  ;;  %2759 = vrot.lane.b32.xlu1 %v2649_v24, %s4525_s2  ;;  %v6238_v24 = vld [vmem:[#allocation6_spill] sm:$0xff] }
 0xb2d   :  { %2763 = vrot.lane.b32.xlu1 %v4101_v27, %s4525_s2 }
 0xb32   :  { %v4104_v11 = vpop.f32.mrf.mxu1 }
 0xb34   :  { %v2662_v18 = vpop.f32.mrf.mxu1 }
 0xb35   :  { %2765 = vrot.lane.b32.xlu0 %v2662_v18, %s4525_s2 }
 0xb36   :  { %v4105_v23 = vpop.f32.mrf.mxu1 }
 0xb37   :  { %v2710_v40 = vpop.permute.xlu0 %2709 }
 0xb38   :  { %v2665_v5 = vpop.f32.mrf.mxu1  ;;  %v2805_v31 = vadd.f32 %v6224_v7, %v2710_v40 }
 0xb39   :  { %2769 = vrot.lane.b32.xlu0 %v4104_v11, %s4525_s2  ;;  %2767 = vrot.lane.b32.xlu1 %v2665_v5, %s4525_s2  ;;  %v6239_v5 = vld [vmem:[#allocation5_spill] sm:$0xff] }
 0xb3a   :  { %4428 = vtanh.f32 %v2805_v31 }
 0xb3b   :  { %v2714_v20 = vpop.permute.xlu0 %2713  ;;  %v2712_v37 = vpop.permute.xlu1 %2711 }
 0xb3c   :  { %v2806_v44 = vadd.f32 %v6225_v3, %v2712_v37  ;;  %v2807_v60 = vadd.f32 %v6226_v42, %v2714_v20  ;;  %v6240_v37 = vld [vmem:[#allocation33_spill] sm:$0xff] }
 0xb3d   :  { %2771 = vrot.lane.b32.xlu1 %v4105_v23, %s4525_s2 }
 0xb3e   :  { %4430 = vtanh.f32 %v2806_v44 }
 0xb3f   :  { %v2716_v1 = vpop.permute.xlu1 %2715  ;;  %4432 = vtanh.f32 %v2807_v60 }
 0xb40   :  { %v2808_v55 = vadd.f32 %v6227_v6, %v2716_v1  ;;  %v6241_v6 = vld [vmem:[#allocation34_spill] sm:$0xff] }
 0xb42   :  { %4434 = vtanh.f32 %v2808_v55 }
 0xb47   :  { %v2718_v35 = vpop.permute.xlu0 %2717  ;;  %v4429_v8 = vpop.eup %4428 }
 0xb48   :  { %v2809_v57 = vadd.f32 %v6228_v38, %v2718_v35 }
 0xb4a   :  { %4436 = vtanh.f32 %v2809_v57 }
 0xb4b   :  { %v2722_v47 = vpop.permute.xlu0 %2721  ;;  %v2720_v32 = vpop.permute.xlu1 %2719 }
 0xb4c   :  { %v4431_v56 = vpop.eup %4430  ;;  %v2810_v52 = vadd.f32 %v6229_v26, %v2720_v32  ;;  %v2811_v28 = vadd.f32 %v6230_v50, %v2722_v47  ;;  %v6243_v32 = vld [vmem:[#allocation30_spill] sm:$0xff]  ;;  %v6244_v50 = vld [vmem:[#allocation28_spill] sm:$0xff] }
 0xb4d   :  { %v2869_v58 = vpack.c.bf16 %v4431_v56, %v4429_v8  ;;  %v4433_v2 = vpop.eup %4432 }
 0xb4e   :  { %4438 = vtanh.f32 %v2810_v52 }
 0xb4f   :  { %v4435_v12 = vpop.eup %4434  ;;  %2912 = vrot.lane.b32.xlu0 %v2869_v58, %s4524_s0  ;;  %v2724_v34 = vpop.permute.xlu1 %2723  ;;  %4440 = vtanh.f32 %v2811_v28 }
 0xb50   :  { %v2812_v19 = vadd.f32 %v6231_v25, %v2724_v34  ;;  %v2870_v54 = vpack.c.bf16 %v4435_v12, %v4433_v2  ;;  %v6245_v25 = vld [vmem:[#allocation27_spill] sm:$0xff] }
 0xb52   :  { %4442 = vtanh.f32 %v2812_v19  ;;  %2914 = vrot.lane.b32.xlu1 %v2870_v54, %s4524_s0  ;;  %v6246_v54 = vld [vmem:[#allocation23_spill] sm:$0xff] }
 0xb57   :  { %v2726_v48 = vpop.permute.xlu0 %2725  ;;  %v4437_v43 = vpop.eup %4436 }
 0xb58   :  { %v2813_v10 = vadd.f32 %v6232_v17, %v2726_v48 }
 0xb5a   :  { %4444 = vtanh.f32 %v2813_v10 }
 0xb5b   :  { %v2730_v45 = vpop.permute.xlu0 %2729  ;;  %v2728_v63 = vpop.permute.xlu1 %2727 }
 0xb5c   :  { %v4439_v41 = vpop.eup %4438  ;;  %v2814_v39 = vadd.f32 %v6233_v51, %v2728_v63  ;;  %v2815_v14 = vadd.f32 %v6234_v13, %v2730_v45  ;;  %v6247_v63 = vld [vmem:[#allocation24_spill] sm:$0xff]  ;;  %v6248_v13 = vld [vmem:[#allocation22_spill] sm:$0xff] }
 0xb5d   :  { %v2871_v49 = vpack.c.bf16 %v4439_v41, %v4437_v43  ;;  %v4441_v36 = vpop.eup %4440 }
 0xb5e   :  { %4446 = vtanh.f32 %v2814_v39 }
 0xb5f   :  { %v4443_v16 = vpop.eup %4442  ;;  %2916 = vrot.lane.b32.xlu0 %v2871_v49, %s4524_s0  ;;  %v2732_v9 = vpop.permute.xlu1 %2731  ;;  %4448 = vtanh.f32 %v2815_v14 }
 0xb60   :  { %v2816_v61 = vadd.f32 %v6235_v4, %v2732_v9  ;;  %v2872_v30 = vpack.c.bf16 %v4443_v16, %v4441_v36  ;;  %v6249_v4 = vld [vmem:[#allocation21_spill] sm:$0xff] }
 0xb62   :  { %4450 = vtanh.f32 %v2816_v61  ;;  %2918 = vrot.lane.b32.xlu1 %v2872_v30, %s4524_s0  ;;  %v6250_v30 = vld [vmem:[#allocation17_spill] sm:$0xff] }
 0xb67   :  { %v2734_v46 = vpop.permute.xlu0 %2733  ;;  %v4445_v21 = vpop.eup %4444 }
 0xb68   :  { %v2817_v59 = vadd.f32 %v6236_v33, %v2734_v46 }
 0xb6a   :  { %4452 = vtanh.f32 %v2817_v59 }
 0xb6b   :  { %v2738_v0 = vpop.permute.xlu0 %2737  ;;  %v2736_v22 = vpop.permute.xlu1 %2735 }
 0xb6c   :  { %v4447_v15 = vpop.eup %4446  ;;  %v2818_v27 = vadd.f32 %v6237_v53, %v2736_v22  ;;  %v2819_v11 = vadd.f32 %v6238_v24, %v2738_v0  ;;  %v6251_v22 = vld [vmem:[#allocation18_spill] sm:$0xff]  ;;  %v6252_v24 = vld [vmem:[#allocation15_spill] sm:$0xff] }
 0xb6d   :  { %v2873_v62 = vpack.c.bf16 %v4447_v15, %v4445_v21  ;;  %v4449_v18 = vpop.eup %4448 }
 0xb6e   :  { %4454 = vtanh.f32 %v2818_v27 }
 0xb6f   :  { %v4451_v23 = vpop.eup %4450  ;;  %2920 = vrot.lane.b32.xlu0 %v2873_v62, %s4524_s0  ;;  %v2740_v40 = vpop.permute.xlu1 %2739  ;;  %4456 = vtanh.f32 %v2819_v11 }
 0xb70   :  { %v2820_v7 = vadd.f32 %v6239_v5, %v2740_v40  ;;  %v2874_v31 = vpack.c.bf16 %v4451_v23, %v4449_v18  ;;  %v6253_v5 = vld [vmem:[#allocation16_spill] sm:$0xff] }
 0xb72   :  { %4458 = vtanh.f32 %v2820_v7  ;;  %2922 = vrot.lane.b32.xlu1 %v2874_v31, %s4524_s0  ;;  %v6254_v31 = vld [vmem:[#allocation13_spill] sm:$0xff] }
 0xb77   :  { %v2742_v20 = vpop.permute.xlu0 %2741  ;;  %v4453_v44 = vpop.eup %4452 }
 0xb78   :  { %v2821_v3 = vadd.f32 %v6240_v37, %v2742_v20 }
 0xb7a   :  { %4460 = vtanh.f32 %v2821_v3 }
 0xb7b   :  { %v2746_v42 = vpop.permute.xlu0 %2745  ;;  %v2744_v60 = vpop.permute.xlu1 %2743 }
 0xb7c   :  { %v4455_v1 = vpop.eup %4454  ;;  %v2822_v55 = vadd.f32 %v6241_v6, %v2744_v60  ;;  %v2823_v35 = vadd.f32 %v6242_v29, %v2746_v42  ;;  %v6255_v60 = vld [vmem:[#allocation14_spill] sm:$0xff] }
 0xb7d   :  { %v2875_v38 = vpack.c.bf16 %v4455_v1, %v4453_v44  ;;  %v4457_v57 = vpop.eup %4456 }
 0xb7e   :  { %4462 = vtanh.f32 %v2822_v55 }
 0xb7f   :  { %v4459_v8 = vpop.eup %4458  ;;  %2924 = vrot.lane.b32.xlu0 %v2875_v38, %s4524_s0  ;;  %v2748_v47 = vpop.permute.xlu1 %2747  ;;  %4464 = vtanh.f32 %v2823_v35 }
 0xb80   :  { %v2824_v56 = vadd.f32 %v6243_v32, %v2748_v47  ;;  %v2876_v26 = vpack.c.bf16 %v4459_v8, %v4457_v57 }
 0xb82   :  { %4466 = vtanh.f32 %v2824_v56  ;;  %2926 = vrot.lane.b32.xlu1 %v2876_v26, %s4524_s0 }
 0xb87   :  { %v2750_v52 = vpop.permute.xlu0 %2749  ;;  %v4461_v58 = vpop.eup %4460 }
 0xb88   :  { %v2825_v28 = vadd.f32 %v6244_v50, %v2750_v52 }
 0xb8a   :  { %4468 = vtanh.f32 %v2825_v28 }
 0xb8b   :  { %v2754_v2 = vpop.permute.xlu0 %2753  ;;  %v2752_v12 = vpop.permute.xlu1 %2751 }
 0xb8c   :  { %v4463_v34 = vpop.eup %4462  ;;  %v2826_v19 = vadd.f32 %v6245_v25, %v2752_v12  ;;  %v2827_v48 = vadd.f32 %v6246_v54, %v2754_v2 }
 0xb8d   :  { %v2877_v17 = vpack.c.bf16 %v4463_v34, %v4461_v58  ;;  %v4465_v10 = vpop.eup %4464 }
 0xb8e   :  { %4470 = vtanh.f32 %v2826_v19 }
 0xb8f   :  { %v4467_v43 = vpop.eup %4466  ;;  %2928 = vrot.lane.b32.xlu0 %v2877_v17, %s4524_s0  ;;  %v2756_v45 = vpop.permute.xlu1 %2755  ;;  %4472 = vtanh.f32 %v2827_v48 }
 0xb90   :  { %v2828_v41 = vadd.f32 %v6247_v63, %v2756_v45  ;;  %v2878_v51 = vpack.c.bf16 %v4467_v43, %v4465_v10  ;;  %v5798_v10 = vld [vmem:[%s5933_s5] ss:$0 sm:$0xff] }
 0xb92   :  { %4474 = vtanh.f32 %v2828_v41  ;;  %2930 = vrot.lane.b32.xlu1 %v2878_v51, %s4524_s0 }
 0xb97   :  { %v2758_v39 = vpop.permute.xlu0 %2757  ;;  %v4469_v49 = vpop.eup %4468 }
 0xb98   :  { %v2829_v14 = vadd.f32 %v6248_v13, %v2758_v39 }
 0xb9a   :  { %4476 = vtanh.f32 %v2829_v14 }
 0xb9b   :  { %v2762_v36 = vpop.permute.xlu0 %2761  ;;  %v2760_v16 = vpop.permute.xlu1 %2759 }
 0xb9c   :  { %v4471_v9 = vpop.eup %4470  ;;  %v2830_v61 = vadd.f32 %v6249_v4, %v2760_v16  ;;  %v2831_v46 = vadd.f32 %v6250_v30, %v2762_v36 }
 0xb9d   :  { %v2879_v33 = vpack.c.bf16 %v4471_v9, %v4469_v49  ;;  %v4473_v59 = vpop.eup %4472 }
 0xb9e   :  { %4478 = vtanh.f32 %v2830_v61 }
 0xb9f   :  { %v4475_v21 = vpop.eup %4474  ;;  %2932 = vrot.lane.b32.xlu0 %v2879_v33, %s4524_s0  ;;  %v2764_v0 = vpop.permute.xlu1 %2763  ;;  %4480 = vtanh.f32 %v2831_v46 }
 0xba0   :  { %v2832_v15 = vadd.f32 %v6251_v22, %v2764_v0  ;;  %v2880_v53 = vpack.c.bf16 %v4475_v21, %v4473_v59 }
 0xba2   :  { %4482 = vtanh.f32 %v2832_v15  ;;  %2934 = vrot.lane.b32.xlu1 %v2880_v53, %s4524_s0 }
 0xba7   :  { %v2766_v27 = vpop.permute.xlu0 %2765  ;;  %v4477_v62 = vpop.eup %4476 }
 0xba8   :  { %v2833_v11 = vadd.f32 %v6252_v24, %v2766_v27 }
 0xbaa   :  { %4484 = vtanh.f32 %v2833_v11 }
 0xbab   :  { %v2770_v18 = vpop.permute.xlu0 %2769  ;;  %v2768_v23 = vpop.permute.xlu1 %2767 }
 0xbac   :  { %v4479_v40 = vpop.eup %4478  ;;  %v2834_v7 = vadd.f32 %v6253_v5, %v2768_v23  ;;  %v2835_v20 = vadd.f32 %v6254_v31, %v2770_v18 }
 0xbad   :  { %v2881_v37 = vpack.c.bf16 %v4479_v40, %v4477_v62  ;;  %v4481_v3 = vpop.eup %4480 }
 0xbae   :  { %4486 = vtanh.f32 %v2834_v7 }
 0xbaf   :  { %v4483_v44 = vpop.eup %4482  ;;  %2936 = vrot.lane.b32.xlu0 %v2881_v37, %s4524_s0  ;;  %v2772_v42 = vpop.permute.xlu1 %2771  ;;  %4488 = vtanh.f32 %v2835_v20 }
 0xbb0   :  { %v2836_v1 = vadd.f32 %v6255_v60, %v2772_v42  ;;  %v2882_v6 = vpack.c.bf16 %v4483_v44, %v4481_v3 }
 0xbb2   :  { %4490 = vtanh.f32 %v2836_v1  ;;  %2938 = vrot.lane.b32.xlu1 %v2882_v6, %s4524_s0 }
 0xbb7   :  { %v4485_v55 = vpop.eup %4484 }
 0xbbb   :  { %v4487_v29 = vpop.eup %4486 }
 0xbbc   :  { %v2883_v35 = vpack.c.bf16 %v4487_v29, %v4485_v55  ;;  %v4489_v38 = vpop.eup %4488 }
 0xbbe   :  { %2940 = vrot.lane.b32.xlu0 %v2883_v35, %s4524_s0 }
 0xbbf   :  { %v4491_v57 = vpop.eup %4490 }
 0xbc0   :  { %v2884_v8 = vpack.c.bf16 %v4491_v57, %v4489_v38 }
 0xbc1   :  { %v2913_v47 = vpop.permute.xlu0 %2912 }
 0xbc2   :  { %4110 = vmatprep.mubr.msk.bf16.mxu1 %vm152_vm0, %v2913_v47  ;;  %2942 = vrot.lane.b32.xlu1 %v2884_v8, %s4524_s0 }
 0xbc4   :  { %v2915_v32 = vpop.permute.xlu1 %2914 }
 0xbc5   :  { %4111 = vmatmul.mubr.msk.bf16.vlgmr.msra.gmra.mxu1 %vm152_vm0, %v2915_v32 }
 0xbd1   :  { %v2917_v56 = vpop.permute.xlu0 %2916 }
 0xbd2   :  { %4114 = vmatprep.mubr.msk.bf16.mxu1 %vm152_vm0, %v2917_v56 }
 0xbd4   :  { %v2919_v26 = vpop.permute.xlu1 %2918 }
 0xbd5   :  { %4115 = vmatmul.mubr.msk.bf16.gmra.mxu1 %vm152_vm0, %v2919_v26 }
 0xbe1   :  { %v2921_v52 = vpop.permute.xlu0 %2920 }
 0xbe2   :  { %4118 = vmatprep.mubr.msk.bf16.mxu1 %vm152_vm0, %v2921_v52 }
 0xbe4   :  { %v2923_v50 = vpop.permute.xlu1 %2922 }
 0xbe5   :  { %4119 = vmatmul.mubr.msk.bf16.gmra.mxu1 %vm152_vm0, %v2923_v50 }
 0xbf1   :  { %v2925_v28 = vpop.permute.xlu0 %2924 }
 0xbf2   :  { %4122 = vmatprep.mubr.msk.bf16.mxu1 %vm152_vm0, %v2925_v28 }
 0xbf4   :  { %v2927_v58 = vpop.permute.xlu1 %2926 }
 0xbf5   :  { %4123 = vmatmul.mubr.msk.bf16.gmra.mxu1 %vm152_vm0, %v2927_v58 }
 0xc01   :  { %v2929_v2 = vpop.permute.xlu0 %2928 }
 0xc02   :  { %4126 = vmatprep.mubr.msk.bf16.mxu1 %vm152_vm0, %v2929_v2 }
 0xc04   :  { %v2931_v12 = vpop.permute.xlu1 %2930 }
 0xc05   :  { %4127 = vmatmul.mubr.msk.bf16.gmra.mxu1 %vm152_vm0, %v2931_v12 }
 0xc11   :  { %v2933_v34 = vpop.permute.xlu0 %2932 }
 0xc12   :  { %4130 = vmatprep.mubr.msk.bf16.mxu1 %vm152_vm0, %v2933_v34 }
 0xc14   :  { %v2935_v25 = vpop.permute.xlu1 %2934 }
 0xc15   :  { %4131 = vmatmul.mubr.msk.bf16.gmra.mxu1 %vm152_vm0, %v2935_v25 }
 0xc21   :  { %v2937_v19 = vpop.permute.xlu0 %2936 }
 0xc22   :  { %4134 = vmatprep.mubr.msk.bf16.mxu1 %vm152_vm0, %v2937_v19 }
 0xc24   :  { %v2939_v54 = vpop.permute.xlu1 %2938 }
 0xc25   :  { %4135 = vmatmul.mubr.msk.bf16.gmra.mxu1 %vm152_vm0, %v2939_v54 }
 0xc30   :  { %v2941_v48 = vpop.permute.xlu0 %2940 }
 0xc31   :  { %4138 = vmatprep.mubr.msk.bf16.mxu1 %vm152_vm0, %v2941_v48 }
 0xc34   :  { %v2943_v17 = vpop.permute.xlu1 %2942 }
 0xc35   :  { %4139 = vmatmul.mubr.msk.bf16.gmra.mxu1 %vm152_vm0, %v2943_v17 }
 0xc85   :  { %v4112_v43 = vpop.f32.mrf.mxu1 }
 0xc86   :  { %v3047_v45 = vadd.f32 %v4112_v43, %v5798_v10 }
 0xc87   :  { %v3038_v63 = vpop.f32.mrf.mxu1 }
 0xc88   :  { %3167 = vst [vmem:[%s5934_s6 + $0x10] sm:$0xff] %v3047_v45  ;;  %v3039_v41 = vadd.f32 %v5798_v10, %v3038_v63 }
 0xc89   :  { %v4113_v51 = vpop.f32.mrf.mxu1 }
 0xc8a   :  { %3165 = vst [vmem:[%s5934_s6] sm:$0xff] %v3039_v41  ;;  %v3050_v39 = vadd.f32 %v4113_v51, %v5798_v10 }
 0xc8b   :  { %v3041_v13 = vpop.f32.mrf.mxu1 }
 0xc8c   :  { %3168 = vst [vmem:[%s5934_s6 + $0x18] sm:$0xff] %v3050_v39  ;;  %v3042_v14 = vadd.f32 %v5798_v10, %v3041_v13 }
 0xc8e   :  { %3166 = vst [vmem:[%s5934_s6 + $0x8] sm:$0xff] %v3042_v14 }
 0xc95   :  { %v4116_v49 = vpop.f32.mrf.mxu1 }
 0xc96   :  { %v3063_v36 = vadd.f32 %v4116_v49, %v5798_v10 }
 0xc97   :  { %v3054_v16 = vpop.f32.mrf.mxu1 }
 0xc98   :  { %3171 = vst [vmem:[%s5934_s6 + $0x30] sm:$0xff] %v3063_v36  ;;  %v3055_v9 = vadd.f32 %v5798_v10, %v3054_v16 }
 0xc99   :  { %v4117_v4 = vpop.f32.mrf.mxu1 }
 0xc9a   :  { %3169 = vst [vmem:[%s5934_s6 + $0x20] sm:$0xff] %v3055_v9  ;;  %v3066_v61 = vadd.f32 %v4117_v4, %v5798_v10 }
 0xc9b   :  { %v3057_v30 = vpop.f32.mrf.mxu1 }
 0xc9c   :  { %3172 = vst [vmem:[%s5934_s6 + $0x38] sm:$0xff] %v3066_v61  ;;  %v3058_v46 = vadd.f32 %v5798_v10, %v3057_v30 }
 0xc9e   :  { %3170 = vst [vmem:[%s5934_s6 + $0x28] sm:$0xff] %v3058_v46 }
 0xca5   :  { %v4120_v33 = vpop.f32.mrf.mxu1 }
 0xca6   :  { %v3079_v59 = vadd.f32 %v4120_v33, %v5798_v10 }
 0xca7   :  { %v3070_v21 = vpop.f32.mrf.mxu1 }
 0xca8   :  { %3175 = vst [vmem:[%s5934_s6 + $0x50] sm:$0xff] %v3079_v59  ;;  %v3071_v0 = vadd.f32 %v5798_v10, %v3070_v21 }
 0xca9   :  { %v4121_v22 = vpop.f32.mrf.mxu1 }
 0xcaa   :  { %3173 = vst [vmem:[%s5934_s6 + $0x40] sm:$0xff] %v3071_v0  ;;  %v3082_v15 = vadd.f32 %v4121_v22, %v5798_v10 }
 0xcab   :  { %v3073_v53 = vpop.f32.mrf.mxu1 }
 0xcac   :  { %3176 = vst [vmem:[%s5934_s6 + $0x58] sm:$0xff] %v3082_v15  ;;  %v3074_v27 = vadd.f32 %v5798_v10, %v3073_v53 }
 0xcae   :  { %3174 = vst [vmem:[%s5934_s6 + $0x48] sm:$0xff] %v3074_v27 }
 0xcb5   :  { %v4124_v24 = vpop.f32.mrf.mxu1 }
 0xcb6   :  { %v3095_v11 = vadd.f32 %v4124_v24, %v5798_v10 }
 0xcb7   :  { %v3086_v62 = vpop.f32.mrf.mxu1 }
 0xcb8   :  { %3179 = vst [vmem:[%s5934_s6 + $0x70] sm:$0xff] %v3095_v11  ;;  %v3087_v18 = vadd.f32 %v5798_v10, %v3086_v62 }
 0xcb9   :  { %v4125_v23 = vpop.f32.mrf.mxu1 }
 0xcba   :  { %3177 = vst [vmem:[%s5934_s6 + $0x60] sm:$0xff] %v3087_v18  ;;  %v3098_v40 = vadd.f32 %v4125_v23, %v5798_v10 }
 0xcbb   :  { %v3089_v5 = vpop.f32.mrf.mxu1 }
 0xcbc   :  { %3180 = vst [vmem:[%s5934_s6 + $0x78] sm:$0xff] %v3098_v40  ;;  %v3090_v7 = vadd.f32 %v5798_v10, %v3089_v5 }
 0xcbe   :  { %3178 = vst [vmem:[%s5934_s6 + $0x68] sm:$0xff] %v3090_v7 }
 0xcc5   :  { %v4128_v31 = vpop.f32.mrf.mxu1 }
 0xcc6   :  { %v3111_v20 = vadd.f32 %v4128_v31, %v5798_v10 }
 0xcc7   :  { %v3102_v37 = vpop.f32.mrf.mxu1 }
 0xcc8   :  { %3183 = vst [vmem:[%s5934_s6 + $0x90] sm:$0xff] %v3111_v20  ;;  %v3103_v3 = vadd.f32 %v5798_v10, %v3102_v37 }
 0xcc9   :  { %v4129_v44 = vpop.f32.mrf.mxu1 }
 0xcca   :  { %3181 = vst [vmem:[%s5934_s6 + $0x80] sm:$0xff] %v3103_v3  ;;  %v3114_v42 = vadd.f32 %v4129_v44, %v5798_v10 }
 0xccb   :  { %v3105_v60 = vpop.f32.mrf.mxu1 }
 0xccc   :  { %3184 = vst [vmem:[%s5934_s6 + $0x98] sm:$0xff] %v3114_v42  ;;  %v3106_v1 = vadd.f32 %v5798_v10, %v3105_v60 }
 0xcce   :  { %3182 = vst [vmem:[%s5934_s6 + $0x88] sm:$0xff] %v3106_v1 }
 0xcd5   :  { %v4132_v6 = vpop.f32.mrf.mxu1 }
 0xcd6   :  { %v3127_v55 = vadd.f32 %v4132_v6, %v5798_v10 }
 0xcd7   :  { %v3118_v29 = vpop.f32.mrf.mxu1 }
 0xcd8   :  { %3187 = vst [vmem:[%s5934_s6 + $0xb0] sm:$0xff] %v3127_v55  ;;  %v3119_v35 = vadd.f32 %v5798_v10, %v3118_v29 }
 0xcd9   :  { %v4133_v38 = vpop.f32.mrf.mxu1 }
 0xcda   :  { %3185 = vst [vmem:[%s5934_s6 + $0xa0] sm:$0xff] %v3119_v35  ;;  %v3130_v57 = vadd.f32 %v4133_v38, %v5798_v10 }
 0xcdb   :  { %v3121_v8 = vpop.f32.mrf.mxu1 }
 0xcdc   :  { %3188 = vst [vmem:[%s5934_s6 + $0xb8] sm:$0xff] %v3130_v57  ;;  %v3122_v47 = vadd.f32 %v5798_v10, %v3121_v8 }
 0xcde   :  { %3186 = vst [vmem:[%s5934_s6 + $0xa8] sm:$0xff] %v3122_v47 }
 0xce5   :  { %v4136_v32 = vpop.f32.mrf.mxu1 }
 0xce6   :  { %v3143_v56 = vadd.f32 %v4136_v32, %v5798_v10 }
 0xce7   :  { %v3134_v26 = vpop.f32.mrf.mxu1 }
 0xce8   :  { %3191 = vst [vmem:[%s5934_s6 + $0xd0] sm:$0xff] %v3143_v56  ;;  %v3135_v52 = vadd.f32 %v5798_v10, %v3134_v26 }
 0xce9   :  { %v4137_v50 = vpop.f32.mrf.mxu1 }
 0xcea   :  { %3189 = vst [vmem:[%s5934_s6 + $0xc0] sm:$0xff] %v3135_v52  ;;  %v3146_v28 = vadd.f32 %v4137_v50, %v5798_v10 }
 0xceb   :  { %v3137_v58 = vpop.f32.mrf.mxu1 }
 0xcec   :  { %3192 = vst [vmem:[%s5934_s6 + $0xd8] sm:$0xff] %v3146_v28  ;;  %v3138_v2 = vadd.f32 %v5798_v10, %v3137_v58 }
 0xcee   :  { %3190 = vst [vmem:[%s5934_s6 + $0xc8] sm:$0xff] %v3138_v2 }
 0xcf5   :  { %v4140_v12 = vpop.f32.mrf.mxu1 }
 0xcf6   :  { %v3159_v34 = vadd.f32 %v4140_v12, %v5798_v10 }
 0xcf7   :  { %v3150_v25 = vpop.f32.mrf.mxu1 }
 0xcf8   :  { %3195 = vst [vmem:[%s5934_s6 + $0xf0] sm:$0xff] %v3159_v34  ;;  %v3151_v19 = vadd.f32 %v5798_v10, %v3150_v25 }
 0xcf9   :  { %v4141_v54 = vpop.f32.mrf.mxu1 }
 0xcfa   :  { %3193 = vst [vmem:[%s5934_s6 + $0xe0] sm:$0xff] %v3151_v19  ;;  %v3162_v48 = vadd.f32 %v4141_v54, %v5798_v10 }
 0xcfb   :  { %v3153_v17 = vpop.f32.mrf.mxu1 }
 0xcfc   :  { %3196 = vst [vmem:[%s5934_s6 + $0xf8] sm:$0xff] %v3162_v48  ;;  %v3154_v43 = vadd.f32 %v5798_v10, %v3153_v17 }
 0xcfe   :  { %3194 = vst [vmem:[%s5934_s6 + $0xe8] sm:$0xff] %v3154_v43 }

</bundles_post_ra>
